<compile_context>
chip_gen: v7x
topology: tpu7x:2x2x1
jax: 0.10.0
libtpu: 0.0.40
codegen_flags: <defaults>
</compile_context>

<pallas_src>
import functools

import jax
import jax.numpy as jnp
from jax import lax
from jax.experimental import pallas as pl
from jax.experimental.pallas import tpu as pltpu

EPS = 1e-8
LAMBDA_SOFTMAX = 9.0   # opt.lambda_softmax
NEG_INF = -1e30


# ----------------------------------------------------------------------------
# plain-JAX helpers (exact ports of the torch helpers)
# ----------------------------------------------------------------------------
def l2norm(x, axis, eps=EPS):
    n = jnp.sum(x * x, axis=axis, keepdims=True)
    n = jnp.sqrt(n + eps) + eps
    return x / n


def _round_up(x, m):
    return (x + m - 1) // m * m


# ----------------------------------------------------------------------------
# Pallas kernel 1: tiled image FC projection (EncoderImagePrecomp.fc)
# ----------------------------------------------------------------------------
def _matmul_kernel(x_ref, w_ref, b_ref, o_ref, acc_ref):
    @pl.when(pl.program_id(2) == 0)
    def _():
        acc_ref[...] = jnp.zeros_like(acc_ref)

    acc_ref[...] += jnp.dot(x_ref[...], w_ref[...],
                            preferred_element_type=jnp.float32)

    @pl.when(pl.program_id(2) == pl.num_programs(2) - 1)
    def _():
        o_ref[...] = acc_ref[...] + b_ref[...]


def pallas_linear(x, w, b, tm=512, tn=256, tk=512):
    """y = x @ w + b: (M, N, K)-tiled bf16 matmul with an f32 accumulator."""
    M, K = x.shape
    N = w.shape[1]
    tm = min(tm, _round_up(M, 8))
    tk = min(tk, _round_up(K, 128))
    tn = min(tn, _round_up(N, 128))
    Mp, Kp, Np = _round_up(M, tm), _round_up(K, tk), _round_up(N, tn)
    xp = jnp.pad(x, ((0, Mp - M), (0, Kp - K))).astype(jnp.bfloat16)
    wp = jnp.pad(w, ((0, Kp - K), (0, Np - N))).astype(jnp.bfloat16)
    bp = jnp.pad(b, (0, Np - N)).reshape(1, Np).astype(jnp.float32)

    out = pl.pallas_call(
        _matmul_kernel,
        out_shape=jax.ShapeDtypeStruct((Mp, Np), jnp.float32),
        grid=(Mp // tm, Np // tn, Kp // tk),
        in_specs=[
            pl.BlockSpec((tm, tk), lambda i, j, k: (i, k)),
            pl.BlockSpec((tk, tn), lambda i, j, k: (k, j)),
            pl.BlockSpec((1, tn), lambda i, j, k: (0, j)),
        ],
        out_specs=pl.BlockSpec((tm, tn), lambda i, j, k: (i, j)),
        scratch_shapes=[pltpu.VMEM((tm, tn), jnp.float32)],
        compiler_params=pltpu.CompilerParams(
            dimension_semantics=("parallel", "parallel", "arbitrary")),
    )(xp, wp, bp)
    return out[:M, :N]


# ----------------------------------------------------------------------------
# Pallas kernel 2: xattn_score (the SCAN similarity hot path)
# ----------------------------------------------------------------------------
def _softmax_last(x):
    m = jnp.max(x, axis=-1, keepdims=True)
    e = jnp.exp(x - m)
    return e * pl.reciprocal(jnp.sum(e, axis=-1, keepdims=True), approx=True)


def _renorm_last(x):
    return x * pl.reciprocal(jnp.sum(x, axis=-1, keepdims=True), approx=True)


def _focal_equal(attn, sourceL):
    funcF = attn * float(sourceL) - jnp.sum(attn, axis=-1, keepdims=True)
    fattn = jnp.where(funcF > 0, jnp.ones_like(attn), jnp.zeros_like(attn))
    return _renorm_last(fattn * attn)


def _cos_scores_flat(A, raw, gram, q_norm):
    # cos(A @ context, query) computed entirely in score space:
    #   numerator  = rowsum(A * raw)         (raw[i, s] = query_i . context_s)
    #   ||ctx||^2  = A (context context^T) A^T  via the (S, S) Gram matrix.
    w12 = jnp.sum(A * raw, axis=-1, keepdims=True)
    t = jnp.dot(A, gram, preferred_element_type=jnp.float32)
    ctx_norm = jnp.sqrt(jnp.maximum(jnp.sum(A * t, axis=-1, keepdims=True), 0.0))
    return w12 * pl.reciprocal(jnp.maximum(ctx_norm * q_norm, EPS), approx=True)


def _cos_scores_batched(A, raw, gram, q_norm):
    w12 = jnp.sum(A * raw, axis=-1, keepdims=True)
    t = jnp.einsum('bqs,bst->bqt', A, gram,
                   preferred_element_type=jnp.float32)
    ctx_norm = jnp.sqrt(jnp.maximum(jnp.sum(A * t, axis=-1, keepdims=True), 0.0))
    return w12 * pl.reciprocal(jnp.maximum(ctx_norm * q_norm, EPS), approx=True)


def _correct_equal_scores(re_attn, raw, gram, q_norm, sourceL, cos_fn):
    """correct_equal + final cosine, with all cosines in score space."""
    cos1 = cos_fn(re_attn, raw, gram, q_norm)
    cos1 = jnp.where(cos1 == 0, jnp.full_like(cos1, EPS), cos1)
    re1 = _focal_equal(re_attn, sourceL)
    cos = cos_fn(re1, raw, gram, q_norm)
    cos = jnp.where(cos == 0, jnp.full_like(cos, EPS), cos)
    delta = cos - cos1
    delta = jnp.where(delta == 0, jnp.full_like(delta, EPS), delta)
    re2 = _focal_equal(_renorm_last(delta * re1), sourceL)
    return cos_fn(re2, raw, gram, q_norm)


def _xattn_kernel(cap_ref, cgram_ref, cnorm_ref, img_ref, igram_ref,
                  inorm_ref, d_ref, out_ref, *, n_regions):
    cap = cap_ref[0]              # (L, D)       bf16 caption words
    gram_c = cgram_ref[0]         # (L, L)       f32  caption Gram
    cap_norm = cnorm_ref[0]       # (L, 1)       f32  ||caption word||
    img_flat = img_ref[...]       # (BI*Rp, D)   bf16 image regions (flat)
    gram_i = igram_ref[...]       # (BI, Rp, Rp) f32  per-image region Gram
    img_norm = inorm_ref[...]     # (BI*Rp, 1)   f32  ||image region||
    d2 = d_ref[0]                 # (BI, 1)      f32  g_sim - 0.3 per image

    L = cap.shape[0]
    BI, Rp, _ = gram_i.shape
    R = n_regions

    # Shared raw caption/region scores: the single big bf16 MXU matmul.
    raw = lax.dot_general(img_flat, cap, (((1,), (1,)), ((), ())),
                          preferred_element_type=jnp.float32)         # (BI*Rp, L)
    lrelu = jnp.where(raw > 0, raw, 0.1 * raw)                        # LeakyReLU
    raw3 = raw.reshape(BI, Rp, L)                                     # tile-aligned
    lrelu3 = lrelu.reshape(BI, Rp, L)
    d3 = d2[:, :, None]                                               # (BI, 1, 1)

    # ------------- i2t direction: query = regions, context = words --------
    ssq = jnp.sum(lrelu3 * lrelu3, axis=1, keepdims=True)             # (BI, 1, L)
    attn3 = lrelu3 * pl.reciprocal(jnp.sqrt(ssq + EPS) + EPS, approx=True)
    attn3 = _softmax_last(attn3 * LAMBDA_SOFTMAX)
    re0 = _renorm_last(d3 * attn3)
    A = re0.reshape(BI * Rp, L)
    i2t_cos = _correct_equal_scores(A, raw, gram_c, img_norm, L,
                                    _cos_scores_flat)                 # (BI*Rp, 1)
    cos3 = i2t_cos.reshape(BI, Rp, 1)
    valid_r = lax.broadcasted_iota(jnp.int32, (1, Rp, 1), 1) < R
    i2t_sim = jnp.sum(jnp.where(valid_r, cos3, 0.0),
                      axis=1) * (1.0 / R)                             # (BI, 1)

    # ------------- t2i direction: query = words, context = regions --------
    rawt = jnp.swapaxes(raw3, 1, 2)                                   # (BI, L, Rp)
    lrelut = jnp.where(rawt > 0, rawt, 0.1 * rawt)
    ssq_w = jnp.sum(lrelut * lrelut, axis=1, keepdims=True)           # l2norm over words
    attn_t = lrelut * pl.reciprocal(jnp.sqrt(ssq_w + EPS) + EPS, approx=True)
    pad_r = lax.broadcasted_iota(jnp.int32, (1, 1, Rp), 2) < R
    attn_t = _softmax_last(jnp.where(pad_r, attn_t * LAMBDA_SOFTMAX, NEG_INF))
    re0t = _renorm_last(d3 * attn_t)
    t2i_cos = _correct_equal_scores(re0t, rawt, gram_i, cap_norm, R,
                                    _cos_scores_batched)              # (BI, L, 1)
    t2i_sim = jnp.sum(t2i_cos, axis=1) * (1.0 / L)                    # (BI, 1)

    out_ref[0] = (t2i_sim + i2t_sim).astype(out_ref.dtype)


def _xattn_vmem_limit():
    cap = 64 * 1024 * 1024
    try:
        cap = int(pltpu.get_tpu_info().vmem_capacity_bytes)
    except Exception:
        pass
    return max(32 * 1024 * 1024, min(cap - 8 * 1024 * 1024, 100 * 1024 * 1024))


def xattn_score(img_emb, img_mean, cap_emb, cap_mean, img_block=None):
    n_img, R, D = img_emb.shape
    n_cap, L, _ = cap_emb.shape
    Rp = _round_up(R, 8)          # pad regions so flat <-> 3-D reshapes are aligned

    if img_block is None:
        # Keep the per-step working set (bf16 image block + score/attention
        # intermediates) comfortably inside v7x's 64 MiB VMEM.
        img_block = n_img
        if n_img > 32:
            for cand in (32, 24, 16, 8):
                if n_img % cand == 0:
                    img_block = cand
                    break
    BI = img_block
    assert n_img % BI == 0
    assert BI == n_img or BI % 8 == 0
    n_blk = n_img // BI

    # ---- wrapper-side preprocessing (cheap XLA glue, done once) ----
    img_p = jnp.pad(img_emb, ((0, 0), (0, Rp - R), (0, 0)))
    img_flat = img_p.reshape(n_img * Rp, D)
    img_norm = jnp.sqrt(jnp.sum(img_flat * img_flat, axis=-1, keepdims=True))
    img_gram = jnp.einsum('brd,bsd->brs', img_p, img_p)        # (n_img, Rp, Rp)
    cap_norm = jnp.sqrt(jnp.sum(cap_emb * cap_emb, axis=-1, keepdims=True))
    cap_gram = jnp.einsum('bld,bmd->blm', cap_emb, cap_emb)    # (n_cap, L, L)

    g_sims = cap_mean @ img_mean.T                             # (n_cap, n_img)
    d = g_sims - 0.3
    d = jnp.where(d == 0, jnp.full_like(d, EPS), d)
    d = d.reshape(n_cap, n_img, 1)

    # bf16 for the big MXU operands; norms / Grams / d stay f32.
    img_bf = img_flat.astype(jnp.bfloat16)
    cap_bf = cap_emb.astype(jnp.bfloat16)

    kernel = functools.partial(_xattn_kernel, n_regions=R)

    sims = pl.pallas_call(
        kernel,
        out_shape=jax.ShapeDtypeStruct((n_cap, n_img, 1), jnp.float32),
        grid=(n_blk, n_cap),   # captions fastest -> image block revisited, not re-fetched
        in_specs=[
            pl.BlockSpec((1, L, D), lambda j, i: (i, 0, 0)),      # caption (bf16)
            pl.BlockSpec((1, L, L), lambda j, i: (i, 0, 0)),      # caption Gram
            pl.BlockSpec((1, L, 1), lambda j, i: (i, 0, 0)),      # ||caption word||
            pl.BlockSpec((BI * Rp, D), lambda j, i: (j, 0)),      # image block (flat bf16)
            pl.BlockSpec((BI, Rp, Rp), lambda j, i: (j, 0, 0)),   # per-image region Gram
            pl.BlockSpec((BI * Rp, 1), lambda j, i: (j, 0)),      # ||image region||
            pl.BlockSpec((1, BI, 1), lambda j, i: (i, j, 0)),     # d = g_sim - 0.3
        ],
        out_specs=pl.BlockSpec((1, BI, 1), lambda j, i: (i, j, 0)),
        compiler_params=pltpu.CompilerParams(
            dimension_semantics=("parallel", "parallel"),
            vmem_limit_bytes=_xattn_vmem_limit()),
    )(cap_bf, cap_gram, cap_norm, img_bf, img_gram, img_norm, d)

    # eval-mode SCAN: rows = images, columns = captions
    return jnp.transpose(sims[:, :, 0])


# ----------------------------------------------------------------------------
# encoders / self-attention enhancement (plain-JAX glue, eval mode)
# ----------------------------------------------------------------------------
def encoder_image(images, W, b):
    n_img, R, img_dim = images.shape
    feat = pallas_linear(images.reshape(n_img * R, img_dim), W, b)
    feat = feat.reshape(n_img, R, -1)
    feat_mean = jnp.mean(feat, axis=1)
    feat = l2norm(feat, axis=-1)          # no_imgnorm=False
    return feat, feat_mean


def _gru_direction(x, Wih, Whh, bih, bhh, reverse=False):
    # x: (B, L, Din) -> (B, L, H); PyTorch GRU gate order (r, z, n)
    B, L, _ = x.shape
    H = Whh.shape[1]
    xs = jnp.swapaxes(x, 0, 1)
    if reverse:
        xs = xs[::-1]

    def step(h, x_t):
        gi = x_t @ Wih.T + bih
        gh = h @ Whh.T + bhh
        r = jax.nn.sigmoid(gi[:, :H] + gh[:, :H])
        z = jax.nn.sigmoid(gi[:, H:2 * H] + gh[:, H:2 * H])
        n = jnp.tanh(gi[:, 2 * H:] + r * gh[:, 2 * H:])
        h_new = (1.0 - z) * n + z * h
        return h_new, h_new

    _, hs = lax.scan(step, jnp.zeros((B, H), jnp.float32), xs)
    if reverse:
        hs = hs[::-1]
    return jnp.swapaxes(hs, 0, 1)


def encoder_text(captions, p):
    # TODO(synk): pack_padded_sequence / variable caption lengths not modeled;
    # all captions use the full sequence length (GloVe init replaced by random).
    x = p['embed'][captions]                              # (B, L, word_dim)
    hf = _gru_direction(x, p['Wih_f'], p['Whh_f'], p['bih_f'], p['bhh_f'])
    hb = _gru_direction(x, p['Wih_b'], p['Whh_b'], p['bih_b'], p['bhh_b'],
                        reverse=True)
    cap_emb = (hf + hb) / 2.0                             # average bi-GRU halves
    cap_mean = jnp.mean(cap_emb, axis=1)
    cap_emb = l2norm(cap_emb, axis=-1)                    # no_txtnorm=False
    cap_mean = l2norm(cap_mean, axis=1)
    return cap_emb, cap_mean


def single_modal_atten(feats, mem, p):
    # V_/T_single_modal_atten in eval mode: BatchNorm1d and Dropout are identity
    W_f = jnp.tanh(feats @ p['W1'] + p['b1'])             # (B, N, E)
    W_m = jnp.tanh(mem @ p['W2'] + p['b2'])               # (B, E)
    h = W_f * W_m[:, None, :]
    a = (h @ p['W3'] + p['b3'])[..., 0]                   # (B, N)
    w = jax.nn.softmax(a, axis=1)
    att = jnp.sum(w[:, :, None] * feats, axis=1)
    return l2norm(att, axis=-1), w


def scan_forward(images, captions, lengths, params):
    del lengths  # all captions full length (see TODO in encoder_text)
    img_emb, img_mean = encoder_image(images, params['img_W'], params['img_b'])
    cap_emb, cap_mean = encoder_text(captions, params)
    img_mean, _ = single_modal_atten(img_emb, img_mean, params['v_att'])
    cap_mean, _ = single_modal_atten(cap_emb, cap_mean, params['t_att'])
    return xattn_score(img_emb, img_mean, cap_emb, cap_mean)


# ----------------------------------------------------------------------------
if __name__ == "__main__":
    key = jax.random.PRNGKey(0)
    n_img, n_cap = 2, 2
    n_regions = 36        # img_region_num (BatchNorm1d(36) in V_single_modal_atten)
    seq_len = 8
    img_dim = 64          # opt.img_dim
    word_dim = 48         # opt.word_dim
    embed = 32            # opt.embed_size
    vocab = 100           # opt.vocab_size
    ks = jax.random.split(key, 32)

    def unif(k, shape, s):
        return jax.random.uniform(k, shape, jnp.float32, -s, s)

    r_img = (6.0 / (img_dim + embed)) ** 0.5
    s_gru = 1.0 / embed ** 0.5
    s_lin = 1.0 / embed ** 0.5

    params = {
        'img_W': unif(ks[0], (img_dim, embed), r_img),
        'img_b': jnp.zeros((embed,), jnp.float32),
        'embed': 0.1 * jax.random.normal(ks[1], (vocab, word_dim), jnp.float32),
        'Wih_f': unif(ks[2], (3 * embed, word_dim), s_gru),
        'Whh_f': unif(ks[3], (3 * embed, embed), s_gru),
        'bih_f': unif(ks[4], (3 * embed,), s_gru),
        'bhh_f': unif(ks[5], (3 * embed,), s_gru),
        'Wih_b': unif(ks[6], (3 * embed, word_dim), s_gru),
        'Whh_b': unif(ks[7], (3 * embed, embed), s_gru),
        'bih_b': unif(ks[8], (3 * embed,), s_gru),
        'bhh_b': unif(ks[9], (3 * embed,), s_gru),
        'v_att': {
            'W1': unif(ks[10], (embed, embed), s_lin), 'b1': unif(ks[11], (embed,), s_lin),
            'W2': unif(ks[12], (embed, embed), s_lin), 'b2': unif(ks[13], (embed,), s_lin),
            'W3': unif(ks[14], (embed, 1), s_lin),     'b3': unif(ks[15], (1,), s_lin),
        },
        't_att': {
            'W1': unif(ks[16], (embed, embed), s_lin), 'b1': unif(ks[17], (embed,), s_lin),
            'W2': unif(ks[18], (embed, embed), s_lin), 'b2': unif(ks[19], (embed,), s_lin),
            'W3': unif(ks[20], (embed, 1), s_lin),     'b3': unif(ks[21], (1,), s_lin),
        },
    }

    images = jax.random.normal(ks[22], (n_img, n_regions, img_dim), jnp.float32)
    captions = jax.random.randint(ks[23], (n_cap, seq_len), 0, vocab)
    lengths = jnp.full((n_cap,), seq_len, jnp.int32)

    scores = jax.jit(scan_forward)(images, captions, lengths, params)
    scores = jax.block_until_ready(scores)
    assert scores.shape == (n_img, n_cap)
    print("KERNEL_OK")
</pallas_src>

<mosaic_0001>
module attributes {stable_mosaic.version = 11 : i64} {
  func.func @_matmul_kernel(%arg0: i32, %arg1: i32, %arg2: i32, %arg3: memref<72x128xbf16, #tpu.memory_space<vmem>>, %arg4: memref<128x128xbf16, #tpu.memory_space<vmem>>, %arg5: memref<1x128xf32, #tpu.memory_space<vmem>>, %arg6: memref<72x128xf32, #tpu.memory_space<vmem>>, %arg7: memref<72x128xf32, #tpu.memory_space<vmem>>) attributes {dimension_semantics = [#tpu.dimension_semantics<parallel>, #tpu.dimension_semantics<parallel>, #tpu.dimension_semantics<arbitrary>], iteration_bounds = array<i64: 1, 1, 1>, scalar_prefetch = 0 : i64, scratch_operands = 1 : i64, tpu.core_type = #tpu.core_type<tc>, window_params = [{transform_indices = @transform_0, window_bounds = array<i64: 72, 128>}, {transform_indices = @transform_1, window_bounds = array<i64: 128, 128>}, {transform_indices = @transform_2, window_bounds = array<i64: 1, 128>}, {transform_indices = @transform_3, window_bounds = array<i64: 72, 128>}]} {
    %c0_i32 = arith.constant 0 : i32
    %0 = arith.cmpi eq, %arg2, %c0_i32 : i32
    %1 = arith.extui %0 : i1 to i32
    %c0_i32_0 = arith.constant 0 : i32
    %2 = arith.cmpi ne, %1, %c0_i32_0 : i32
    scf.if %2 {
      %cst_10 = arith.constant 0.000000e+00 : f32
      %12 = vector.broadcast %cst_10 : f32 to vector<72x128xf32>
      %c0_11 = arith.constant 0 : index
      %c0_12 = arith.constant 0 : index
      %13 = vector.load %arg7[%c0_11, %c0_12] : memref<72x128xf32, #tpu.memory_space<vmem>>, vector<72x128xf32>
      tpu.vector_store %arg7[%c0_11, %c0_12], %12 {strides = array<i32>} : memref<72x128xf32, #tpu.memory_space<vmem>>, vector<72x128xf32>,
    } else {
    }
    %c0 = arith.constant 0 : index
    %c0_1 = arith.constant 0 : index
    %3 = vector.load %arg7[%c0, %c0_1] : memref<72x128xf32, #tpu.memory_space<vmem>>, vector<72x128xf32>
    %c0_2 = arith.constant 0 : index
    %c0_3 = arith.constant 0 : index
    %4 = vector.load %arg3[%c0_2, %c0_3] : memref<72x128xbf16, #tpu.memory_space<vmem>>, vector<72x128xbf16>
    %c0_4 = arith.constant 0 : index
    %c0_5 = arith.constant 0 : index
    %5 = vector.load %arg4[%c0_4, %c0_5] : memref<128x128xbf16, #tpu.memory_space<vmem>>, vector<128x128xbf16>
    %cst = arith.constant dense<0.000000e+00> : vector<72x128xf32>
    %6 = tpu.matmul %4, %5, %cst {dimension_numbers = #tpu.dot_dimension_numbers<[1], [0], [0], [1], [0, 0, 1, 1], [], []>} : vector<72x128xbf16>, vector<128x128xbf16>, vector<72x128xf32> -> vector<72x128xf32>
    %7 = arith.addf %3, %6 : vector<72x128xf32>
    %c0_6 = arith.constant 0 : index
    %c0_7 = arith.constant 0 : index
    %8 = vector.load %arg7[%c0_6, %c0_7] : memref<72x128xf32, #tpu.memory_space<vmem>>, vector<72x128xf32>
    tpu.vector_store %arg7[%c0_6, %c0_7], %7 {strides = array<i32>} : memref<72x128xf32, #tpu.memory_space<vmem>>, vector<72x128xf32>,
    %c0_i32_8 = arith.constant 0 : i32
    %9 = arith.cmpi eq, %arg2, %c0_i32_8 : i32
    %10 = arith.extui %9 : i1 to i32
    %c0_i32_9 = arith.constant 0 : i32
    %11 = arith.cmpi ne, %10, %c0_i32_9 : i32
    scf.if %11 {
      %c0_10 = arith.constant 0 : index
      %c0_11 = arith.constant 0 : index
      %12 = vector.load %arg7[%c0_10, %c0_11] : memref<72x128xf32, #tpu.memory_space<vmem>>, vector<72x128xf32>
      %c0_12 = arith.constant 0 : index
      %c0_13 = arith.constant 0 : index
      %13 = vector.load %arg5[%c0_12, %c0_13] : memref<1x128xf32, #tpu.memory_space<vmem>>, vector<1x128xf32>
      %14 = vector.broadcast %13 : vector<1x128xf32> to vector<72x128xf32>
      %15 = arith.addf %12, %14 : vector<72x128xf32>
      %c0_14 = arith.constant 0 : index
      %c0_15 = arith.constant 0 : index
      %16 = vector.load %arg6[%c0_14, %c0_15] : memref<72x128xf32, #tpu.memory_space<vmem>>, vector<72x128xf32>
      tpu.vector_store %arg6[%c0_14, %c0_15], %15 {strides = array<i32>} : memref<72x128xf32, #tpu.memory_space<vmem>>, vector<72x128xf32>,
    } else {
    }
    return
  }
  func.func @transform_0(%arg0: i32, %arg1: i32, %arg2: i32) -> (i32, i32) {
    %c0_i32 = arith.constant 0 : i32
    return %arg0, %arg2 : i32, i32
  }
  func.func @transform_1(%arg0: i32, %arg1: i32, %arg2: i32) -> (i32, i32) {
    %c0_i32 = arith.constant 0 : i32
    return %arg2, %arg1 : i32, i32
  }
  func.func @transform_2(%arg0: i32, %arg1: i32, %arg2: i32) -> (i32, i32) {
    %c0_i32 = arith.constant 0 : i32
    %c0_i32_0 = arith.constant 0 : i32
    return %c0_i32, %arg1 : i32, i32
  }
  func.func @transform_3(%arg0: i32, %arg1: i32, %arg2: i32) -> (i32, i32) {
    %c0_i32 = arith.constant 0 : i32
    return %arg0, %arg1 : i32, i32
  }
}

module attributes {stable_mosaic.version = 11 : i64} {
  func.func @_xattn_kernel(%arg0: i32, %arg1: i32, %arg2: memref<1x8x32xbf16, #tpu.memory_space<vmem>>, %arg3: memref<1x8x8xf32, #tpu.memory_space<vmem>>, %arg4: memref<1x8x1xf32, #tpu.memory_space<vmem>>, %arg5: memref<80x32xbf16, #tpu.memory_space<vmem>>, %arg6: memref<2x40x40xf32, #tpu.memory_space<vmem>>, %arg7: memref<80x1xf32, #tpu.memory_space<vmem>>, %arg8: memref<1x2x1xf32, #tpu.memory_space<vmem>>, %arg9: memref<1x2x1xf32, #tpu.memory_space<vmem>>) attributes {dimension_semantics = [#tpu.dimension_semantics<parallel>, #tpu.dimension_semantics<parallel>], iteration_bounds = array<i64: 1, 2>, scalar_prefetch = 0 : i64, scratch_operands = 0 : i64, tpu.core_type = #tpu.core_type<tc>, window_params = [{transform_indices = @transform_0, window_bounds = array<i64: 1, 8, 32>}, {transform_indices = @transform_1, window_bounds = array<i64: 1, 8, 8>}, {transform_indices = @transform_2, window_bounds = array<i64: 1, 8, 1>}, {transform_indices = @transform_3, window_bounds = array<i64: 80, 32>}, {transform_indices = @transform_4, window_bounds = array<i64: 2, 40, 40>}, {transform_indices = @transform_5, window_bounds = array<i64: 80, 1>}, {transform_indices = @transform_6, window_bounds = array<i64: 1, 2, 1>}, {transform_indices = @transform_7, window_bounds = array<i64: 1, 2, 1>}]} {
    %c0 = arith.constant 0 : index
    %c0_0 = arith.constant 0 : index
    %c0_1 = arith.constant 0 : index
    %0 = vector.load %arg2[%c0, %c0_0, %c0_1] : memref<1x8x32xbf16, #tpu.memory_space<vmem>>, vector<1x8x32xbf16>
    %1 = vector.shape_cast %0 : vector<1x8x32xbf16> to vector<8x32xbf16>
    %c0_2 = arith.constant 0 : index
    %c0_3 = arith.constant 0 : index
    %c0_4 = arith.constant 0 : index
    %2 = vector.load %arg3[%c0_2, %c0_3, %c0_4] : memref<1x8x8xf32, #tpu.memory_space<vmem>>, vector<1x8x8xf32>
    %3 = vector.shape_cast %2 : vector<1x8x8xf32> to vector<8x8xf32>
    %c0_5 = arith.constant 0 : index
    %c0_6 = arith.constant 0 : index
    %c0_7 = arith.constant 0 : index
    %4 = vector.load %arg4[%c0_5, %c0_6, %c0_7] : memref<1x8x1xf32, #tpu.memory_space<vmem>>, vector<1x8x1xf32>
    %5 = vector.shape_cast %4 : vector<1x8x1xf32> to vector<8x1xf32>
    %c0_8 = arith.constant 0 : index
    %c0_9 = arith.constant 0 : index
    %6 = vector.load %arg5[%c0_8, %c0_9] : memref<80x32xbf16, #tpu.memory_space<vmem>>, vector<80x32xbf16>
    %c0_10 = arith.constant 0 : index
    %c0_11 = arith.constant 0 : index
    %c0_12 = arith.constant 0 : index
    %7 = vector.load %arg6[%c0_10, %c0_11, %c0_12] : memref<2x40x40xf32, #tpu.memory_space<vmem>>, vector<2x40x40xf32>
    %c0_13 = arith.constant 0 : index
    %c0_14 = arith.constant 0 : index
    %8 = vector.load %arg7[%c0_13, %c0_14] : memref<80x1xf32, #tpu.memory_space<vmem>>, vector<80x1xf32>
    %c0_15 = arith.constant 0 : index
    %c0_16 = arith.constant 0 : index
    %c0_17 = arith.constant 0 : index
    %9 = vector.load %arg8[%c0_15, %c0_16, %c0_17] : memref<1x2x1xf32, #tpu.memory_space<vmem>>, vector<1x2x1xf32>
    %10 = vector.shape_cast %9 : vector<1x2x1xf32> to vector<2x1xf32>
    %cst = arith.constant dense<0.000000e+00> : vector<80x8xf32>
    %11 = tpu.matmul %6, %1, %cst {dimension_numbers = #tpu.dot_dimension_numbers<[1], [1], [0], [0], [0, 0, 1, 0], [], []>} : vector<80x32xbf16>, vector<8x32xbf16>, vector<80x8xf32> -> vector<80x8xf32>
    %cst_18 = arith.constant 0.000000e+00 : f32
    %12 = vector.broadcast %cst_18 : f32 to vector<80x8xf32>
    %13 = arith.cmpf ogt, %11, %12 : vector<80x8xf32>
    %cst_19 = arith.constant 1.000000e-01 : f32
    %14 = vector.broadcast %cst_19 : f32 to vector<80x8xf32>
    %15 = arith.mulf %14, %11 : vector<80x8xf32>
    %16 = arith.select %13, %11, %15 : vector<80x8xi1>, vector<80x8xf32>
    %17 = vector.shape_cast %11 : vector<80x8xf32> to vector<2x40x8xf32>
    %18 = vector.shape_cast %16 : vector<80x8xf32> to vector<2x40x8xf32>
    %19 = vector.shape_cast %10 : vector<2x1xf32> to vector<2x1x1xf32>
    %20 = arith.mulf %18, %18 : vector<2x40x8xf32>
    %cst_20 = arith.constant dense<0.000000e+00> : vector<2x8xf32>
    %21 = vector.multi_reduction <add>, %20, %cst_20 [1] : vector<2x40x8xf32> to vector<2x8xf32>
    %22 = vector.shape_cast %21 : vector<2x8xf32> to vector<2x1x8xf32>
    %cst_21 = arith.constant 9.99999993E-9 : f32
    %23 = vector.broadcast %cst_21 : f32 to vector<2x1x8xf32>
    %24 = arith.addf %22, %23 : vector<2x1x8xf32>
    %25 = math.sqrt %24 : vector<2x1x8xf32>
    %cst_22 = arith.constant 9.99999993E-9 : f32
    %26 = vector.broadcast %cst_22 : f32 to vector<2x1x8xf32>
    %27 = arith.addf %25, %26 : vector<2x1x8xf32>
    %28 = tpu.reciprocal %27 {approx = true} : vector<2x1x8xf32> -> vector<2x1x8xf32>
    %29 = vector.broadcast %28 : vector<2x1x8xf32> to vector<2x40x8xf32>
    %30 = arith.mulf %18, %29 : vector<2x40x8xf32>
    %cst_23 = arith.constant 9.000000e+00 : f32
    %31 = vector.broadcast %cst_23 : f32 to vector<2x40x8xf32>
    %32 = arith.mulf %30, %31 : vector<2x40x8xf32>
    %cst_24 = arith.constant dense<0xFF800000> : vector<2x40xf32>
    %33 = vector.multi_reduction <maximumf>, %32, %cst_24 [2] : vector<2x40x8xf32> to vector<2x40xf32>
    %34 = vector.shape_cast %33 : vector<2x40xf32> to vector<2x40x1xf32>
    %35 = vector.broadcast %34 : vector<2x40x1xf32> to vector<2x40x8xf32>
    %36 = arith.subf %32, %35 : vector<2x40x8xf32>
    %37 = math.exp %36 : vector<2x40x8xf32>
    %cst_25 = arith.constant dense<0.000000e+00> : vector<2x40xf32>
    %38 = vector.multi_reduction <add>, %37, %cst_25 [2] : vector<2x40x8xf32> to vector<2x40xf32>
    %39 = vector.shape_cast %38 : vector<2x40xf32> to vector<2x40x1xf32>
    %40 = tpu.reciprocal %39 {approx = true} : vector<2x40x1xf32> -> vector<2x40x1xf32>
    %41 = vector.broadcast %40 : vector<2x40x1xf32> to vector<2x40x8xf32>
    %42 = arith.mulf %37, %41 : vector<2x40x8xf32>
    %43 = vector.broadcast %19 : vector<2x1x1xf32> to vector<2x40x8xf32>
    %44 = arith.mulf %43, %42 : vector<2x40x8xf32>
    %cst_26 = arith.constant dense<0.000000e+00> : vector<2x40xf32>
    %45 = vector.multi_reduction <add>, %44, %cst_26 [2] : vector<2x40x8xf32> to vector<2x40xf32>
    %46 = vector.shape_cast %45 : vector<2x40xf32> to vector<2x40x1xf32>
    %47 = tpu.reciprocal %46 {approx = true} : vector<2x40x1xf32> -> vector<2x40x1xf32>
    %48 = vector.broadcast %47 : vector<2x40x1xf32> to vector<2x40x8xf32>
    %49 = arith.mulf %44, %48 : vector<2x40x8xf32>
    %50 = vector.shape_cast %49 : vector<2x40x8xf32> to vector<80x8xf32>
    %51 = arith.mulf %50, %11 : vector<80x8xf32>
    %cst_27 = arith.constant dense<0.000000e+00> : vector<80xf32>
    %52 = vector.multi_reduction <add>, %51, %cst_27 [1] : vector<80x8xf32> to vector<80xf32>
    %53 = vector.shape_cast %52 : vector<80xf32> to vector<80x1xf32>
    %cst_28 = arith.constant dense<0.000000e+00> : vector<80x8xf32>
    %54 = tpu.matmul %50, %3, %cst_28 {dimension_numbers = #tpu.dot_dimension_numbers<[1], [0], [0], [1], [0, 0, 1, 1], [], []>} : vector<80x8xf32>, vector<8x8xf32>, vector<80x8xf32> -> vector<80x8xf32>
    %55 = arith.mulf %50, %54 : vector<80x8xf32>
    %cst_29 = arith.constant dense<0.000000e+00> : vector<80xf32>
    %56 = vector.multi_reduction <add>, %55, %cst_29 [1] : vector<80x8xf32> to vector<80xf32>
    %57 = vector.shape_cast %56 : vector<80xf32> to vector<80x1xf32>
    %cst_30 = arith.constant 0.000000e+00 : f32
    %58 = vector.broadcast %cst_30 : f32 to vector<80x1xf32>
    %59 = arith.maximumf %57, %58 : vector<80x1xf32>
    %60 = math.sqrt %59 : vector<80x1xf32>
    %61 = arith.mulf %60, %8 : vector<80x1xf32>
    %cst_31 = arith.constant 9.99999993E-9 : f32
    %62 = vector.broadcast %cst_31 : f32 to vector<80x1xf32>
    %63 = arith.maximumf %61, %62 : vector<80x1xf32>
    %64 = tpu.reciprocal %63 {approx = true} : vector<80x1xf32> -> vector<80x1xf32>
    %65 = arith.mulf %53, %64 : vector<80x1xf32>
    %cst_32 = arith.constant 0.000000e+00 : f32
    %66 = vector.broadcast %cst_32 : f32 to vector<80x1xf32>
    %67 = arith.cmpf oeq, %65, %66 : vector<80x1xf32>
    %cst_33 = arith.constant 9.99999993E-9 : f32
    %68 = vector.broadcast %cst_33 : f32 to vector<80x1xf32>
    %69 = arith.select %67, %68, %65 : vector<80x1xi1>, vector<80x1xf32>
    %cst_34 = arith.constant 8.000000e+00 : f32
    %70 = vector.broadcast %cst_34 : f32 to vector<80x8xf32>
    %71 = arith.mulf %50, %70 : vector<80x8xf32>
    %cst_35 = arith.constant dense<0.000000e+00> : vector<80xf32>
    %72 = vector.multi_reduction <add>, %50, %cst_35 [1] : vector<80x8xf32> to vector<80xf32>
    %73 = vector.shape_cast %72 : vector<80xf32> to vector<80x1xf32>
    %74 = vector.broadcast %73 : vector<80x1xf32> to vector<80x8xf32>
    %75 = arith.subf %71, %74 : vector<80x8xf32>
    %cst_36 = arith.constant 0.000000e+00 : f32
    %76 = vector.broadcast %cst_36 : f32 to vector<80x8xf32>
    %77 = arith.cmpf ogt, %75, %76 : vector<80x8xf32>
    %cst_37 = arith.constant 1.000000e+00 : f32
    %78 = vector.broadcast %cst_37 : f32 to vector<80x8xf32>
    %cst_38 = arith.constant 0.000000e+00 : f32
    %79 = vector.broadcast %cst_38 : f32 to vector<80x8xf32>
    %80 = arith.select %77, %78, %79 : vector<80x8xi1>, vector<80x8xf32>
    %81 = arith.mulf %80, %50 : vector<80x8xf32>
    %cst_39 = arith.constant dense<0.000000e+00> : vector<80xf32>
    %82 = vector.multi_reduction <add>, %81, %cst_39 [1] : vector<80x8xf32> to vector<80xf32>
    %83 = vector.shape_cast %82 : vector<80xf32> to vector<80x1xf32>
    %84 = tpu.reciprocal %83 {approx = true} : vector<80x1xf32> -> vector<80x1xf32>
    %85 = vector.broadcast %84 : vector<80x1xf32> to vector<80x8xf32>
    %86 = arith.mulf %81, %85 : vector<80x8xf32>
    %87 = arith.mulf %86, %11 : vector<80x8xf32>
    %cst_40 = arith.constant dense<0.000000e+00> : vector<80xf32>
    %88 = vector.multi_reduction <add>, %87, %cst_40 [1] : vector<80x8xf32> to vector<80xf32>
    %89 = vector.shape_cast %88 : vector<80xf32> to vector<80x1xf32>
    %cst_41 = arith.constant dense<0.000000e+00> : vector<80x8xf32>
    %90 = tpu.matmul %86, %3, %cst_41 {dimension_numbers = #tpu.dot_dimension_numbers<[1], [0], [0], [1], [0, 0, 1, 1], [], []>} : vector<80x8xf32>, vector<8x8xf32>, vector<80x8xf32> -> vector<80x8xf32>
    %91 = arith.mulf %86, %90 : vector<80x8xf32>
    %cst_42 = arith.constant dense<0.000000e+00> : vector<80xf32>
    %92 = vector.multi_reduction <add>, %91, %cst_42 [1] : vector<80x8xf32> to vector<80xf32>
    %93 = vector.shape_cast %92 : vector<80xf32> to vector<80x1xf32>
    %cst_43 = arith.constant 0.000000e+00 : f32
    %94 = vector.broadcast %cst_43 : f32 to vector<80x1xf32>
    %95 = arith.maximumf %93, %94 : vector<80x1xf32>
    %96 = math.sqrt %95 : vector<80x1xf32>
    %97 = arith.mulf %96, %8 : vector<80x1xf32>
    %cst_44 = arith.constant 9.99999993E-9 : f32
    %98 = vector.broadcast %cst_44 : f32 to vector<80x1xf32>
    %99 = arith.maximumf %97, %98 : vector<80x1xf32>
    %100 = tpu.reciprocal %99 {approx = true} : vector<80x1xf32> -> vector<80x1xf32>
    %101 = arith.mulf %89, %100 : vector<80x1xf32>
    %cst_45 = arith.constant 0.000000e+00 : f32
    %102 = vector.broadcast %cst_45 : f32 to vector<80x1xf32>
    %103 = arith.cmpf oeq, %101, %102 : vector<80x1xf32>
    %cst_46 = arith.constant 9.99999993E-9 : f32
    %104 = vector.broadcast %cst_46 : f32 to vector<80x1xf32>
    %105 = arith.select %103, %104, %101 : vector<80x1xi1>, vector<80x1xf32>
    %106 = arith.subf %105, %69 : vector<80x1xf32>
    %cst_47 = arith.constant 0.000000e+00 : f32
    %107 = vector.broadcast %cst_47 : f32 to vector<80x1xf32>
    %108 = arith.cmpf oeq, %106, %107 : vector<80x1xf32>
    %cst_48 = arith.constant 9.99999993E-9 : f32
    %109 = vector.broadcast %cst_48 : f32 to vector<80x1xf32>
    %110 = arith.select %108, %109, %106 : vector<80x1xi1>, vector<80x1xf32>
    %111 = vector.broadcast %110 : vector<80x1xf32> to vector<80x8xf32>
    %112 = arith.mulf %111, %86 : vector<80x8xf32>
    %cst_49 = arith.constant dense<0.000000e+00> : vector<80xf32>
    %113 = vector.multi_reduction <add>, %112, %cst_49 [1] : vector<80x8xf32> to vector<80xf32>
    %114 = vector.shape_cast %113 : vector<80xf32> to vector<80x1xf32>
    %115 = tpu.reciprocal %114 {approx = true} : vector<80x1xf32> -> vector<80x1xf32>
    %116 = vector.broadcast %115 : vector<80x1xf32> to vector<80x8xf32>
    %117 = arith.mulf %112, %116 : vector<80x8xf32>
    %cst_50 = arith.constant 8.000000e+00 : f32
    %118 = vector.broadcast %cst_50 : f32 to vector<80x8xf32>
    %119 = arith.mulf %117, %118 : vector<80x8xf32>
    %cst_51 = arith.constant dense<0.000000e+00> : vector<80xf32>
    %120 = vector.multi_reduction <add>, %117, %cst_51 [1] : vector<80x8xf32> to vector<80xf32>
    %121 = vector.shape_cast %120 : vector<80xf32> to vector<80x1xf32>
    %122 = vector.broadcast %121 : vector<80x1xf32> to vector<80x8xf32>
    %123 = arith.subf %119, %122 : vector<80x8xf32>
    %cst_52 = arith.constant 0.000000e+00 : f32
    %124 = vector.broadcast %cst_52 : f32 to vector<80x8xf32>
    %125 = arith.cmpf ogt, %123, %124 : vector<80x8xf32>
    %cst_53 = arith.constant 1.000000e+00 : f32
    %126 = vector.broadcast %cst_53 : f32 to vector<80x8xf32>
    %cst_54 = arith.constant 0.000000e+00 : f32
    %127 = vector.broadcast %cst_54 : f32 to vector<80x8xf32>
    %128 = arith.select %125, %126, %127 : vector<80x8xi1>, vector<80x8xf32>
    %129 = arith.mulf %128, %117 : vector<80x8xf32>
    %cst_55 = arith.constant dense<0.000000e+00> : vector<80xf32>
    %130 = vector.multi_reduction <add>, %129, %cst_55 [1] : vector<80x8xf32> to vector<80xf32>
    %131 = vector.shape_cast %130 : vector<80xf32> to vector<80x1xf32>
    %132 = tpu.reciprocal %131 {approx = true} : vector<80x1xf32> -> vector<80x1xf32>
    %133 = vector.broadcast %132 : vector<80x1xf32> to vector<80x8xf32>
    %134 = arith.mulf %129, %133 : vector<80x8xf32>
    %135 = arith.mulf %134, %11 : vector<80x8xf32>
    %cst_56 = arith.constant dense<0.000000e+00> : vector<80xf32>
    %136 = vector.multi_reduction <add>, %135, %cst_56 [1] : vector<80x8xf32> to vector<80xf32>
    %137 = vector.shape_cast %136 : vector<80xf32> to vector<80x1xf32>
    %cst_57 = arith.constant dense<0.000000e+00> : vector<80x8xf32>
    %138 = tpu.matmul %134, %3, %cst_57 {dimension_numbers = #tpu.dot_dimension_numbers<[1], [0], [0], [1], [0, 0, 1, 1], [], []>} : vector<80x8xf32>, vector<8x8xf32>, vector<80x8xf32> -> vector<80x8xf32>
    %139 = arith.mulf %134, %138 : vector<80x8xf32>
    %cst_58 = arith.constant dense<0.000000e+00> : vector<80xf32>
    %140 = vector.multi_reduction <add>, %139, %cst_58 [1] : vector<80x8xf32> to vector<80xf32>
    %141 = vector.shape_cast %140 : vector<80xf32> to vector<80x1xf32>
    %cst_59 = arith.constant 0.000000e+00 : f32
    %142 = vector.broadcast %cst_59 : f32 to vector<80x1xf32>
    %143 = arith.maximumf %141, %142 : vector<80x1xf32>
    %144 = math.sqrt %143 : vector<80x1xf32>
    %145 = arith.mulf %144, %8 : vector<80x1xf32>
    %cst_60 = arith.constant 9.99999993E-9 : f32
    %146 = vector.broadcast %cst_60 : f32 to vector<80x1xf32>
    %147 = arith.maximumf %145, %146 : vector<80x1xf32>
    %148 = tpu.reciprocal %147 {approx = true} : vector<80x1xf32> -> vector<80x1xf32>
    %149 = arith.mulf %137, %148 : vector<80x1xf32>
    %150 = vector.shape_cast %149 : vector<80x1xf32> to vector<2x40x1xf32>
    %151 = tpu.iota {dimensions = array<i32: 1>} : vector<1x40x1xi32>
    %c36_i32 = arith.constant 36 : i32
    %152 = vector.broadcast %c36_i32 : i32 to vector<1x40x1xi32>
    %153 = arith.cmpi slt, %151, %152 : vector<1x40x1xi32>
    %cst_61 = arith.constant 0.000000e+00 : f32
    %154 = vector.shape_cast %153 : vector<1x40x1xi1> to vector<1x40x1xi1>
    %155 = vector.broadcast %154 : vector<1x40x1xi1> to vector<2x40x1xi1>
    %156 = vector.broadcast %cst_61 : f32 to vector<2x40x1xf32>
    %157 = arith.select %155, %150, %156 : vector<2x40x1xi1>, vector<2x40x1xf32>
    %cst_62 = arith.constant dense<0.000000e+00> : vector<2x1xf32>
    %158 = vector.multi_reduction <add>, %157, %cst_62 [1] : vector<2x40x1xf32> to vector<2x1xf32>
    %cst_63 = arith.constant 0.027777778 : f32
    %159 = vector.broadcast %cst_63 : f32 to vector<2x1xf32>
    %160 = arith.mulf %158, %159 : vector<2x1xf32>
    %161 = tpu.transpose %17, [0, 2, 1] : vector<2x40x8xf32> -> vector<2x8x40xf32>
    %cst_64 = arith.constant 0.000000e+00 : f32
    %162 = vector.broadcast %cst_64 : f32 to vector<2x8x40xf32>
    %163 = arith.cmpf ogt, %161, %162 : vector<2x8x40xf32>
    %cst_65 = arith.constant 1.000000e-01 : f32
    %164 = vector.broadcast %cst_65 : f32 to vector<2x8x40xf32>
    %165 = arith.mulf %164, %161 : vector<2x8x40xf32>
    %166 = arith.select %163, %161, %165 : vector<2x8x40xi1>, vector<2x8x40xf32>
    %167 = arith.mulf %166, %166 : vector<2x8x40xf32>
    %cst_66 = arith.constant dense<0.000000e+00> : vector<2x40xf32>
    %168 = vector.multi_reduction <add>, %167, %cst_66 [1] : vector<2x8x40xf32> to vector<2x40xf32>
    %169 = vector.shape_cast %168 : vector<2x40xf32> to vector<2x1x40xf32>
    %cst_67 = arith.constant 9.99999993E-9 : f32
    %170 = vector.broadcast %cst_67 : f32 to vector<2x1x40xf32>
    %171 = arith.addf %169, %170 : vector<2x1x40xf32>
    %172 = math.sqrt %171 : vector<2x1x40xf32>
    %cst_68 = arith.constant 9.99999993E-9 : f32
    %173 = vector.broadcast %cst_68 : f32 to vector<2x1x40xf32>
    %174 = arith.addf %172, %173 : vector<2x1x40xf32>
    %175 = tpu.reciprocal %174 {approx = true} : vector<2x1x40xf32> -> vector<2x1x40xf32>
    %176 = vector.broadcast %175 : vector<2x1x40xf32> to vector<2x8x40xf32>
    %177 = arith.mulf %166, %176 : vector<2x8x40xf32>
    %178 = tpu.iota {dimensions = array<i32: 2>} : vector<1x1x40xi32>
    %c36_i32_69 = arith.constant 36 : i32
    %179 = vector.broadcast %c36_i32_69 : i32 to vector<1x1x40xi32>
    %180 = arith.cmpi slt, %178, %179 : vector<1x1x40xi32>
    %cst_70 = arith.constant 9.000000e+00 : f32
    %181 = vector.broadcast %cst_70 : f32 to vector<2x8x40xf32>
    %182 = arith.mulf %177, %181 : vector<2x8x40xf32>
    %cst_71 = arith.constant -1.000000e+30 : f32
    %183 = vector.shape_cast %180 : vector<1x1x40xi1> to vector<1x1x40xi1>
    %184 = vector.broadcast %183 : vector<1x1x40xi1> to vector<2x8x40xi1>
    %185 = vector.broadcast %cst_71 : f32 to vector<2x8x40xf32>
    %186 = arith.select %184, %182, %185 : vector<2x8x40xi1>, vector<2x8x40xf32>
    %cst_72 = arith.constant dense<0xFF800000> : vector<2x8xf32>
    %187 = vector.multi_reduction <maximumf>, %186, %cst_72 [2] : vector<2x8x40xf32> to vector<2x8xf32>
    %188 = vector.shape_cast %187 : vector<2x8xf32> to vector<2x8x1xf32>
    %189 = vector.broadcast %188 : vector<2x8x1xf32> to vector<2x8x40xf32>
    %190 = arith.subf %186, %189 : vector<2x8x40xf32>
    %191 = math.exp %190 : vector<2x8x40xf32>
    %cst_73 = arith.constant dense<0.000000e+00> : vector<2x8xf32>
    %192 = vector.multi_reduction <add>, %191, %cst_73 [2] : vector<2x8x40xf32> to vector<2x8xf32>
    %193 = vector.shape_cast %192 : vector<2x8xf32> to vector<2x8x1xf32>
    %194 = tpu.reciprocal %193 {approx = true} : vector<2x8x1xf32> -> vector<2x8x1xf32>
    %195 = vector.broadcast %194 : vector<2x8x1xf32> to vector<2x8x40xf32>
    %196 = arith.mulf %191, %195 : vector<2x8x40xf32>
    %197 = vector.broadcast %19 : vector<2x1x1xf32> to vector<2x8x40xf32>
    %198 = arith.mulf %197, %196 : vector<2x8x40xf32>
    %cst_74 = arith.constant dense<0.000000e+00> : vector<2x8xf32>
    %199 = vector.multi_reduction <add>, %198, %cst_74 [2] : vector<2x8x40xf32> to vector<2x8xf32>
    %200 = vector.shape_cast %199 : vector<2x8xf32> to vector<2x8x1xf32>
    %201 = tpu.reciprocal %200 {approx = true} : vector<2x8x1xf32> -> vector<2x8x1xf32>
    %202 = vector.broadcast %201 : vector<2x8x1xf32> to vector<2x8x40xf32>
    %203 = arith.mulf %198, %202 : vector<2x8x40xf32>
    %204 = arith.mulf %203, %161 : vector<2x8x40xf32>
    %cst_75 = arith.constant dense<0.000000e+00> : vector<2x8xf32>
    %205 = vector.multi_reduction <add>, %204, %cst_75 [2] : vector<2x8x40xf32> to vector<2x8xf32>
    %206 = vector.shape_cast %205 : vector<2x8xf32> to vector<2x8x1xf32>
    "tpu.trace_start"() <{level = 10 : i32, message = "bqs,bst->bqt"}> : () -> ()
    %cst_76 = arith.constant dense<0.000000e+00> : vector<2x8x40xf32>
    %207 = tpu.matmul %203, %7, %cst_76 {dimension_numbers = #tpu.dot_dimension_numbers<[2], [1], [1], [2], [0, 0, 0, 1, 1, 2], [0], [0]>} : vector<2x8x40xf32>, vector<2x40x40xf32>, vector<2x8x40xf32> -> vector<2x8x40xf32>
    "tpu.trace_stop"() : () -> ()
    %208 = arith.mulf %203, %207 : vector<2x8x40xf32>
    %cst_77 = arith.constant dense<0.000000e+00> : vector<2x8xf32>
    %209 = vector.multi_reduction <add>, %208, %cst_77 [2] : vector<2x8x40xf32> to vector<2x8xf32>
    %210 = vector.shape_cast %209 : vector<2x8xf32> to vector<2x8x1xf32>
    %cst_78 = arith.constant 0.000000e+00 : f32
    %211 = vector.broadcast %cst_78 : f32 to vector<2x8x1xf32>
    %212 = arith.maximumf %210, %211 : vector<2x8x1xf32>
    %213 = math.sqrt %212 : vector<2x8x1xf32>
    %214 = vector.shape_cast %5 : vector<8x1xf32> to vector<1x8x1xf32>
    %215 = vector.broadcast %214 : vector<1x8x1xf32> to vector<2x8x1xf32>
    %216 = arith.mulf %213, %215 : vector<2x8x1xf32>
    %cst_79 = arith.constant 9.99999993E-9 : f32
    %217 = vector.broadcast %cst_79 : f32 to vector<2x8x1xf32>
    %218 = arith.maximumf %216, %217 : vector<2x8x1xf32>
    %219 = tpu.reciprocal %218 {approx = true} : vector<2x8x1xf32> -> vector<2x8x1xf32>
    %220 = arith.mulf %206, %219 : vector<2x8x1xf32>
    %cst_80 = arith.constant 0.000000e+00 : f32
    %221 = vector.broadcast %cst_80 : f32 to vector<2x8x1xf32>
    %222 = arith.cmpf oeq, %220, %221 : vector<2x8x1xf32>
    %cst_81 = arith.constant 9.99999993E-9 : f32
    %223 = vector.broadcast %cst_81 : f32 to vector<2x8x1xf32>
    %224 = arith.select %222, %223, %220 : vector<2x8x1xi1>, vector<2x8x1xf32>
    %cst_82 = arith.constant 3.600000e+01 : f32
    %225 = vector.broadcast %cst_82 : f32 to vector<2x8x40xf32>
    %226 = arith.mulf %203, %225 : vector<2x8x40xf32>
    %cst_83 = arith.constant dense<0.000000e+00> : vector<2x8xf32>
    %227 = vector.multi_reduction <add>, %203, %cst_83 [2] : vector<2x8x40xf32> to vector<2x8xf32>
    %228 = vector.shape_cast %227 : vector<2x8xf32> to vector<2x8x1xf32>
    %229 = vector.broadcast %228 : vector<2x8x1xf32> to vector<2x8x40xf32>
    %230 = arith.subf %226, %229 : vector<2x8x40xf32>
    %cst_84 = arith.constant 0.000000e+00 : f32
    %231 = vector.broadcast %cst_84 : f32 to vector<2x8x40xf32>
    %232 = arith.cmpf ogt, %230, %231 : vector<2x8x40xf32>
    %cst_85 = arith.constant 1.000000e+00 : f32
    %233 = vector.broadcast %cst_85 : f32 to vector<2x8x40xf32>
    %cst_86 = arith.constant 0.000000e+00 : f32
    %234 = vector.broadcast %cst_86 : f32 to vector<2x8x40xf32>
    %235 = arith.select %232, %233, %234 : vector<2x8x40xi1>, vector<2x8x40xf32>
    %236 = arith.mulf %235, %203 : vector<2x8x40xf32>
    %cst_87 = arith.constant dense<0.000000e+00> : vector<2x8xf32>
    %237 = vector.multi_reduction <add>, %236, %cst_87 [2] : vector<2x8x40xf32> to vector<2x8xf32>
    %238 = vector.shape_cast %237 : vector<2x8xf32> to vector<2x8x1xf32>
    %239 = tpu.reciprocal %238 {approx = true} : vector<2x8x1xf32> -> vector<2x8x1xf32>
    %240 = vector.broadcast %239 : vector<2x8x1xf32> to vector<2x8x40xf32>
    %241 = arith.mulf %236, %240 : vector<2x8x40xf32>
    %242 = arith.mulf %241, %161 : vector<2x8x40xf32>
    %cst_88 = arith.constant dense<0.000000e+00> : vector<2x8xf32>
    %243 = vector.multi_reduction <add>, %242, %cst_88 [2] : vector<2x8x40xf32> to vector<2x8xf32>
    %244 = vector.shape_cast %243 : vector<2x8xf32> to vector<2x8x1xf32>
    "tpu.trace_start"() <{level = 10 : i32, message = "bqs,bst->bqt"}> : () -> ()
    %cst_89 = arith.constant dense<0.000000e+00> : vector<2x8x40xf32>
    %245 = tpu.matmul %241, %7, %cst_89 {dimension_numbers = #tpu.dot_dimension_numbers<[2], [1], [1], [2], [0, 0, 0, 1, 1, 2], [0], [0]>} : vector<2x8x40xf32>, vector<2x40x40xf32>, vector<2x8x40xf32> -> vector<2x8x40xf32>
    "tpu.trace_stop"() : () -> ()
    %246 = arith.mulf %241, %245 : vector<2x8x40xf32>
    %cst_90 = arith.constant dense<0.000000e+00> : vector<2x8xf32>
    %247 = vector.multi_reduction <add>, %246, %cst_90 [2] : vector<2x8x40xf32> to vector<2x8xf32>
    %248 = vector.shape_cast %247 : vector<2x8xf32> to vector<2x8x1xf32>
    %cst_91 = arith.constant 0.000000e+00 : f32
    %249 = vector.broadcast %cst_91 : f32 to vector<2x8x1xf32>
    %250 = arith.maximumf %248, %249 : vector<2x8x1xf32>
    %251 = math.sqrt %250 : vector<2x8x1xf32>
    %252 = vector.shape_cast %5 : vector<8x1xf32> to vector<1x8x1xf32>
    %253 = vector.broadcast %252 : vector<1x8x1xf32> to vector<2x8x1xf32>
    %254 = arith.mulf %251, %253 : vector<2x8x1xf32>
    %cst_92 = arith.constant 9.99999993E-9 : f32
    %255 = vector.broadcast %cst_92 : f32 to vector<2x8x1xf32>
    %256 = arith.maximumf %254, %255 : vector<2x8x1xf32>
    %257 = tpu.reciprocal %256 {approx = true} : vector<2x8x1xf32> -> vector<2x8x1xf32>
    %258 = arith.mulf %244, %257 : vector<2x8x1xf32>
    %cst_93 = arith.constant 0.000000e+00 : f32
    %259 = vector.broadcast %cst_93 : f32 to vector<2x8x1xf32>
    %260 = arith.cmpf oeq, %258, %259 : vector<2x8x1xf32>
    %cst_94 = arith.constant 9.99999993E-9 : f32
    %261 = vector.broadcast %cst_94 : f32 to vector<2x8x1xf32>
    %262 = arith.select %260, %261, %258 : vector<2x8x1xi1>, vector<2x8x1xf32>
    %263 = arith.subf %262, %224 : vector<2x8x1xf32>
    %cst_95 = arith.constant 0.000000e+00 : f32
    %264 = vector.broadcast %cst_95 : f32 to vector<2x8x1xf32>
    %265 = arith.cmpf oeq, %263, %264 : vector<2x8x1xf32>
    %cst_96 = arith.constant 9.99999993E-9 : f32
    %266 = vector.broadcast %cst_96 : f32 to vector<2x8x1xf32>
    %267 = arith.select %265, %266, %263 : vector<2x8x1xi1>, vector<2x8x1xf32>
    %268 = vector.broadcast %267 : vector<2x8x1xf32> to vector<2x8x40xf32>
    %269 = arith.mulf %268, %241 : vector<2x8x40xf32>
    %cst_97 = arith.constant dense<0.000000e+00> : vector<2x8xf32>
    %270 = vector.multi_reduction <add>, %269, %cst_97 [2] : vector<2x8x40xf32> to vector<2x8xf32>
    %271 = vector.shape_cast %270 : vector<2x8xf32> to vector<2x8x1xf32>
    %272 = tpu.reciprocal %271 {approx = true} : vector<2x8x1xf32> -> vector<2x8x1xf32>
    %273 = vector.broadcast %272 : vector<2x8x1xf32> to vector<2x8x40xf32>
    %274 = arith.mulf %269, %273 : vector<2x8x40xf32>
    %cst_98 = arith.constant 3.600000e+01 : f32
    %275 = vector.broadcast %cst_98 : f32 to vector<2x8x40xf32>
    %276 = arith.mulf %274, %275 : vector<2x8x40xf32>
    %cst_99 = arith.constant dense<0.000000e+00> : vector<2x8xf32>
    %277 = vector.multi_reduction <add>, %274, %cst_99 [2] : vector<2x8x40xf32> to vector<2x8xf32>
    %278 = vector.shape_cast %277 : vector<2x8xf32> to vector<2x8x1xf32>
    %279 = vector.broadcast %278 : vector<2x8x1xf32> to vector<2x8x40xf32>
    %280 = arith.subf %276, %279 : vector<2x8x40xf32>
    %cst_100 = arith.constant 0.000000e+00 : f32
    %281 = vector.broadcast %cst_100 : f32 to vector<2x8x40xf32>
    %282 = arith.cmpf ogt, %280, %281 : vector<2x8x40xf32>
    %cst_101 = arith.constant 1.000000e+00 : f32
    %283 = vector.broadcast %cst_101 : f32 to vector<2x8x40xf32>
    %cst_102 = arith.constant 0.000000e+00 : f32
    %284 = vector.broadcast %cst_102 : f32 to vector<2x8x40xf32>
    %285 = arith.select %282, %283, %284 : vector<2x8x40xi1>, vector<2x8x40xf32>
    %286 = arith.mulf %285, %274 : vector<2x8x40xf32>
    %cst_103 = arith.constant dense<0.000000e+00> : vector<2x8xf32>
    %287 = vector.multi_reduction <add>, %286, %cst_103 [2] : vector<2x8x40xf32> to vector<2x8xf32>
    %288 = vector.shape_cast %287 : vector<2x8xf32> to vector<2x8x1xf32>
    %289 = tpu.reciprocal %288 {approx = true} : vector<2x8x1xf32> -> vector<2x8x1xf32>
    %290 = vector.broadcast %289 : vector<2x8x1xf32> to vector<2x8x40xf32>
    %291 = arith.mulf %286, %290 : vector<2x8x40xf32>
    %292 = arith.mulf %291, %161 : vector<2x8x40xf32>
    %cst_104 = arith.constant dense<0.000000e+00> : vector<2x8xf32>
    %293 = vector.multi_reduction <add>, %292, %cst_104 [2] : vector<2x8x40xf32> to vector<2x8xf32>
    %294 = vector.shape_cast %293 : vector<2x8xf32> to vector<2x8x1xf32>
    "tpu.trace_start"() <{level = 10 : i32, message = "bqs,bst->bqt"}> : () -> ()
    %cst_105 = arith.constant dense<0.000000e+00> : vector<2x8x40xf32>
    %295 = tpu.matmul %291, %7, %cst_105 {dimension_numbers = #tpu.dot_dimension_numbers<[2], [1], [1], [2], [0, 0, 0, 1, 1, 2], [0], [0]>} : vector<2x8x40xf32>, vector<2x40x40xf32>, vector<2x8x40xf32> -> vector<2x8x40xf32>
    "tpu.trace_stop"() : () -> ()
    %296 = arith.mulf %291, %295 : vector<2x8x40xf32>
    %cst_106 = arith.constant dense<0.000000e+00> : vector<2x8xf32>
    %297 = vector.multi_reduction <add>, %296, %cst_106 [2] : vector<2x8x40xf32> to vector<2x8xf32>
    %298 = vector.shape_cast %297 : vector<2x8xf32> to vector<2x8x1xf32>
    %cst_107 = arith.constant 0.000000e+00 : f32
    %299 = vector.broadcast %cst_107 : f32 to vector<2x8x1xf32>
    %300 = arith.maximumf %298, %299 : vector<2x8x1xf32>
    %301 = math.sqrt %300 : vector<2x8x1xf32>
    %302 = vector.shape_cast %5 : vector<8x1xf32> to vector<1x8x1xf32>
    %303 = vector.broadcast %302 : vector<1x8x1xf32> to vector<2x8x1xf32>
    %304 = arith.mulf %301, %303 : vector<2x8x1xf32>
    %cst_108 = arith.constant 9.99999993E-9 : f32
    %305 = vector.broadcast %cst_108 : f32 to vector<2x8x1xf32>
    %306 = arith.maximumf %304, %305 : vector<2x8x1xf32>
    %307 = tpu.reciprocal %306 {approx = true} : vector<2x8x1xf32> -> vector<2x8x1xf32>
    %308 = arith.mulf %294, %307 : vector<2x8x1xf32>
    %cst_109 = arith.constant dense<0.000000e+00> : vector<2x1xf32>
    %309 = vector.multi_reduction <add>, %308, %cst_109 [1] : vector<2x8x1xf32> to vector<2x1xf32>
    %cst_110 = arith.constant 1.250000e-01 : f32
    %310 = vector.broadcast %cst_110 : f32 to vector<2x1xf32>
    %311 = arith.mulf %309, %310 : vector<2x1xf32>
    %312 = arith.addf %311, %160 : vector<2x1xf32>
    %c0_111 = arith.constant 0 : index
    %c0_112 = arith.constant 0 : index
    %c0_113 = arith.constant 0 : index
    %313 = vector.load %arg9[%c0_111, %c0_112, %c0_113] : memref<1x2x1xf32, #tpu.memory_space<vmem>>, vector<1x2x1xf32>
    %314 = vector.shape_cast %313 : vector<1x2x1xf32> to vector<2x1xf32>
    %315 = vector.shape_cast %312 : vector<2x1xf32> to vector<1x2x1xf32>
    tpu.vector_store %arg9[%c0_111, %c0_112, %c0_113], %315 {strides = array<i32>} : memref<1x2x1xf32, #tpu.memory_space<vmem>>, vector<1x2x1xf32>,
    return
  }
  func.func @transform_0(%arg0: i32, %arg1: i32) -> (i32, i32, i32) {
    %c0_i32 = arith.constant 0 : i32
    %c0_i32_0 = arith.constant 0 : i32
    %c0_i32_1 = arith.constant 0 : i32
    return %arg1, %c0_i32, %c0_i32_0 : i32, i32, i32
  }
  func.func @transform_1(%arg0: i32, %arg1: i32) -> (i32, i32, i32) {
    %c0_i32 = arith.constant 0 : i32
    %c0_i32_0 = arith.constant 0 : i32
    %c0_i32_1 = arith.constant 0 : i32
    return %arg1, %c0_i32, %c0_i32_0 : i32, i32, i32
  }
  func.func @transform_2(%arg0: i32, %arg1: i32) -> (i32, i32, i32) {
    %c0_i32 = arith.constant 0 : i32
    %c0_i32_0 = arith.constant 0 : i32
    %c0_i32_1 = arith.constant 0 : i32
    return %arg1, %c0_i32, %c0_i32_0 : i32, i32, i32
  }
  func.func @transform_3(%arg0: i32, %arg1: i32) -> (i32, i32) {
    %c0_i32 = arith.constant 0 : i32
    %c0_i32_0 = arith.constant 0 : i32
    return %arg0, %c0_i32 : i32, i32
  }
  func.func @transform_4(%arg0: i32, %arg1: i32) -> (i32, i32, i32) {
    %c0_i32 = arith.constant 0 : i32
    %c0_i32_0 = arith.constant 0 : i32
    %c0_i32_1 = arith.constant 0 : i32
    return %arg0, %c0_i32, %c0_i32_0 : i32, i32, i32
  }
  func.func @transform_5(%arg0: i32, %arg1: i32) -> (i32, i32) {
    %c0_i32 = arith.constant 0 : i32
    %c0_i32_0 = arith.constant 0 : i32
    return %arg0, %c0_i32 : i32, i32
  }
  func.func @transform_6(%arg0: i32, %arg1: i32) -> (i32, i32, i32) {
    %c0_i32 = arith.constant 0 : i32
    %c0_i32_0 = arith.constant 0 : i32
    return %arg1, %arg0, %c0_i32 : i32, i32, i32
  }
  func.func @transform_7(%arg0: i32, %arg1: i32) -> (i32, i32, i32) {
    %c0_i32 = arith.constant 0 : i32
    %c0_i32_0 = arith.constant 0 : i32
    return %arg1, %arg0, %c0_i32 : i32, i32, i32
  }
}

</mosaic_0001>

<bundles_post_ra>
// kernel: custom-call.1
= control target key start
LH: loop header
LB: loop body
LE: loop exit
PB: predicated region body
PF: predicated region fallthrough
CT: control target
= control target key end

     0   :  { %s6_s0 = inlined_call_operand.vmem [shape: f32[2,32], index: 0, kind: output, shape index: {}]  }

// kernel: scan_forward.2
= control target key start
LH: loop header
LB: loop body
LE: loop exit
PB: predicated region body
PF: predicated region fallthrough
CT: control target
= control target key end

     0   :  { %v363_v0 = vmov 0.0   ;;  %vm364_vm0 = vmmov 0   ;;  %s459_s1 = inlined_call_operand.vmem [shape: bf16[128,128], index: 1, kind: input, shape index: {}]   ;;  %s460_s0 = inlined_call_operand.vmem [shape: bf16[72,128], index: 0, kind: input, shape index: {}]   ;;  %s461_s2 = inlined_call_operand.vmem [shape: f32[1,128], index: 2, kind: input, shape index: {}]   ;;  %s462_s3 = inlined_call_operand.vmem [shape: f32[72,128], index: 3, kind: output, shape index: {}]  }
   0x1   :  { %296 = vmatprep.subr.bf16.mxu0 %v363_v0  ;;  %v350_v1 = vld [vmem:[%s459_s1] sm:$0xff]   ;;  %332 = vmatprep.subr.bf16.mxu1 %v363_v0  ;;  %v351_v2 = vld [vmem:[%s459_s1 + $0x8] sm:$0xff]   ;;  %v352_v3 = vld [vmem:[%s459_s1 + $0x10] sm:$0xff]  }
   0x2   :  { %312 = vmatprep.mubr.msk.bf16.mxu0 %vm364_vm0, %v363_v0  ;;  %324 = vmatprep.mubr.msk.bf16.mxu1 %vm364_vm0, %v363_v0  ;;  %v353_v4 = vld [vmem:[%s459_s1 + $0x18] sm:$0xff]   ;;  %v354_v5 = vld [vmem:[%s459_s1 + $0x20] sm:$0xff]   ;;  %v355_v6 = vld [vmem:[%s459_s1 + $0x28] sm:$0xff]  }
   0x3   :  { %297 = vmatpush3.bf16.msra.mxu0 %v350_v1  ;;  %340 = vmatpush3.bf16.msra.mxu1 %v350_v1  ;;  %v356_v7 = vld [vmem:[%s459_s1 + $0x30] sm:$0xff]   ;;  %v357_v8 = vld [vmem:[%s459_s1 + $0x38] sm:$0xff]   ;;  %v358_v9 = vld [vmem:[%s460_s0] sm:$0xff]  }
   0x4   :  { %298 = vmatprep.subr.bf16.mxu0 %v363_v0  ;;  %333 = vmatprep.subr.bf16.mxu1 %v363_v0  ;;  %v359_v10 = vld [vmem:[%s460_s0 + $0x18] sm:$0xff]   ;;  %v360_v11 = vld [vmem:[%s460_s0 + $0x8] sm:$0xff]   ;;  %v361_v12 = vld [vmem:[%s460_s0 + $0x20] ss:$0 sps:$4 sm:$0xff]  }
   0x5   :  { %v362_v13 = vld [vmem:[%s460_s0 + $0x10] sm:$0xff]   ;;  %v282_v14 = vld [vmem:[%s461_s2] ss:$0 sm:$0xff] }
   0x7   :  { %299 = vmatpush3.bf16.msra.mxu0 %v351_v2  ;;  %341 = vmatpush3.bf16.msra.mxu1 %v351_v2 }
   0x8   :  { %300 = vmatprep.subr.bf16.mxu0 %v363_v0  ;;  %334 = vmatprep.subr.bf16.mxu1 %v363_v0 }
   0xb   :  { %301 = vmatpush3.bf16.msra.mxu0 %v352_v3  ;;  %342 = vmatpush3.bf16.msra.mxu1 %v352_v3 }
   0xc   :  { %302 = vmatprep.subr.bf16.mxu0 %v363_v0  ;;  %335 = vmatprep.subr.bf16.mxu1 %v363_v0 }
   0xf   :  { %303 = vmatpush3.bf16.msra.mxu0 %v353_v4  ;;  %343 = vmatpush3.bf16.msra.mxu1 %v353_v4 }
  0x10   :  { %304 = vmatprep.subr.bf16.mxu0 %v363_v0  ;;  %336 = vmatprep.subr.bf16.mxu1 %v363_v0 }
  0x13   :  { %305 = vmatpush3.bf16.msra.mxu0 %v354_v5  ;;  %344 = vmatpush3.bf16.msra.mxu1 %v354_v5 }
  0x14   :  { %306 = vmatprep.subr.bf16.mxu0 %v363_v0  ;;  %337 = vmatprep.subr.bf16.mxu1 %v363_v0 }
  0x17   :  { %307 = vmatpush3.bf16.msra.mxu0 %v355_v6  ;;  %345 = vmatpush3.bf16.msra.mxu1 %v355_v6 }
  0x18   :  { %308 = vmatprep.subr.bf16.mxu0 %v363_v0  ;;  %338 = vmatprep.subr.bf16.mxu1 %v363_v0 }
  0x1b   :  { %309 = vmatpush3.bf16.msra.mxu0 %v356_v7  ;;  %346 = vmatpush3.bf16.msra.mxu1 %v356_v7 }
  0x1c   :  { %310 = vmatprep.subr.bf16.mxu0 %v363_v0  ;;  %339 = vmatprep.subr.bf16.mxu1 %v363_v0 }
  0x1f   :  { %311 = vmatpush3.bf16.msra.mxu0 %v357_v8  ;;  %347 = vmatpush3.bf16.msra.mxu1 %v357_v8 }
  0x22   :  { %313 = vmatmul.mubr.bf16.vlgmr.msra.gmra.mrb[0].mxu0 %v358_v9  ;;  %325 = vmatmul.mubr.bf16.vlgmr.msra.gmra.mrb[0].mxu1 %v359_v10 }
  0x23   :  { %316 = vmatprep.mubr.msk.bf16.mxu0 %vm364_vm0, %v363_v0  ;;  %328 = vmatprep.mubr.msk.bf16.mxu1 %vm364_vm0, %v363_v0 }
  0x2a   :  { %317 = vmatmul.mubr.bf16.gmra.mrb[4].mxu0 %v360_v11  ;;  %329 = vmatmul.mubr.bf16.gmra.mrb[4].mxu1 %v361_v12 }
  0x2b   :  { %320 = vmatprep.mubr.msk.bf16.mxu0 %vm364_vm0, %v363_v0 }
  0x32   :  { %321 = vmatmul.mubr.bf16.gmra.mrb[8].mxu0 %v362_v13 }
  0xf5   :  { %v172_v15 = vpop.f32.mrb[0].mxu0  ;;  %v196_v16 = vpop.f32.mrb[0].mxu1 }
  0xf6   :  { %v247_v17 = vadd.f32 %v282_v14, %v172_v15  ;;  %v314_v18 = vpop.f32.mrb[1].mxu0  ;;  %v253_v19 = vadd.f32 %v282_v14, %v196_v16  ;;  %v326_v20 = vpop.f32.mrb[1].mxu1 }
  0xf7   :  { %v175_v21 = vpop.f32.mrb[2].mxu0  ;;  %v199_v22 = vpop.f32.mrb[2].mxu1 }
  0xf8   :  { %256 = vst [vmem:[%s462_s3] sm:$0xff] %v247_v17  ;;  %v248_v23 = vadd.f32 %v282_v14, %v175_v21  ;;  %v315_v24 = vpop.f32.mrb[3].mxu0  ;;  %262 = vst [vmem:[%s462_s3 + $0x30] sm:$0xff] %v253_v19  ;;  %v254_v25 = vadd.f32 %v282_v14, %v199_v22  ;;  %v327_v26 = vpop.f32.mrb[3].mxu1 }
  0xfa   :  { %257 = vst [vmem:[%s462_s3 + $0x8] sm:$0xff] %v248_v23  ;;  %263 = vst [vmem:[%s462_s3 + $0x38] sm:$0xff] %v254_v25 }
  0xfd   :  { %v180_v27 = vpop.f32.mrb[4].mxu0  ;;  %v204_v28 = vpop.f32.mrb[4].mxu1 }
  0xfe   :  { %v249_v29 = vadd.f32 %v282_v14, %v180_v27  ;;  %v318_v30 = vpop.f32.mrb[5].mxu0  ;;  %v255_v31 = vadd.f32 %v282_v14, %v204_v28  ;;  %v330_v32 = vpop.f32.mrb[5].mxu1 }
  0xff   :  { %v183_v33 = vpop.f32.mrb[6].mxu0  ;;  %v207_v34 = vpop.f32.mrb[6].mxu1 }
 0x100   :  { %258 = vst [vmem:[%s462_s3 + $0x10] sm:$0xff] %v249_v29  ;;  %v250_v35 = vadd.f32 %v282_v14, %v183_v33  ;;  %v319_v36 = vpop.f32.mrb[7].mxu0  ;;  %264 = vst [vmem:[%s462_s3 + $0x40] sm:$0xff] %v255_v31  ;;  %v331_v37 = vpop.f32.mrb[7].mxu1 }
 0x102   :  { %259 = vst [vmem:[%s462_s3 + $0x18] sm:$0xff] %v250_v35 }
 0x105   :  { %v188_v38 = vpop.f32.mrb[8].mxu0 }
 0x106   :  { %v251_v39 = vadd.f32 %v282_v14, %v188_v38  ;;  %v322_v40 = vpop.f32.mrb[9].mxu0 }
 0x107   :  { %v191_v41 = vpop.f32.mrb[10].mxu0 }
 0x108   :  { %260 = vst [vmem:[%s462_s3 + $0x20] sm:$0xff] %v251_v39  ;;  %v252_v42 = vadd.f32 %v282_v14, %v191_v41  ;;  %v323_v43 = vpop.f32.mrb[11].mxu0 }
 0x10a   :  { %261 = vst [vmem:[%s462_s3 + $0x28] sm:$0xff] %v252_v42 }

// kernel: scan_forward.3
= control target key start
LH: loop header
LB: loop body
LE: loop exit
PB: predicated region body
PF: predicated region fallthrough
CT: control target
= control target key end

     0   :  { %s4158_s24 = smov 0   ;;  %s4160_s25 = smov 0   ;;  %s5704_s0 = inlined_call_operand.vmem [shape: bf16[2,8,32], index: 0, kind: input, shape index: {}]   ;;  %s5705_s1 = inlined_call_operand.vmem [shape: f32[2,8,8], index: 1, kind: input, shape index: {}]   ;;  %s5706_s2 = inlined_call_operand.vmem [shape: f32[2,8,1], index: 2, kind: input, shape index: {}]   ;;  %s5707_s3 = inlined_call_operand.vmem [shape: bf16[80,32], index: 3, kind: input, shape index: {}]   ;;  %s5708_s4 = inlined_call_operand.vmem [shape: f32[2,40,40], index: 4, kind: input, shape index: {}]   ;;  %s5709_s5 = inlined_call_operand.vmem [shape: f32[80,1], index: 5, kind: input, shape index: {}]   ;;  %s5710_s6 = inlined_call_operand.vmem [shape: f32[2,2,1], index: 6, kind: input, shape index: {}]   ;;  %s5711_s7 = inlined_call_operand.vmem [shape: f32[2,2,1], index: 7, kind: output, shape index: {}]  }
   0x1   :  { %s4162_s26 = smov 0  }
   0x2 LB: > { %s26_s27 = sadd.s32 1, %s4107_s25  ;;  %p3422_p0 = scmp.ge.s32.totalorder %s4111_s26, 1  ;;  %s4111_s26 = sphi %s4162_s26, %s17_s26   ;;  %s4107_s25 = sphi %s4160_s25, %s5725_s25   ;;  %s4103_s24 = sphi %s4158_s24, %s5724_s24  }
   0x3   : > { %p27_p1 = scmp.ge.s32.totalorder %s26_s27, 2  ;;  %p316_p2 = scmp.lt.s32.totalorder %s4111_s26, 3 }
   0x5   : > { %s5727_s27 = smov (%p27_p1, %s26_s27), 0  ;;  %p317_p3 = pnand %p3422_p0, %p316_p2 }
   0x7   : > { %320 = sbr.rel (%p317_p3) target bundleno = 3538 (0xdd2), region = 48 }
   0xe   : > { %p380_p4 = scmp.lt.s32.totalorder %s4103_s24, 1  ;;  %v5712_v0 = vmov 0.0   ;;  %vm4114_vm0 = vmmov 0   ;;  %vm485_vm1 = vcmask 261120   ;;  %v3770_v3 = vld [vmem:[%s5707_s3] sm:$0xff]   ;;  %v3771_v4 = vld [vmem:[%s5707_s3 + $0x8] sm:$0xff]  }
   0xf   : > { %3552 = vmatprep.subr.bf16.mxu0 %v5712_v0  ;;  %3554 = vmatprep.mubr.msk.bf16.mxu0 %vm4114_vm0, %v5712_v0  ;;  %v3772_v5 = vld [vmem:[%s5707_s3 + $0x10] sm:$0xff]   ;;  %v3773_v6 = vld [vmem:[%s5707_s3 + $0x18] sm:$0xff]   ;;  %v3774_v7 = vld [vmem:[%s5707_s3 + $0x20] sm:$0xff]   ;;  %vm640_vm4 = vcmask 64512  }
  0x10   : > { %s5729_s24 = smov (!%p380_p4, %s4103_s24), 1 }
  0x11   : > { %s3423_s28 = sshll.u32 %s5729_s24, 2  ;;  %s3426_s19 = sshll.u32 %s5729_s24, 1 }
  0x12   : > { %s383_s8 = scalar_lea.vmem %s5704_s0, %s3423_s28  ;;  %s417_s22 = scalar_lea.vmem %s5710_s6, %s3426_s19 }
  0x13   : > { %v426_v1 = vld [vmem:[%s383_s8] sm:$0xf]  ;;  %s3424_s23 = sshll.u32 %s5729_s24, 3  ;;  %s424_s21 = scalar_lea.vmem %s5711_s7, %s3426_s19 }
  0x14   : > { %v502_v2 = vsel %vm485_vm1, %v426_v1, 0  ;;  %s387_s30 = scalar_lea.vmem %s5705_s1, %s3424_s23  ;;  %s391_s16 = scalar_lea.vmem %s5706_s2, %s3424_s23 }
  0x15   : > { %3553 = vmatpush3.bf16.xpose.msra.mxu0 %v502_v2 }
  0x1c   : > { %3555 = vmatmul.mubr.msk.bf16.vlgmr.msra.gmra.mrb[0].mxu0 %vm485_vm1, %v3770_v3 }
  0x1d   : > { %3558 = vmatprep.mubr.msk.bf16.mxu0 %vm4114_vm0, %v5712_v0 }
  0x24   : > { %3559 = vmatmul.mubr.msk.bf16.gmra.mrb[4].mxu0 %vm485_vm1, %v3771_v4 }
  0x25   : > { %3562 = vmatprep.mubr.msk.bf16.mxu0 %vm4114_vm0, %v5712_v0 }
  0x2c   : > { %3563 = vmatmul.mubr.msk.bf16.gmra.mrb[8].mxu0 %vm485_vm1, %v3772_v5 }
  0x2d   : > { %3566 = vmatprep.mubr.msk.bf16.mxu0 %vm4114_vm0, %v5712_v0 }
  0x34   : > { %3567 = vmatmul.mubr.msk.bf16.gmra.mrb[12].mxu0 %vm485_vm1, %v3773_v6 }
  0x35   : > { %3570 = vmatprep.mubr.msk.bf16.mxu0 %vm4114_vm0, %v5712_v0 }
  0x3c   : > { %3571 = vmatmul.mubr.msk.bf16.gmra.mrb[16].mxu0 %vm485_vm1, %v3774_v7 }
  0x3d   : > { %3635 = vmatprep.mubr.msk.f32.mxu0 %vm4114_vm0, %v5712_v0 }
  0xef   : > { %v4216_v8 = vpop.f32.mrb[0].mxu0 }
  0xf0   : > { %v587_v9 = vmul.f32 0.1, %v4216_v8  ;;  %v3556_v10 = vpop.f32.mrb[1].mxu0  ;;  %vm577_vm2 = vcmp.gt.f32.partialorder %v4216_v8, 0.0 }
  0xf1   : > { %v4220_v11 = vpop.f32.mrb[2].mxu0 }
  0xf2   : > { %v588_v12 = vmul.f32 0.1, %v4220_v11  ;;  %v3557_v13 = vpop.f32.mrb[3].mxu0  ;;  %vm578_vm3 = vcmp.gt.f32.partialorder %v4220_v11, 0.0  ;;  %v4225_v14 = vsel %vm577_vm2, %v4216_v8, %v587_v9 }
  0xf3   : > { %v630_v15 = vmul.f32 %v4225_v14, %v4225_v14 }
  0xf4   : > { %v4230_v16 = vsel %vm578_vm3, %v4220_v11, %v588_v12 }
  0xf5   : > { %v631_v17 = vmul.f32 %v4230_v16, %v4230_v16  ;;  %v641_v19 = vsel %vm640_vm4, %v630_v15, 0.0 }
  0xf7   : > { %v4234_v18 = vpop.f32.mrb[4].mxu0  ;;  %v642_v20 = vsel %vm640_vm4, %v631_v17, 0.0 }
  0xf8   : > { %v3560_v21 = vpop.f32.mrb[5].mxu0  ;;  %vm579_vm5 = vcmp.gt.f32.partialorder %v4234_v18, 0.0  ;;  %v589_v22 = vmul.f32 0.1, %v4234_v18  ;;  %v643_v23 = vadd.f32 %v642_v20, %v641_v19 }
  0xf9   : > { %v4240_v24 = vpop.f32.mrb[6].mxu0 }
  0xfa   : > { %v590_v25 = vmul.f32 0.1, %v4240_v24  ;;  %v3561_v26 = vpop.f32.mrb[7].mxu0  ;;  %vm580_vm6 = vcmp.gt.f32.partialorder %v4240_v24, 0.0  ;;  %v4245_v27 = vsel %vm579_vm5, %v4234_v18, %v589_v22 }
  0xfb   : > { %v632_v28 = vmul.f32 %v4245_v27, %v4245_v27 }
  0xfc   : > { %v4250_v29 = vsel %vm580_vm6, %v4240_v24, %v590_v25 }
  0xfd   : > { %v633_v30 = vmul.f32 %v4250_v29, %v4250_v29  ;;  %v644_v31 = vsel %vm640_vm4, %v632_v28, 0.0 }
  0xfe   : > { %v645_v32 = vadd.f32 %v644_v31, %v643_v23 }
  0xff   : > { %v4255_v33 = vpop.f32.mrb[8].mxu0  ;;  %v646_v34 = vsel %vm640_vm4, %v633_v30, 0.0 }
 0x100   : > { %vm581_vm7 = vcmp.gt.f32.partialorder %v4255_v33, 0.0  ;;  %v591_v35 = vmul.f32 0.1, %v4255_v33  ;;  %v3564_v36 = vpop.f32.mrb[9].mxu0  ;;  %v647_v37 = vadd.f32 %v646_v34, %v645_v32 }
 0x101   : > { %v4260_v38 = vpop.f32.mrb[10].mxu0 }
 0x102   : > { %v592_v39 = vmul.f32 0.1, %v4260_v38  ;;  %v3565_v40 = vpop.f32.mrb[11].mxu0  ;;  %v4264_v41 = vsel %vm581_vm7, %v4255_v33, %v591_v35  ;;  %vm582_vm8 = vcmp.gt.f32.partialorder %v4260_v38, 0.0 }
 0x103   : > { %v634_v42 = vmul.f32 %v4264_v41, %v4264_v41 }
 0x104   : > { %v4271_v45 = vsel %vm582_vm8, %v4260_v38, %v592_v39 }
 0x105   : > { %v648_v43 = vsel %vm640_vm4, %v634_v42, 0.0  ;;  %v635_v51 = vmul.f32 %v4271_v45, %v4271_v45 }
 0x106   : > { %v649_v44 = vadd.f32 %v648_v43, %v647_v37 }
 0x107   : > { %v4273_v46 = vpop.f32.mrb[12].mxu0  ;;  %v656_v60 = vsel %vm640_vm4, %v635_v51, 0.0 }
 0x108   : > { %v3568_v47 = vpop.f32.mrb[13].mxu0  ;;  %v650_v48 = vrot.slane %v649_v44, 4  ;;  %vm583_vm9 = vcmp.gt.f32.partialorder %v4273_v46, 0.0  ;;  %v593_v49 = vmul.f32 0.1, %v4273_v46 }
 0x109   : > { %v4277_v50 = vpop.f32.mrb[14].mxu0 }
 0x10a   : > { %vm584_vm10 = vcmp.gt.f32.partialorder %v4277_v50, 0.0  ;;  %v594_v52 = vmul.f32 0.1, %v4277_v50  ;;  %v3569_v53 = vpop.f32.mrb[15].mxu0  ;;  %v651_v54 = vadd.f32 %v650_v48, %v649_v44  ;;  %v4284_v55 = vsel %vm583_vm9, %v4273_v46, %v593_v49 }
 0x10b   : > { %v636_v56 = vmul.f32 %v4284_v55, %v4284_v55 }
 0x10c   : > { %v652_v57 = vrot.slane %v651_v54, 2  ;;  %v4289_v58 = vsel %vm584_vm10, %v4277_v50, %v594_v52 }
 0x10d   : > { %v637_v59 = vmul.f32 %v4289_v58, %v4289_v58  ;;  %v657_v61 = vsel %vm640_vm4, %v636_v56, 0.0 }
 0x10e   : > { %v653_v62 = vadd.f32 %v652_v57, %v651_v54  ;;  %v658_v63 = vadd.f32 %v657_v61, %v656_v60 }
 0x10f   : > { %v4295_v1 = vpop.f32.mrb[16].mxu0  ;;  %v659_v2 = vsel %vm640_vm4, %v637_v59, 0.0 }
 0x110   : > { %vm585_vm11 = vcmp.gt.f32.partialorder %v4295_v1, 0.0  ;;  %v595_v3 = vmul.f32 0.1, %v4295_v1  ;;  %v3572_v4 = vpop.f32.mrb[17].mxu0  ;;  %v654_v5 = vrot.slane %v653_v62, 1  ;;  %v660_v6 = vadd.f32 %v659_v2, %v658_v63 }
 0x111   : > { %v4300_v7 = vpop.f32.mrb[18].mxu0 }
 0x112   : > { %v4303_v9 = vsel %vm585_vm11, %v4295_v1, %v595_v3  ;;  %vm586_vm12 = vcmp.gt.f32.partialorder %v4300_v7, 0.0  ;;  %v596_v10 = vmul.f32 0.1, %v4300_v7  ;;  %v3573_v12 = vpop.f32.mrb[19].mxu0  ;;  %v655_v13 = vadd.f32 %v654_v5, %v653_v62 }
 0x113   : > { %v638_v15 = vmul.f32 %v4303_v9, %v4303_v9 }
 0x114   : > { %v606_v17 = vsel %vm586_vm12, %v4300_v7, %v596_v10  ;;  %v671_v19 = vadd.f32 1e-08, %v655_v13 }
 0x115   : > { %v639_v20 = vmul.f32 %v606_v17, %v606_v17  ;;  %v661_v21 = vsel %vm640_vm4, %v638_v15, 0.0 }
 0x116   : > { %3775 = vrsqrt.f32 %v671_v19  ;;  %v662_v22 = vadd.f32 %v661_v21, %v660_v6  ;;  %vm675_vm13 = vcmp.eq.f32.partialorder %v671_v19, inf  ;;  %v678_v35 = vand.u32 2147483648, %v671_v19 }
 0x117   : > { %v663_v23 = vsel %vm640_vm4, %v639_v20, 0.0  ;;  %vm677_vm14 = vcmp.eq.f32.partialorder %v671_v19, 0.0 }
 0x118   : > { %v664_v25 = vadd.f32 %v663_v23, %v662_v22 }
 0x11a   : > { %v665_v26 = vrot.slane %v664_v25, 4 }
 0x11c   : > { %v666_v28 = vadd.f32 %v665_v26, %v664_v25 }
 0x11e   : > { %v667_v30 = vrot.slane %v666_v28, 2 }
 0x120   : > { %v3776_v31 = vpop.eup %3775  ;;  %v668_v34 = vadd.f32 %v667_v30, %v666_v28 }
 0x121   : > { %v674_v32 = vmul.f32 %v3776_v31, %v671_v19 }
 0x122   : > { %v669_v37 = vrot.slane %v668_v34, 1 }
 0x123   : > { %v676_v36 = vsel %vm675_vm13, %v671_v19, %v674_v32 }
 0x124   : > { %v679_v39 = vsel %vm677_vm14, %v678_v35, %v676_v36  ;;  %v670_v42 = vadd.f32 %v669_v37, %v668_v34  ;;  %vm2508_vm14 = vcmask 326656  }
 0x125   : > { %v687_v40 = vadd.f32 1e-08, %v679_v39 }
 0x126   : > { %v672_v43 = vadd.f32 1e-08, %v670_v42 }
 0x127   : > { %3777 = vrcp.f32 %v687_v40 }
 0x128   : > { %3779 = vrsqrt.f32 %v672_v43  ;;  %vm682_vm15 = vcmp.eq.f32.partialorder %v672_v43, inf  ;;  %v685_v59 = vand.u32 2147483648, %v672_v43  ;;  %vm684_vm1 = vcmp.eq.f32.partialorder %v672_v43, 0.0 }
 0x131   : > { %v3778_v44 = vpop.eup %3777 }
 0x132   : > { %v693_v47 = vmul.f32 %v3778_v44, %v4245_v27  ;;  %v691_v48 = vmul.f32 %v3778_v44, %v4225_v14  ;;  %v694_v49 = vmul.f32 %v3778_v44, %v4250_v29  ;;  %v692_v51 = vmul.f32 %v3778_v44, %v4230_v16  ;;  %v3780_v52 = vpop.eup %3779 }
 0x133   : > { %v695_v53 = vmul.f32 %v3778_v44, %v4264_v41  ;;  %v681_v57 = vmul.f32 %v3780_v52, %v672_v43 }
 0x134   : > { %v703_v54 = vmul.f32 9.0, %v693_v47  ;;  %v701_v56 = vmul.f32 9.0, %v691_v48  ;;  %v704_v62 = vmul.f32 9.0, %v694_v49  ;;  %v702_v27 = vmul.f32 9.0, %v692_v51 }
 0x135   : > { %v683_v14 = vsel %vm682_vm15, %v672_v43, %v681_v57  ;;  %v705_v2 = vmul.f32 9.0, %v695_v53 }
 0x136   : > { %v717_v60 = vsel %vm640_vm4, %v703_v54, -inf  ;;  %v711_v61 = vsel %vm640_vm4, %v701_v56, -inf  ;;  %v686_v29 = vsel %vm684_vm1, %v685_v59, %v683_v14  ;;  %v720_v63 = vsel %vm640_vm4, %v704_v62, -inf }
 0x137   : > { %718 = vmax.xlane.f32.xlu1 %v717_v60  ;;  %712 = vmax.xlane.f32.xlu0 %v711_v61  ;;  %v688_v16 = vadd.f32 1e-08, %v686_v29  ;;  %v714_v41 = vsel %vm640_vm4, %v702_v27, -inf  ;;  %v723_v3 = vsel %vm640_vm4, %v705_v2, -inf }
 0x139   : > { %3781 = vrcp.f32 %v688_v16 }
 0x13b   : > { %721 = vmax.xlane.f32.xlu1 %v720_v63  ;;  %715 = vmax.xlane.f32.xlu0 %v714_v41 }
 0x13f   : > { %724 = vmax.xlane.f32.xlu0 %v723_v3 }
 0x143   : > { %v3782_v4 = vpop.eup %3781 }
 0x144   : > { %v697_v5 = vmul.f32 %v3782_v4, %v4284_v55  ;;  %v696_v6 = vmul.f32 %v3782_v4, %v4271_v45  ;;  %v699_v10 = vmul.f32 %v3782_v4, %v4303_v9  ;;  %v698_v12 = vmul.f32 %v3782_v4, %v4289_v58 }
 0x145   : > { %v700_v13 = vmul.f32 %v3782_v4, %v606_v17  ;;  %v4115_v9 = vmov 0  }
 0x146   : > { %v707_v15 = vmul.f32 9.0, %v697_v5  ;;  %v706_v19 = vmul.f32 9.0, %v696_v6  ;;  %v709_v22 = vmul.f32 9.0, %v699_v10  ;;  %v708_v23 = vmul.f32 9.0, %v698_v12  ;;  %3768 = vset.pattern.permute.xlu0 %v4115_v9  ;;  %3769 = vset.pattern.permute.xlu1 %v4115_v9 }
 0x147   : > { %v710_v45 = vmul.f32 9.0, %v700_v13 }
 0x148   : > { %v729_v20 = vsel %vm640_vm4, %v707_v15, -inf  ;;  %v726_v21 = vsel %vm640_vm4, %v706_v19, -inf  ;;  %v735_v25 = vsel %vm640_vm4, %v709_v22, -inf  ;;  %v732_v55 = vsel %vm640_vm4, %v708_v23, -inf }
 0x149   : > { %730 = vmax.xlane.f32.xlu0 %v729_v20  ;;  %727 = vmax.xlane.f32.xlu1 %v726_v21  ;;  %v738_v58 = vsel %vm640_vm4, %v710_v45, -inf }
 0x14d   : > { %736 = vmax.xlane.f32.xlu0 %v735_v25  ;;  %733 = vmax.xlane.f32.xlu1 %v732_v55  ;;  %v4116_v55 = vmov 1966171168  }
 0x151   : > { %739 = vmax.xlane.f32.xlu1 %v738_v58  ;;  %v5714_v58 = vlaneseq }
 0x1c4   : > { %v719_v17 = vpop.xlane.xlu1 %718  ;;  %v713_v26 = vpop.xlane.xlu0 %712 }
 0x1c5   : > { %v743_v28 = vsub.f32 %v703_v54, %v719_v17  ;;  %v741_v30 = vsub.f32 %v701_v56, %v713_v26  ;;  %v4375_v26 = vshrl.u32 %v5714_v58, 7 }
 0x1c7   : > { %v751_v31 = vmul.f32 1.442695, %v741_v30  ;;  %v755_v32 = vmul.f32 1.442695, %v743_v28  ;;  %5718 = vst [vmem:[#allocation2_spill] sm:$0xff] %v4375_v26 }
 0x1c8   : > { %v722_v34 = vpop.xlane.xlu1 %721  ;;  %v716_v35 = vpop.xlane.xlu0 %715  ;;  %v3438_v28 = vld.sshfl [vmem:[%s417_s22] sm:$0x11 pattern:$0x75316420] }
 0x1c9   : > { %v744_v36 = vsub.f32 %v704_v62, %v722_v34  ;;  %v742_v37 = vsub.f32 %v702_v27, %v716_v35  ;;  %3783 = vpow2.f32 %v751_v31  ;;  %v615_v31 = vcombine.high %v3438_v28, %v3438_v28 }
 0x1ca   : > { %3785 = vpow2.f32 %v755_v32  ;;  %v823_v34 = vsub.s32 0, %v4375_v26 }
 0x1cb   : > { %v753_v39 = vmul.f32 1.442695, %v742_v37  ;;  %v757_v40 = vmul.f32 1.442695, %v744_v36 }
 0x1cc   : > { %v725_v42 = vpop.xlane.xlu0 %724 }
 0x1cd   : > { %v745_v43 = vsub.f32 %v705_v2, %v725_v42  ;;  %3787 = vpow2.f32 %v753_v39 }
 0x1ce   : > { %3789 = vpow2.f32 %v757_v40 }
 0x1cf   : > { %v759_v44 = vmul.f32 1.442695, %v745_v43 }
 0x1d1   : > { %3791 = vpow2.f32 %v759_v44 }
 0x1d3   : > { %v4331_v47 = vpop.eup %3783 }
 0x1d4   : > { %v771_v48 = vsel %vm640_vm4, %v4331_v47, 0.0  ;;  %v4335_v49 = vpop.eup %3785 }
 0x1d5   : > { %772 = vadd.xlane.f32.xlu0 %v771_v48  ;;  %v777_v57 = vsel %vm640_vm4, %v4335_v49, 0.0 }
 0x1d6   : > { %v731_v52 = vpop.xlane.xlu0 %730  ;;  %v728_v53 = vpop.xlane.xlu1 %727 }
 0x1d7   : > { %v4337_v51 = vpop.eup %3787  ;;  %v747_v54 = vsub.f32 %v707_v15, %v731_v52  ;;  %v746_v56 = vsub.f32 %v706_v19, %v728_v53 }
 0x1d8   : > { %v774_v59 = vsel %vm640_vm4, %v4337_v51, 0.0  ;;  %v4343_v60 = vpop.eup %3789 }
 0x1d9   : > { %778 = vadd.xlane.f32.xlu0 %v777_v57  ;;  %775 = vadd.xlane.f32.xlu1 %v774_v59  ;;  %v763_v62 = vmul.f32 1.442695, %v747_v54  ;;  %v761_v27 = vmul.f32 1.442695, %v746_v56  ;;  %v780_v2 = vsel %vm640_vm4, %v4343_v60, 0.0 }
 0x1da   : > { %v737_v14 = vpop.xlane.xlu0 %736  ;;  %v734_v29 = vpop.xlane.xlu1 %733 }
 0x1db   : > { %v4345_v61 = vpop.eup %3791  ;;  %3793 = vpow2.f32 %v763_v62  ;;  %v749_v63 = vsub.f32 %v709_v22, %v737_v14  ;;  %v748_v41 = vsub.f32 %v708_v23, %v734_v29 }
 0x1dc   : > { %v783_v16 = vsel %vm640_vm4, %v4345_v61, 0.0  ;;  %3795 = vpow2.f32 %v761_v27 }
 0x1dd   : > { %784 = vadd.xlane.f32.xlu0 %v783_v16  ;;  %781 = vadd.xlane.f32.xlu1 %v780_v2  ;;  %v767_v3 = vmul.f32 1.442695, %v749_v63  ;;  %v765_v4 = vmul.f32 1.442695, %v748_v41 }
 0x1de   : > { %v740_v5 = vpop.xlane.xlu1 %739 }
 0x1df   : > { %3797 = vpow2.f32 %v767_v3  ;;  %v750_v6 = vsub.f32 %v710_v45, %v740_v5  ;;  %v617_v45 = vunpack.c.l.s4 %v4116_v55 }
 0x1e0   : > { %3799 = vpow2.f32 %v765_v4 }
 0x1e1   : > { %v769_v10 = vmul.f32 1.442695, %v750_v6  ;;  %v618_v17 = vunpack.c.0.s8 %v617_v45 }
 0x1e3   : > { %3801 = vpow2.f32 %v769_v10  ;;  %v621_v30 = vsub.s32 %v618_v17, %v4375_v26 }
 0x1e5   : > { %v4351_v12 = vpop.eup %3793  ;;  %v622_v32 = vrot.slane %v3438_v28, %v621_v30  ;;  %v629_v35 = vrot.slane %v615_v31, %v621_v30 }
 0x1e6   : > { %v4353_v13 = vpop.eup %3795  ;;  %v789_v15 = vsel %vm640_vm4, %v4351_v12, 0.0 }
 0x1e7   : > { %790 = vadd.xlane.f32.xlu0 %v789_v15  ;;  %v786_v19 = vsel %vm640_vm4, %v4353_v13, 0.0  ;;  %v824_v36 = vrot.slane %v622_v32, %v823_v34  ;;  %v828_v37 = vrot.slane %v629_v35, %v823_v34 }
 0x1e8   : > { %787 = vadd.xlane.f32.xlu1 %v786_v19 }
 0x1e9   : > { %v3798_v20 = vpop.eup %3797 }
 0x1ea   : > { %v4359_v21 = vpop.eup %3799  ;;  %v795_v22 = vsel %vm640_vm4, %v3798_v20, 0.0 }
 0x1eb   : > { %796 = vadd.xlane.f32.xlu0 %v795_v22  ;;  %v792_v23 = vsel %vm640_vm4, %v4359_v21, 0.0 }
 0x1ec   : > { %793 = vadd.xlane.f32.xlu1 %v792_v23 }
 0x1ed   : > { %v4365_v25 = vpop.eup %3801 }
 0x1ee   : > { %v798_v9 = vsel %vm640_vm4, %v4365_v25, 0.0 }
 0x1f0   : > { %799 = vadd.xlane.f32.xlu1 %v798_v9 }
 0x201   : > { %830 = vperm.xlu0 %3768, %v824_v36   ;;  %834 = vperm.xlu1 %3769, %v828_v37  }
 0x262   : > { %v773_v39 = vpop.xlane.xlu0 %772 }
 0x263   : > { %3803 = vrcp.f32 %v773_v39 }
 0x266   : > { %v779_v40 = vpop.xlane.xlu0 %778  ;;  %v776_v42 = vpop.xlane.xlu1 %775 }
 0x267   : > { %3805 = vrcp.f32 %v776_v42  ;;  %v4448_v42 = vld [vmem:[%s387_s30] sm:$0xff] }
 0x268   : > { %3807 = vrcp.f32 %v779_v40  ;;  %3574 = vmatprep.subr.mxu1 %v4448_v42 }
 0x269   : > { %3575 = vmatpush3.msra.mxu1 %v4448_v42 }
 0x26a   : > { %v785_v43 = vpop.xlane.xlu0 %784  ;;  %v782_v44 = vpop.xlane.xlu1 %781  ;;  %3591 = vmatprep.subr.mxu1 %v4448_v42 }
 0x26b   : > { %3809 = vrcp.f32 %v782_v44 }
 0x26d   : > { %v3804_v56 = vpop.eup %3803 }
 0x26e   : > { %v811_v27 = vmul.f32 %v3804_v56, %v4331_v47 }
 0x271   : > { %v3806_v57 = vpop.eup %3805 }
 0x272   : > { %v3808_v59 = vpop.eup %3807  ;;  %v812_v14 = vmul.f32 %v3806_v57, %v4337_v51 }
 0x273   : > { %v813_v41 = vmul.f32 %v3808_v59, %v4335_v49 }
 0x274   : > { %v791_v48 = vpop.xlane.xlu0 %790 }
 0x275   : > { %v788_v52 = vpop.xlane.xlu1 %787  ;;  %v3810_v2 = vpop.eup %3809 }
 0x276   : > { %v814_v10 = vmul.f32 %v3810_v2, %v4343_v60 }
 0x278   : > { %v797_v53 = vpop.xlane.xlu0 %796 }
 0x279   : > { %3811 = vrcp.f32 %v797_v53  ;;  %v794_v54 = vpop.xlane.xlu1 %793 }
 0x27a   : > { %3813 = vrcp.f32 %v785_v43 }
 0x27b   : > { %3815 = vrcp.f32 %v788_v52 }
 0x27c   : > { %3817 = vrcp.f32 %v791_v48 }
 0x27d   : > { %v800_v62 = vpop.xlane.xlu1 %799  ;;  %3819 = vrcp.f32 %v794_v54 }
 0x27e   : > { %3821 = vrcp.f32 %v800_v62 }
 0x280   : > { %v4381_v29 = vpop.permute.xlu0 %830 }
 0x281   : > { %v4384_v16 = vmul.f32 %v4381_v29, %v811_v27  ;;  %v4387_v63 = vmul.f32 %v4381_v29, %v812_v14  ;;  %v4395_v51 = vmul.f32 %v4381_v29, %v813_v41  ;;  %v4397_v6 = vpop.permute.xlu1 %834  ;;  %v4406_v22 = vmul.f32 %v4381_v29, %v814_v10 }
 0x283   : > { %v3812_v3 = vpop.eup %3811  ;;  %v847_v4 = vsel %vm640_vm4, %v4384_v16, 0.0  ;;  %v850_v47 = vsel %vm640_vm4, %v4387_v63, 0.0  ;;  %v853_v19 = vsel %vm640_vm4, %v4395_v51, 0.0  ;;  %v856_v60 = vsel %vm640_vm4, %v4406_v22, 0.0 }
 0x284   : > { %848 = vadd.xlane.f32.xlu1 %v847_v4  ;;  %851 = vadd.xlane.f32.xlu0 %v850_v47  ;;  %v819_v5 = vmul.f32 %v3812_v3, %v3798_v20  ;;  %v3814_v49 = vpop.eup %3813 }
 0x285   : > { %v3816_v23 = vpop.eup %3815  ;;  %v815_v55 = vmul.f32 %v3814_v49, %v4345_v61 }
 0x286   : > { %v4401_v15 = vmul.f32 %v4397_v6, %v819_v5  ;;  %v816_v9 = vmul.f32 %v3816_v23, %v4353_v13  ;;  %v3818_v17 = vpop.eup %3817 }
 0x287   : > { %v4414_v45 = vmul.f32 %v4381_v29, %v815_v55  ;;  %v817_v61 = vmul.f32 %v3818_v17, %v4351_v12  ;;  %v3820_v31 = vpop.eup %3819 }
 0x288   : > { %854 = vadd.xlane.f32.xlu1 %v853_v19  ;;  %v871_v20 = vsel %vm640_vm4, %v4401_v15, 0.0  ;;  %v4420_v30 = vmul.f32 %v4397_v6, %v816_v9  ;;  %v818_v13 = vmul.f32 %v3820_v31, %v4359_v21  ;;  %v3822_v35 = vpop.eup %3821 }
 0x289   : > { %872 = vadd.xlane.f32.xlu0 %v871_v20  ;;  %v859_v28 = vsel %vm640_vm4, %v4414_v45, 0.0  ;;  %v4426_v34 = vmul.f32 %v4397_v6, %v817_v61  ;;  %v820_v12 = vmul.f32 %v3822_v35, %v4365_v25 }
 0x28a   : > { %v862_v32 = vsel %vm640_vm4, %v4420_v30, 0.0  ;;  %v4432_v37 = vmul.f32 %v4397_v6, %v818_v13 }
 0x28b   : > { %v865_v36 = vsel %vm640_vm4, %v4426_v34, 0.0  ;;  %v4438_v40 = vmul.f32 %v4397_v6, %v820_v12 }
 0x28c   : > { %857 = vadd.xlane.f32.xlu1 %v856_v60  ;;  %v868_v39 = vsel %vm640_vm4, %v4432_v37, 0.0 }
 0x28d   : > { %v874_v21 = vsel %vm640_vm4, %v4438_v40, 0.0 }
 0x290   : > { %860 = vadd.xlane.f32.xlu1 %v859_v28 }
 0x294   : > { %863 = vadd.xlane.f32.xlu1 %v862_v32 }
 0x298   : > { %866 = vadd.xlane.f32.xlu1 %v865_v36 }
 0x29c   : > { %869 = vadd.xlane.f32.xlu1 %v868_v39 }
 0x2a0   : > { %875 = vadd.xlane.f32.xlu1 %v874_v21 }
 0x311   : > { %v852_v25 = vpop.xlane.xlu0 %851  ;;  %v849_v43 = vpop.xlane.xlu1 %848 }
 0x312   : > { %3823 = vrcp.f32 %v852_v25 }
 0x313   : > { %3825 = vrcp.f32 %v849_v43 }
 0x315   : > { %v855_v44 = vpop.xlane.xlu1 %854 }
 0x316   : > { %3827 = vrcp.f32 %v855_v44 }
 0x319   : > { %v858_v48 = vpop.xlane.xlu1 %857 }
 0x31a   : > { %3829 = vrcp.f32 %v858_v48 }
 0x31c   : > { %v3824_v52 = vpop.eup %3823 }
 0x31d   : > { %v3826_v53 = vpop.eup %3825  ;;  %v4454_v54 = vmul.f32 %v3824_v52, %v4387_v63  ;;  %v861_v56 = vpop.xlane.xlu1 %860 }
 0x31e   : > { %v4457_v57 = vmul.f32 %v3826_v53, %v4384_v16  ;;  %3831 = vrcp.f32 %v861_v56  ;;  %v873_v63 = vpop.xlane.xlu0 %872 }
 0x31f   : > { %v1275_v59 = vsel %vm640_vm4, %v4454_v54, 0.0  ;;  %v1263_v13 = vmul.f32 8.0, %v4454_v54 }
 0x320   : > { %v3828_v62 = vpop.eup %3827  ;;  %3576 = vmatprep.mubr.msk.f32.mxu1 %vm640_vm4, %v4457_v57  ;;  %1276 = vadd.xlane.f32.xlu1 %v1275_v59  ;;  %v1272_v27 = vsel %vm640_vm4, %v4457_v57, 0.0  ;;  %v1262_v35 = vmul.f32 8.0, %v4457_v57 }
 0x321   : > { %v4466_v14 = vmul.f32 %v3828_v62, %v4395_v51  ;;  %1273 = vadd.xlane.f32.xlu0 %v1272_v27  ;;  %3577 = vmatmul.mubr.msk.f32.vlgmr.msra.gmra.mrb[0].mxu1 %vm640_vm4, %v4454_v54  ;;  %v864_v16 = vpop.xlane.xlu1 %863 }
 0x322   : > { %3833 = vrcp.f32 %v864_v16  ;;  %3592 = vmatpush3.msra.mxu1 %v4448_v42 }
 0x323   : > { %3579 = vmatprep.mubr.msk.f32.mxu1 %vm640_vm4, %v4466_v14  ;;  %v1278_v41 = vsel %vm640_vm4, %v4466_v14, 0.0  ;;  %3608 = vmatprep.subr.mxu1 %v4448_v42  ;;  %3835 = vrcp.f32 %v873_v63  ;;  %v1264_v21 = vmul.f32 8.0, %v4466_v14 }
 0x324   : > { %v3830_v2 = vpop.eup %3829 }
 0x325   : > { %v4477_v3 = vmul.f32 %v3830_v2, %v4406_v22  ;;  %1279 = vadd.xlane.f32.xlu0 %v1278_v41  ;;  %v867_v4 = vpop.xlane.xlu1 %866 }
 0x326   : > { %3837 = vrcp.f32 %v867_v4 }
 0x327   : > { %3580 = vmatmul.mubr.msk.f32.gmra.mrb[2].mxu1 %vm640_vm4, %v4477_v3  ;;  %v1281_v47 = vsel %vm640_vm4, %v4477_v3, 0.0  ;;  %v1265_v56 = vmul.f32 8.0, %v4477_v3 }
 0x328   : > { %v3832_v51 = vpop.eup %3831  ;;  %1282 = vadd.xlane.f32.xlu1 %v1281_v47 }
 0x329   : > { %v4484_v5 = vmul.f32 %v3832_v51, %v4414_v45  ;;  %v870_v10 = vpop.xlane.xlu1 %869 }
 0x32a   : > { %3839 = vrcp.f32 %v870_v10 }
 0x32b   : > { %3582 = vmatprep.mubr.msk.f32.mxu1 %vm640_vm4, %v4484_v5  ;;  %v1284_v49 = vsel %vm640_vm4, %v4484_v5, 0.0  ;;  %v1266_v41 = vmul.f32 8.0, %v4484_v5 }
 0x32c   : > { %v3834_v19 = vpop.eup %3833  ;;  %1285 = vadd.xlane.f32.xlu0 %v1284_v49 }
 0x32d   : > { %v4491_v22 = vmul.f32 %v3834_v19, %v4420_v30  ;;  %v876_v23 = vpop.xlane.xlu1 %875  ;;  %v3836_v20 = vpop.eup %3835 }
 0x32e   : > { %3841 = vrcp.f32 %v876_v23  ;;  %v4501_v9 = vmul.f32 %v3836_v20, %v4401_v15 }
 0x32f   : > { %3583 = vmatmul.mubr.msk.f32.gmra.mrb[4].mxu1 %vm640_vm4, %v4491_v22  ;;  %v1287_v55 = vsel %vm640_vm4, %v4491_v22, 0.0  ;;  %v1267_v19 = vmul.f32 8.0, %v4491_v22 }
 0x330   : > { %v3838_v60 = vpop.eup %3837  ;;  %1288 = vadd.xlane.f32.xlu1 %v1287_v55  ;;  %v1296_v61 = vsel %vm640_vm4, %v4501_v9, 0.0 }
 0x331   : > { %v4498_v45 = vmul.f32 %v3838_v60, %v4426_v34 }
 0x333   : > { %3585 = vmatprep.mubr.msk.f32.mxu1 %vm640_vm4, %v4498_v45  ;;  %v1290_v17 = vsel %vm640_vm4, %v4498_v45, 0.0 }
 0x334   : > { %v3840_v28 = vpop.eup %3839  ;;  %1291 = vadd.xlane.f32.xlu0 %v1290_v17 }
 0x335   : > { %v4508_v30 = vmul.f32 %v3840_v28, %v4432_v37  ;;  %v1268_v28 = vmul.f32 8.0, %v4498_v45 }
 0x337   : > { %3586 = vmatmul.mubr.msk.f32.gmra.mrb[6].mxu1 %vm640_vm4, %v4508_v30  ;;  %v1293_v15 = vsel %vm640_vm4, %v4508_v30, 0.0 }
 0x338   : > { %v3842_v31 = vpop.eup %3841  ;;  %1297 = vadd.xlane.f32.xlu0 %v1296_v61  ;;  %1294 = vadd.xlane.f32.xlu1 %v1293_v15 }
 0x339   : > { %v4517_v32 = vmul.f32 %v3842_v31, %v4438_v40  ;;  %3588 = vmatprep.mubr.msk.f32.mxu1 %vm640_vm4, %v4501_v9 }
 0x33b   : > { %3589 = vmatmul.mubr.msk.f32.gmra.mrb[8].mxu1 %vm640_vm4, %v4517_v32  ;;  %v1299_v34 = vsel %vm640_vm4, %v4517_v32, 0.0 }
 0x33c   : > { %1300 = vadd.xlane.f32.xlu1 %v1299_v34 }
 0x3ad   : > { %v1277_v36 = vpop.xlane.xlu1 %1276 }
 0x3ae   : > { %v1274_v37 = vpop.xlane.xlu0 %1273  ;;  %v1303_v12 = vsub.f32 %v1263_v13, %v1277_v36  ;;  %v1270_v13 = vmul.f32 8.0, %v4501_v9  ;;  %v1269_v36 = vmul.f32 8.0, %v4508_v30 }
 0x3af   : > { %v1302_v39 = vsub.f32 %v1262_v35, %v1274_v37 }
 0x3b0   : > { %vm1313_vm2 = vcmp.gt.f32.partialorder %v1303_v12, 0.0 }
 0x3b1   : > { %vm1312_vm3 = vcmp.gt.f32.partialorder %v1302_v39, 0.0  ;;  %v1323_v40 = vsel %vm1313_vm2, 1.0, %v5712_v0 }
 0x3b2   : > { %v1322_v25 = vsel %vm1312_vm3, 1.0, %v5712_v0  ;;  %v1280_v43 = vpop.xlane.xlu0 %1279  ;;  %v4531_v44 = vmul.f32 %v1323_v40, %v4454_v54 }
 0x3b3   : > { %v1304_v48 = vsub.f32 %v1264_v21, %v1280_v43  ;;  %v4534_v52 = vmul.f32 %v1322_v25, %v4457_v57 }
 0x3b4   : > { %v1345_v53 = vsel %vm640_vm4, %v4531_v44, 0.0 }
 0x3b5   : > { %vm1314_vm5 = vcmp.gt.f32.partialorder %v1304_v48, 0.0  ;;  %v1342_v59 = vsel %vm640_vm4, %v4534_v52, 0.0  ;;  %1346 = vadd.xlane.f32.xlu1 %v1345_v53  ;;  %v1283_v62 = vpop.xlane.xlu1 %1282  ;;  %v1271_v48 = vmul.f32 8.0, %v4517_v32 }
 0x3b6   : > { %v1324_v27 = vsel %vm1314_vm5, 1.0, %v5712_v0  ;;  %1343 = vadd.xlane.f32.xlu0 %v1342_v59  ;;  %v1305_v16 = vsub.f32 %v1265_v56, %v1283_v62 }
 0x3b7   : > { %v4543_v63 = vmul.f32 %v1324_v27, %v4466_v14 }
 0x3b8   : > { %vm1315_vm6 = vcmp.gt.f32.partialorder %v1305_v16, 0.0 }
 0x3b9   : > { %v1325_v2 = vsel %vm1315_vm6, 1.0, %v5712_v0  ;;  %v1286_v4 = vpop.xlane.xlu0 %1285  ;;  %v1348_v47 = vsel %vm640_vm4, %v4543_v63, 0.0 }
 0x3ba   : > { %v1306_v51 = vsub.f32 %v1266_v41, %v1286_v4  ;;  %1349 = vadd.xlane.f32.xlu0 %v1348_v47  ;;  %v4550_v10 = vmul.f32 %v1325_v2, %v4477_v3 }
 0x3bc   : > { %vm1316_vm7 = vcmp.gt.f32.partialorder %v1306_v51, 0.0  ;;  %v1351_v49 = vsel %vm640_vm4, %v4550_v10, 0.0 }
 0x3bd   : > { %v1326_v23 = vsel %vm1316_vm7, 1.0, %v5712_v0  ;;  %1352 = vadd.xlane.f32.xlu1 %v1351_v49  ;;  %v1289_v20 = vpop.xlane.xlu1 %1288 }
 0x3be   : > { %v1307_v55 = vsub.f32 %v1267_v19, %v1289_v20  ;;  %v4557_v60 = vmul.f32 %v1326_v23, %v4484_v5 }
 0x3c0   : > { %vm1317_vm8 = vcmp.gt.f32.partialorder %v1307_v55, 0.0  ;;  %v1354_v17 = vsel %vm640_vm4, %v4557_v60, 0.0 }
 0x3c1   : > { %v1327_v61 = vsel %vm1317_vm8, 1.0, %v5712_v0  ;;  %1355 = vadd.xlane.f32.xlu0 %v1354_v17  ;;  %v1292_v15 = vpop.xlane.xlu0 %1291 }
 0x3c2   : > { %v1308_v31 = vsub.f32 %v1268_v28, %v1292_v15  ;;  %v4564_v34 = vmul.f32 %v1327_v61, %v4491_v22 }
 0x3c4   : > { %vm1318_vm9 = vcmp.gt.f32.partialorder %v1308_v31, 0.0  ;;  %v1357_v35 = vsel %vm640_vm4, %v4564_v34, 0.0 }
 0x3c5   : > { %v1328_v37 = vsel %vm1318_vm9, 1.0, %v5712_v0  ;;  %v1298_v12 = vpop.xlane.xlu0 %1297  ;;  %1358 = vadd.xlane.f32.xlu1 %v1357_v35  ;;  %v1295_v39 = vpop.xlane.xlu1 %1294 }
 0x3c6   : > { %v1310_v40 = vsub.f32 %v1270_v13, %v1298_v12  ;;  %v1309_v21 = vsub.f32 %v1269_v36, %v1295_v39  ;;  %v4572_v25 = vmul.f32 %v1328_v37, %v4498_v45 }
 0x3c8   : > { %vm1320_vm10 = vcmp.gt.f32.partialorder %v1310_v40, 0.0  ;;  %vm1319_vm11 = vcmp.gt.f32.partialorder %v1309_v21, 0.0  ;;  %v1360_v43 = vsel %vm640_vm4, %v4572_v25, 0.0 }
 0x3c9   : > { %v1330_v53 = vsel %vm1320_vm10, 1.0, %v5712_v0  ;;  %v1329_v56 = vsel %vm1319_vm11, 1.0, %v5712_v0  ;;  %1361 = vadd.xlane.f32.xlu0 %v1360_v43  ;;  %v1301_v59 = vpop.xlane.xlu1 %1300 }
 0x3ca   : > { %v1311_v62 = vsub.f32 %v1271_v48, %v1301_v59  ;;  %v4580_v27 = vmul.f32 %v1330_v53, %v4501_v9  ;;  %v4583_v16 = vmul.f32 %v1329_v56, %v4508_v30 }
 0x3cc   : > { %vm1321_vm12 = vcmp.gt.f32.partialorder %v1311_v62, 0.0  ;;  %v1366_v41 = vsel %vm640_vm4, %v4580_v27, 0.0  ;;  %v1363_v2 = vsel %vm640_vm4, %v4583_v16, 0.0 }
 0x3cd   : > { %v1331_v4 = vsel %vm1321_vm12, 1.0, %v5712_v0  ;;  %1367 = vadd.xlane.f32.xlu0 %v1366_v41  ;;  %1364 = vadd.xlane.f32.xlu1 %v1363_v2 }
 0x3ce   : > { %v4591_v47 = vmul.f32 %v1331_v4, %v4517_v32 }
 0x3d0   : > { %v1369_v51 = vsel %vm640_vm4, %v4591_v47, 0.0 }
 0x3d1   : > { %1370 = vadd.xlane.f32.xlu1 %v1369_v51 }
 0x3f4   : > { %v4595_v49 = vpop.f32.mrb[0].mxu1 }
 0x3f5   : > { %v4597_v19 = vpop.f32.mrb[1].mxu1 }
 0x3fa   : > { %v4599_v23 = vpop.f32.mrb[2].mxu1  ;;  %2436 = vxpose.xlu0.b32.start [1/5] (short) (narrow) %v4216_v8, 8 }
 0x3fb   : > { %v4602_v20 = vpop.f32.mrb[3].mxu1 }
 0x3fe   : > { %2437 = vxpose.xlu0.b32.cont [2/5] (short) (narrow) %v4220_v11, 8 }
 0x402   : > { %v4605_v55 = vpop.f32.mrb[4].mxu1  ;;  %2438 = vxpose.xlu0.b32.cont [3/5] (short) (narrow) %v4234_v18, 8 }
 0x403   : > { %v4608_v17 = vpop.f32.mrb[5].mxu1 }
 0x404   : > { %2468 = vxpose.xlu1.b32.start [1/5] (short) (narrow) %v4260_v38, 8 }
 0x406   : > { %2439 = vxpose.xlu0.b32.cont [4/5] (short) (narrow) %v4240_v24, 8 }
 0x408   : > { %2469 = vxpose.xlu1.b32.cont [2/5] (short) (narrow) %v4273_v46, 8 }
 0x40a   : > { %2440 = vxpose.xlu0.b32.end [5/5] (short) (narrow) %v4255_v33, 8  ;;  %v4614_v28 = vpop.f32.mrb[6].mxu1 }
 0x40b   : > { %v4616_v61 = vpop.f32.mrb[7].mxu1 }
 0x40c   : > { %2470 = vxpose.xlu1.b32.cont [3/5] (short) (narrow) %v4277_v50, 8 }
 0x40e   : > { %v4619_v15 = vpop.f32.mrb[8].mxu1 }
 0x40f   : > { %v4621_v31 = vpop.f32.mrb[9].mxu1 }
 0x410   : > { %2471 = vxpose.xlu1.b32.cont [4/5] (short) (narrow) %v4295_v1, 8 }
 0x414   : > { %2472 = vxpose.xlu1.b32.end [5/5] (short) (narrow) %v4300_v7, 8 }
 0x442   : > { %v1347_v13 = vpop.xlane.xlu1 %1346 }
 0x443   : > { %v1344_v35 = vpop.xlane.xlu0 %1343  ;;  %3843 = vrcp.f32 %v1347_v13 }
 0x444   : > { %3845 = vrcp.f32 %v1344_v35 }
 0x447   : > { %v1350_v36 = vpop.xlane.xlu0 %1349 }
 0x448   : > { %3847 = vrcp.f32 %v1350_v36 }
 0x44a   : > { %v1353_v37 = vpop.xlane.xlu1 %1352 }
 0x44b   : > { %3849 = vrcp.f32 %v1353_v37 }
 0x44d   : > { %v3844_v12 = vpop.eup %3843 }
 0x44e   : > { %v3846_v39 = vpop.eup %3845  ;;  %v4626_v40 = vmul.f32 %v3844_v12, %v4531_v44  ;;  %v1356_v21 = vpop.xlane.xlu0 %1355 }
 0x44f   : > { %3851 = vrcp.f32 %v1356_v21  ;;  %v4629_v43 = vmul.f32 %v3846_v39, %v4534_v52 }
 0x451   : > { %3593 = vmatprep.mubr.msk.f32.mxu1 %vm640_vm4, %v4629_v43 }
 0x452   : > { %v3848_v48 = vpop.eup %3847  ;;  %3594 = vmatmul.mubr.msk.f32.vlgmr.msra.gmra.mrb[10].mxu1 %vm640_vm4, %v4626_v40  ;;  %v1359_v53 = vpop.xlane.xlu1 %1358 }
 0x453   : > { %3853 = vrcp.f32 %v1359_v53  ;;  %v4636_v56 = vmul.f32 %v3848_v48, %v4543_v63  ;;  %3609 = vmatpush3.msra.mxu1 %v4448_v42 }
 0x455   : > { %v3850_v44 = vpop.eup %3849  ;;  %3596 = vmatprep.mubr.msk.f32.mxu1 %vm640_vm4, %v4636_v56 }
 0x456   : > { %v1362_v52 = vpop.xlane.xlu0 %1361  ;;  %v4642_v59 = vmul.f32 %v3850_v44, %v4550_v10 }
 0x457   : > { %3855 = vrcp.f32 %v1362_v52 }
 0x458   : > { %3597 = vmatmul.mubr.msk.f32.gmra.mrb[12].mxu1 %vm640_vm4, %v4642_v59 }
 0x459   : > { %v3852_v62 = vpop.eup %3851 }
 0x45a   : > { %v1368_v41 = vpop.xlane.xlu0 %1367  ;;  %v1365_v2 = vpop.xlane.xlu1 %1364  ;;  %v4647_v63 = vmul.f32 %v3852_v62, %v4557_v60 }
 0x45b   : > { %3857 = vrcp.f32 %v1368_v41 }
 0x45c   : > { %3859 = vrcp.f32 %v1365_v2  ;;  %3599 = vmatprep.mubr.msk.f32.mxu1 %vm640_vm4, %v4647_v63 }
 0x45d   : > { %v3854_v42 = vpop.eup %3853 }
 0x45e   : > { %v1371_v4 = vpop.xlane.xlu1 %1370  ;;  %v4652_v10 = vmul.f32 %v3854_v42, %v4564_v34 }
 0x45f   : > { %3861 = vrcp.f32 %v1371_v4 }
 0x460   : > { %3600 = vmatmul.mubr.msk.f32.gmra.mrb[14].mxu1 %vm640_vm4, %v4652_v10 }
 0x461   : > { %v3856_v51 = vpop.eup %3855 }
 0x462   : > { %v4657_v13 = vmul.f32 %v3856_v51, %v4572_v25 }
 0x464   : > { %3602 = vmatprep.mubr.msk.f32.mxu1 %vm640_vm4, %v4657_v13 }
 0x465   : > { %v3858_v60 = vpop.eup %3857 }
 0x466   : > { %v3860_v35 = vpop.eup %3859  ;;  %v4662_v36 = vmul.f32 %v3858_v60, %v4580_v27 }
 0x467   : > { %v4665_v37 = vmul.f32 %v3860_v35, %v4583_v16 }
 0x469   : > { %v3862_v34 = vpop.eup %3861  ;;  %3603 = vmatmul.mubr.msk.f32.gmra.mrb[16].mxu1 %vm640_vm4, %v4665_v37 }
 0x46a   : > { %3605 = vmatprep.mubr.msk.f32.mxu1 %vm640_vm4, %v4662_v36  ;;  %v4672_v25 = vmul.f32 %v3862_v34, %v4591_v47 }
 0x46d   : > { %3606 = vmatmul.mubr.msk.f32.gmra.mrb[18].mxu1 %vm640_vm4, %v4672_v25 }
 0x47a   : > { %v4676_v12 = vpop.trf.xlu0 }
 0x47b   : > { %vm2500_vm13 = vcmp.gt.f32.partialorder %v4676_v12, 0.0  ;;  %v2502_v27 = vmul.f32 0.1, %v4676_v12 }
 0x47d   : > { %v2504_v16 = vsel %vm2500_vm13, %v4676_v12, %v2502_v27 }
 0x47e   : > { %v2506_v39 = vmul.f32 %v2504_v16, %v2504_v16 }
 0x480   : > { %v2509_v21 = vsel %vm2508_vm14, %v2506_v39, 0.0 }
 0x481   : > { %v2510_v48 = vrot.slane %v2509_v21, 4 }
 0x483   : > { %v2511_v53 = vadd.f32 %v2510_v48, %v2509_v21 }
 0x484   : > { %v4682_v44 = vpop.trf.xlu1 }
 0x485   : > { %5719 = vst [vmem:[#allocation3_spill] sm:$0xff] %v4682_v44  ;;  %v2512_v47 = vrot.slane %v2511_v53, 2  ;;  %vm2501_vm15 = vcmp.gt.f32.partialorder %v4682_v44, 0.0  ;;  %v2503_v52 = vmul.f32 0.1, %v4682_v44 }
 0x487   : > { %v2513_v62 = vadd.f32 %v2512_v47, %v2511_v53  ;;  %v2505_v41 = vsel %vm2501_vm15, %v4682_v44, %v2503_v52 }
 0x488   : > { %v2507_v2 = vmul.f32 %v2505_v41, %v2505_v41 }
 0x489   : > { %v2514_v42 = vrot.slane %v2513_v62, 1 }
 0x48a   : > { %v2516_v4 = vsel %vm2508_vm14, %v2507_v2, 0.0 }
 0x48b   : > { %v2515_v51 = vadd.f32 %v2514_v42, %v2513_v62  ;;  %v2517_v60 = vrot.slane %v2516_v4, 4 }
 0x48d   : > { %v2523_v35 = vadd.f32 1e-08, %v2515_v51  ;;  %v2518_v34 = vadd.f32 %v2517_v60, %v2516_v4  ;;  %v5720_v51 = vlaneseq }
 0x48f   : > { %3863 = vrsqrt.f32 %v2523_v35  ;;  %v2519_v27 = vrot.slane %v2518_v34, 2  ;;  %vm2527_vm1 = vcmp.eq.f32.partialorder %v2523_v35, inf  ;;  %v2530_v26 = vand.u32 2147483648, %v2523_v35 }
 0x490   : > { %vm2529_vm2 = vcmp.eq.f32.partialorder %v2523_v35, 0.0  ;;  %v2546_v60 = vand.u32 127, %v5720_v51 }
 0x491   : > { %v2520_v39 = vadd.f32 %v2519_v27, %v2518_v34 }
 0x492   : > { %vm2547_vm6 = vcmp.lt.s32.totalorder %v2546_v60, 36  ;;  %v1087_v60 = vmul.f32 %v4605_v55, %v4491_v22 }
 0x493   : > { %v2521_v21 = vrot.slane %v2520_v39, 1 }
 0x495   : > { %v2522_v48 = vadd.f32 %v2521_v21, %v2520_v39 }
 0x497   : > { %v2524_v0 = vadd.f32 1e-08, %v2522_v48 }
 0x499   : > { %v3864_v58 = vpop.eup %3863  ;;  %3865 = vrsqrt.f32 %v2524_v0  ;;  %vm2534_vm3 = vcmp.eq.f32.partialorder %v2524_v0, inf  ;;  %v2537_v2 = vand.u32 2147483648, %v2524_v0  ;;  %vm2536_vm5 = vcmp.eq.f32.partialorder %v2524_v0, 0.0 }
 0x49a   : > { %v2526_v53 = vmul.f32 %v3864_v58, %v2523_v35 }
 0x49c   : > { %v2528_v47 = vsel %vm2527_vm1, %v2523_v35, %v2526_v53 }
 0x49d   : > { %v2531_v52 = vsel %vm2529_vm2, %v2530_v26, %v2528_v47  ;;  %v1082_v47 = vmul.f32 %v4597_v19, %v4457_v57  ;;  %v1084_v19 = vmul.f32 %v4602_v20, %v4466_v14 }
 0x49e   : > { %v2539_v44 = vadd.f32 1e-08, %v2531_v52 }
 0x4a0   : > { %3867 = vrcp.f32 %v2539_v44  ;;  %v897_v44 = vmul.f32 %v4457_v57, %v4216_v8 }
 0x4a2   : > { %v907_v35 = vsel %vm640_vm4, %v897_v44, 0.0 }
 0x4a3   : > { %v3866_v62 = vpop.eup %3865 }
 0x4a4   : > { %v2533_v42 = vmul.f32 %v3866_v62, %v2524_v0 }
 0x4a6   : > { %v2535_v4 = vsel %vm2534_vm3, %v2524_v0, %v2533_v42  ;;  %v1083_v0 = vmul.f32 %v4595_v49, %v4454_v54  ;;  %v1392_v49 = vmul.f32 %v4629_v43, %v4216_v8 }
 0x4a7   : > { %v2538_v34 = vsel %vm2536_vm5, %v2537_v2, %v2535_v4  ;;  %v1085_v4 = vmul.f32 %v4599_v23, %v4477_v3  ;;  %v1086_v23 = vmul.f32 %v4608_v17, %v4484_v5 }
 0x4a8   : > { %v2540_v27 = vadd.f32 1e-08, %v2538_v34  ;;  %v1095_v52 = vsel %vm640_vm4, %v1083_v0, 0.0  ;;  %v1402_v57 = vsel %vm640_vm4, %v1392_v49, 0.0  ;;  %v1098_v34 = vsel %vm640_vm4, %v1084_v19, 0.0 }
 0x4a9   : > { %v1101_v51 = vsel %vm640_vm4, %v1085_v4, 0.0  ;;  %v1104_v20 = vsel %vm640_vm4, %v1086_v23, 0.0  ;;  %v906_v49 = vmul.f32 %v4517_v32, %v4300_v7 }
 0x4aa   : > { %v3868_v39 = vpop.eup %3867  ;;  %3869 = vrcp.f32 %v2540_v27  ;;  %v1107_v27 = vsel %vm640_vm4, %v1087_v60, 0.0 }
 0x4ab   : > { %v2543_v21 = vmul.f32 %v3868_v39, %v2504_v16  ;;  %v1089_v39 = vmul.f32 %v4614_v28, %v4508_v30 }
 0x4ad   : > { %v2548_v58 = vmul.f32 9.0, %v2543_v21  ;;  %v1088_v21 = vmul.f32 %v4616_v61, %v4498_v45  ;;  %v1113_v55 = vsel %vm640_vm4, %v1089_v39, 0.0  ;;  %v898_v61 = vmul.f32 %v4454_v54, %v4220_v11 }
 0x4af   : > { %v4689_v48 = vsel %vm2547_vm6, %v2548_v58, -1e+30  ;;  %v1091_v58 = vmul.f32 %v4619_v15, %v4517_v32  ;;  %v1110_v17 = vsel %vm640_vm4, %v1088_v21, 0.0  ;;  %v910_v0 = vsel %vm640_vm4, %v898_v61, 0.0 }
 0x4b0   : > { %v2554_v26 = vsel %vm2508_vm14, %v4689_v48, -inf  ;;  %v899_v15 = vmul.f32 %v4466_v14, %v4234_v18 }
 0x4b1   : > { %2555 = vmax.xlane.f32.xlu0 %v2554_v26  ;;  %v1090_v26 = vmul.f32 %v4621_v31, %v4501_v9  ;;  %v1119_v28 = vsel %vm640_vm4, %v1091_v58, 0.0  ;;  %v900_v31 = vmul.f32 %v4477_v3, %v4240_v24 }
 0x4b3   : > { %v1116_v44 = vsel %vm640_vm4, %v1090_v26, 0.0 }
 0x4b4   : > { %v3870_v53 = vpop.eup %3869 }
 0x4b5   : > { %908 = vadd.xlane.f32.xlu0 %v907_v35  ;;  %v2544_v16 = vmul.f32 %v3870_v53, %v2505_v41  ;;  %v1092_v41 = vsel %vm640_vm4, %v1082_v47, 0.0  ;;  %v913_v35 = vsel %vm640_vm4, %v899_v15, 0.0  ;;  %v916_v53 = vsel %vm640_vm4, %v900_v31, 0.0 }
 0x4b6   : > { %v902_v47 = vmul.f32 %v4491_v22, %v4260_v38 }
 0x4b7   : > { %v2549_v62 = vmul.f32 9.0, %v2544_v16  ;;  %v901_v16 = vmul.f32 %v4484_v5, %v4255_v33 }
 0x4b8   : > { %v922_v14 = vsel %vm640_vm4, %v902_v47, 0.0 }
 0x4b9   : > { %1096 = vadd.xlane.f32.xlu0 %v1095_v52  ;;  %v4701_v2 = vsel %vm2547_vm6, %v2549_v62, -1e+30  ;;  %v919_v54 = vsel %vm640_vm4, %v901_v16, 0.0  ;;  %v903_v52 = vmul.f32 %v4498_v45, %v4273_v46  ;;  %v904_v62 = vmul.f32 %v4508_v30, %v4277_v50 }
 0x4ba   : > { %v2557_v42 = vsel %vm2508_vm14, %v4701_v2, -inf  ;;  %v934_v45 = vsel %vm640_vm4, %v906_v49, 0.0  ;;  %v1395_v49 = vmul.f32 %v4642_v59, %v4240_v24 }
 0x4bb   : > { %2558 = vmax.xlane.f32.xlu1 %v2557_v42  ;;  %v925_v3 = vsel %vm640_vm4, %v903_v52, 0.0  ;;  %v928_v5 = vsel %vm640_vm4, %v904_v62, 0.0  ;;  %v905_v42 = vmul.f32 %v4501_v9, %v4295_v1  ;;  %v1393_v62 = vmul.f32 %v4626_v40, %v4220_v11 }
 0x4bd   : > { %1093 = vadd.xlane.f32.xlu0 %v1092_v41  ;;  %v931_v22 = vsel %vm640_vm4, %v905_v42, 0.0  ;;  %v1394_v42 = vmul.f32 %v4636_v56, %v4234_v18 }
 0x4bf   : > { %1403 = vadd.xlane.f32.xlu1 %v1402_v57 }
 0x4c1   : > { %1102 = vadd.xlane.f32.xlu0 %v1101_v51 }
 0x4c5   : > { %1099 = vadd.xlane.f32.xlu0 %v1098_v34 }
 0x4c9   : > { %1108 = vadd.xlane.f32.xlu0 %v1107_v27 }
 0x4cd   : > { %1105 = vadd.xlane.f32.xlu0 %v1104_v20 }
 0x4d1   : > { %1114 = vadd.xlane.f32.xlu0 %v1113_v55 }
 0x4d5   : > { %1111 = vadd.xlane.f32.xlu0 %v1110_v17 }
 0x4d9   : > { %1120 = vadd.xlane.f32.xlu0 %v1119_v28 }
 0x4dd   : > { %1117 = vadd.xlane.f32.xlu0 %v1116_v44 }
 0x4e1   : > { %911 = vadd.xlane.f32.xlu0 %v910_v0 }
 0x4e5   : > { %914 = vadd.xlane.f32.xlu0 %v913_v35 }
 0x4e9   : > { %917 = vadd.xlane.f32.xlu0 %v916_v53 }
 0x4ed   : > { %920 = vadd.xlane.f32.xlu0 %v919_v54 }
 0x4f1   : > { %923 = vadd.xlane.f32.xlu0 %v922_v14 }
 0x4f5   : > { %926 = vadd.xlane.f32.xlu0 %v925_v3 }
 0x4f9   : > { %929 = vadd.xlane.f32.xlu0 %v928_v5  ;;  %v1405_v5 = vsel %vm640_vm4, %v1393_v62, 0.0 }
 0x4fd   : > { %932 = vadd.xlane.f32.xlu0 %v931_v22  ;;  %v1408_v22 = vsel %vm640_vm4, %v1394_v42, 0.0 }
 0x501   : > { %935 = vadd.xlane.f32.xlu0 %v934_v45  ;;  %v1411_v45 = vsel %vm640_vm4, %v1395_v49, 0.0 }
 0x525   : > { %v3595_v4 = vpop.f32.mrb[10].mxu1 }
 0x526   : > { %v1578_v41 = vmul.f32 %v3595_v4, %v4626_v40  ;;  %v1528_v30 = vpop.f32.mrb[11].mxu1  ;;  %v1396_v4 = vmul.f32 %v4647_v63, %v4255_v33 }
 0x527   : > { %v1577_v57 = vmul.f32 %v1528_v30, %v4629_v43 }
 0x528   : > { %v1590_v19 = vsel %vm640_vm4, %v1578_v41, 0.0 }
 0x529   : > { %1591 = vadd.xlane.f32.xlu1 %v1590_v19  ;;  %v1587_v34 = vsel %vm640_vm4, %v1577_v57, 0.0  ;;  %v1414_v57 = vsel %vm640_vm4, %v1396_v4, 0.0  ;;  %v1397_v19 = vmul.f32 %v4652_v10, %v4260_v38 }
 0x52b   : > { %v3598_v9 = vpop.f32.mrb[12].mxu1 }
 0x52c   : > { %v1580_v51 = vmul.f32 %v3598_v9, %v4642_v59  ;;  %v1538_v60 = vpop.f32.mrb[13].mxu1 }
 0x52d   : > { %1588 = vadd.xlane.f32.xlu1 %v1587_v34  ;;  %v1579_v23 = vmul.f32 %v1538_v60, %v4636_v56  ;;  %v1398_v60 = vmul.f32 %v4657_v13, %v4273_v46 }
 0x52e   : > { %v1596_v32 = vsel %vm640_vm4, %v1580_v51, 0.0  ;;  %v1417_v51 = vsel %vm640_vm4, %v1397_v19, 0.0 }
 0x52f   : > { %v1593_v21 = vsel %vm640_vm4, %v1579_v23, 0.0  ;;  %v1399_v23 = vmul.f32 %v4665_v37, %v4277_v50 }
 0x531   : > { %1597 = vadd.xlane.f32.xlu1 %v1596_v32  ;;  %v1420_v32 = vsel %vm640_vm4, %v1398_v60, 0.0 }
 0x533   : > { %v3601_v27 = vpop.f32.mrb[14].mxu1 }
 0x534   : > { %v1582_v39 = vmul.f32 %v3601_v27, %v4652_v10  ;;  %v1548_v20 = vpop.f32.mrb[15].mxu1  ;;  %v1423_v27 = vsel %vm640_vm4, %v1399_v23, 0.0 }
 0x535   : > { %1594 = vadd.xlane.f32.xlu1 %v1593_v21  ;;  %v1581_v58 = vmul.f32 %v1548_v20, %v4647_v63  ;;  %v1401_v20 = vmul.f32 %v4672_v25, %v4300_v7 }
 0x536   : > { %v1602_v55 = vsel %vm640_vm4, %v1582_v39, 0.0  ;;  %v1400_v39 = vmul.f32 %v4662_v36, %v4295_v1 }
 0x537   : > { %v1599_v26 = vsel %vm640_vm4, %v1581_v58, 0.0  ;;  %v1429_v21 = vsel %vm640_vm4, %v1401_v20, 0.0  ;;  %v4842_v20 = vld [vmem:[%s5709_s5 + $0x10] sm:$0xff] }
 0x539   : > { %1603 = vadd.xlane.f32.xlu1 %v1602_v55 }
 0x53c   : > { %v3604_v17 = vpop.f32.mrb[16].mxu1 }
 0x53d   : > { %v1584_v28 = vmul.f32 %v3604_v17, %v4665_v37  ;;  %v1558_v44 = vpop.f32.mrb[17].mxu1  ;;  %1600 = vadd.xlane.f32.xlu1 %v1599_v26 }
 0x53e   : > { %v1583_v0 = vmul.f32 %v1558_v44, %v4657_v13  ;;  %v2556_v30 = vpop.xlane.xlu0 %2555 }
 0x53f   : > { %v1608_v61 = vsel %vm640_vm4, %v1584_v28, 0.0  ;;  %v2560_v9 = vsub.f32 %v4689_v48, %v2556_v30  ;;  %v1426_v48 = vsel %vm640_vm4, %v1400_v39, 0.0 }
 0x540   : > { %v3607_v15 = vpop.f32.mrb[18].mxu1  ;;  %v1605_v53 = vsel %vm640_vm4, %v1583_v0, 0.0 }
 0x541   : > { %v1568_v35 = vpop.f32.mrb[19].mxu1  ;;  %1609 = vadd.xlane.f32.xlu1 %v1608_v61  ;;  %v1586_v31 = vmul.f32 %v3607_v15, %v4672_v25  ;;  %v2562_v34 = vmul.f32 1.442695, %v2560_v9 }
 0x542   : > { %v1585_v16 = vmul.f32 %v1568_v35, %v4662_v36  ;;  %v4817_v17 = vpop.xlane.xlu0 %908 }
 0x543   : > { %v1614_v54 = vsel %vm640_vm4, %v1586_v31, 0.0 }
 0x544   : > { %v1611_v3 = vsel %vm640_vm4, %v1585_v16, 0.0 }
 0x545   : > { %1606 = vadd.xlane.f32.xlu1 %v1605_v53 }
 0x546   : > { %v1097_v26 = vpop.xlane.xlu0 %1096 }
 0x547   : > { %v1123_v15 = vmax.f32 %v1097_v26, 0.0 }
 0x548   : > { %v2559_v47 = vpop.xlane.xlu1 %2558 }
 0x549   : > { %1615 = vadd.xlane.f32.xlu1 %v1614_v54  ;;  %v2561_v14 = vsub.f32 %v4701_v2, %v2559_v47  ;;  %vm1141_vm9 = vcmp.eq.f32.partialorder %v1123_v15, inf  ;;  %v1144_v19 = vand.u32 2147483648, %v1123_v15  ;;  %vm1143_vm11 = vcmp.eq.f32.partialorder %v1123_v15, 0.0 }
 0x54a   : > { %v1094_v28 = vpop.xlane.xlu0 %1093 }
 0x54b   : > { %v2564_v52 = vmul.f32 1.442695, %v2561_v14  ;;  %v1122_v61 = vmax.f32 %v1094_v28, 0.0 }
 0x54c   : > { %v4844_v26 = vpop.xlane.xlu1 %1403 }
 0x54d   : > { %1612 = vadd.xlane.f32.xlu1 %v1611_v3  ;;  %3871 = vpow2.f32 %v2564_v52  ;;  %vm1134_vm7 = vcmp.eq.f32.partialorder %v1122_v61, inf  ;;  %v1137_v49 = vand.u32 2147483648, %v1122_v61  ;;  %vm1136_vm8 = vcmp.eq.f32.partialorder %v1122_v61, 0.0 }
 0x54e   : > { %3873 = vpow2.f32 %v2562_v34  ;;  %v1103_v44 = vpop.xlane.xlu0 %1102 }
 0x54f   : > { %3875 = vrsqrt.f32 %v1122_v61  ;;  %v1125_v16 = vmax.f32 %v1103_v44, 0.0 }
 0x550   : > { %3877 = vrsqrt.f32 %v1123_v15 }
 0x551   : > { %1406 = vadd.xlane.f32.xlu1 %v1405_v5  ;;  %vm1155_vm13 = vcmp.eq.f32.partialorder %v1125_v16, inf  ;;  %vm1157_vm15 = vcmp.eq.f32.partialorder %v1125_v16, 0.0 }
 0x552   : > { %v1100_v0 = vpop.xlane.xlu0 %1099 }
 0x553   : > { %v1124_v35 = vmax.f32 %v1100_v0, 0.0 }
 0x555   : > { %1409 = vadd.xlane.f32.xlu1 %v1408_v22  ;;  %3879 = vrsqrt.f32 %v1124_v35  ;;  %vm1148_vm10 = vcmp.eq.f32.partialorder %v1124_v35, inf  ;;  %vm1150_vm12 = vcmp.eq.f32.partialorder %v1124_v35, 0.0 }
 0x556   : > { %v1109_v31 = vpop.xlane.xlu0 %1108  ;;  %3881 = vrsqrt.f32 %v1125_v16 }
 0x557   : > { %v4789_v2 = vpop.eup %3871  ;;  %v4819_v14 = vmax.f32 %v1109_v31, 0.0 }
 0x558   : > { %v2569_v41 = vsel %vm2508_vm14, %v4789_v2, 0.0  ;;  %v4813_v55 = vpop.eup %3873 }
 0x559   : > { %1412 = vadd.xlane.f32.xlu1 %v1411_v45  ;;  %2570 = vadd.xlane.f32.xlu0 %v2569_v41  ;;  %v2566_v58 = vsel %vm2508_vm14, %v4813_v55, 0.0  ;;  %v3876_v53 = vpop.eup %3875  ;;  %3883 = vrsqrt.f32 %v4819_v14  ;;  %v4829_v41 = vld [vmem:[%s5709_s5] sm:$0xff]  ;;  %vm1169_vm1 = vcmp.eq.f32.partialorder %v4819_v14, inf  ;;  %vm1171_vm2 = vcmp.eq.f32.partialorder %v4819_v14, 0.0 }
 0x55a   : > { %v1106_v54 = vpop.xlane.xlu0 %1105  ;;  %v1133_v47 = vmul.f32 %v3876_v53, %v1122_v61  ;;  %v3878_v52 = vpop.eup %3877 }
 0x55b   : > { %v4822_v42 = vmax.f32 %v1106_v54, 0.0  ;;  %v1140_v22 = vmul.f32 %v3878_v52, %v1123_v15  ;;  %v1158_v54 = vand.u32 2147483648, %v1125_v16 }
 0x55c   : > { %v1135_v5 = vsel %vm1134_vm7, %v1122_v61, %v1133_v47 }
 0x55d   : > { %1415 = vadd.xlane.f32.xlu1 %v1414_v57  ;;  %v1138_v30 = vsel %vm1136_vm8, %v1137_v49, %v1135_v5  ;;  %3885 = vrsqrt.f32 %v4822_v42  ;;  %v1142_v57 = vsel %vm1141_vm9, %v1123_v15, %v1140_v22  ;;  %v4859_v22 = vld [vmem:[%s5709_s5 + $0x18] sm:$0xff]  ;;  %vm1162_vm3 = vcmp.eq.f32.partialorder %v4822_v42, inf }
 0x55e   : > { %v1115_v3 = vpop.xlane.xlu0 %1114  ;;  %v1202_v9 = vmul.f32 %v1138_v30, %v4829_v41  ;;  %v1145_v23 = vsel %vm1143_vm11, %v1144_v19, %v1142_v57  ;;  %v1172_v30 = vand.u32 2147483648, %v4819_v14  ;;  %vm1164_vm5 = vcmp.eq.f32.partialorder %v4822_v42, 0.0 }
 0x55f   : > { %v3880_v62 = vpop.eup %3879  ;;  %v4824_v45 = vmax.f32 %v1115_v3, 0.0 }
 0x560   : > { %v1147_v4 = vmul.f32 %v3880_v62, %v1124_v35 }
 0x561   : > { %1418 = vadd.xlane.f32.xlu1 %v1417_v51  ;;  %3887 = vrsqrt.f32 %v4824_v45  ;;  %v3882_v51 = vpop.eup %3881  ;;  %vm1183_vm6 = vcmp.eq.f32.partialorder %v4824_v45, inf  ;;  %vm1185_vm7 = vcmp.eq.f32.partialorder %v4824_v45, 0.0 }
 0x562   : > { %v1149_v60 = vsel %vm1148_vm10, %v1124_v35, %v1147_v4  ;;  %v1112_v34 = vpop.xlane.xlu0 %1111 }
 0x563   : > { %v3884_v39 = vpop.eup %3883  ;;  %v4846_v28 = vmax.f32 %v1112_v34, 0.0 }
 0x564   : > { %v1168_v61 = vmul.f32 %v3884_v39, %v4819_v14 }
 0x565   : > { %1421 = vadd.xlane.f32.xlu1 %v1420_v32  ;;  %v4837_v32 = vld [vmem:[%s5709_s5 + $0x8] sm:$0xff]  ;;  %vm1176_vm8 = vcmp.eq.f32.partialorder %v4846_v28, inf  ;;  %vm1178_vm9 = vcmp.eq.f32.partialorder %v4846_v28, 0.0 }
 0x566   : > { %v1203_v44 = vmul.f32 %v1145_v23, %v4837_v32  ;;  %v1170_v4 = vsel %vm1169_vm1, %v4819_v14, %v1168_v61  ;;  %v1165_v14 = vand.u32 2147483648, %v4822_v42 }
 0x567   : > { %v3886_v15 = vpop.eup %3885  ;;  %v1173_v34 = vsel %vm1171_vm2, %v1172_v30, %v1170_v4 }
 0x568   : > { %v1213_v53 = vmax.f32 %v1203_v44, 1e-08  ;;  %v1161_v62 = vmul.f32 %v3886_v15, %v4822_v42  ;;  %v1186_v15 = vand.u32 2147483648, %v4824_v45 }
 0x569   : > { %1424 = vadd.xlane.f32.xlu1 %v1423_v27  ;;  %v1151_v27 = vand.u32 2147483648, %v1124_v35  ;;  %v1121_v35 = vpop.xlane.xlu0 %1120 }
 0x56a   : > { %v4865_v57 = vmax.f32 %v1121_v35, 0.0 }
 0x56b   : > { %v3888_v52 = vpop.eup %3887 }
 0x56c   : > { %vm1197_vm11 = vcmp.eq.f32.partialorder %v4865_v57, inf  ;;  %vm1199_vm2 = vcmp.eq.f32.partialorder %v4865_v57, 0.0 }
 0x56d   : > { %1427 = vadd.xlane.f32.xlu1 %v1426_v48  ;;  %v1154_v48 = vmul.f32 %v3882_v51, %v1125_v16 }
 0x56f   : > { %v1156_v31 = vsel %vm1155_vm13, %v1125_v16, %v1154_v48  ;;  %v1182_v16 = vmul.f32 %v3888_v52, %v4824_v45 }
 0x570   : > { %v1159_v49 = vsel %vm1157_vm15, %v1158_v54, %v1156_v31  ;;  %v4899_v54 = vld [vmem:[%s5709_s5 + $0x38] sm:$0xff] }
 0x571   : > { %1430 = vadd.xlane.f32.xlu1 %v1429_v21  ;;  %v1152_v21 = vsel %vm1150_vm12, %v1151_v27, %v1149_v60  ;;  %v1205_v51 = vmul.f32 %v1159_v49, %v4859_v22  ;;  %v4873_v60 = vld [vmem:[%s5709_s5 + $0x28] sm:$0xff]  ;;  %v1163_v27 = vsel %vm1162_vm3, %v4822_v42, %v1161_v62 }
 0x572   : > { %v1204_v0 = vmul.f32 %v1152_v21, %v4842_v20  ;;  %v1207_v48 = vmul.f32 %v1173_v34, %v4873_v60  ;;  %v1184_v21 = vsel %vm1183_vm6, %v4824_v45, %v1182_v16  ;;  %v1166_v42 = vsel %vm1164_vm5, %v1165_v14, %v1163_v27 }
 0x573   : > { %v1215_v61 = vmax.f32 %v1205_v51, 1e-08  ;;  %v1179_v51 = vand.u32 2147483648, %v4846_v28  ;;  %v1200_v34 = vand.u32 2147483648, %v4865_v57 }
 0x574   : > { %v1214_v5 = vmax.f32 %v1204_v0, 1e-08  ;;  %v4890_v0 = vld [vmem:[%s5709_s5 + $0x20] sm:$0xff]  ;;  %v1217_v62 = vmax.f32 %v1207_v48, 1e-08 }
 0x575   : > { %2567 = vadd.xlane.f32.xlu1 %v2566_v58  ;;  %v1212_v58 = vmax.f32 %v1202_v9, 1e-08  ;;  %v1118_v9 = vpop.xlane.xlu0 %1117  ;;  %v1206_v52 = vmul.f32 %v1166_v42, %v4890_v0 }
 0x576   : > { %v4883_v39 = vmax.f32 %v1118_v9, 0.0 }
 0x577   : > { %3889 = vrcp.f32 %v1212_v58  ;;  %v1216_v14 = vmax.f32 %v1206_v52, 1e-08 }
 0x578   : > { %3891 = vrsqrt.f32 %v4846_v28  ;;  %vm1190_vm1 = vcmp.eq.f32.partialorder %v4883_v39, inf }
 0x581   : > { %v3890_v44 = vpop.eup %3889 }
 0x582   : > { %v3892_v31 = vpop.eup %3891  ;;  %v1232_v30 = vmul.f32 %v3890_v44, %v4817_v17  ;;  %v1193_v17 = vand.u32 2147483648, %v4883_v39 }
 0x583   : > { %v1175_v4 = vmul.f32 %v3892_v31, %v4846_v28 }
 0x584   : > { %vm1242_vm12 = vcmp.eq.f32.partialorder %v1232_v30, 0.0 }
 0x5b6   : > { %v1592_v47 = vpop.xlane.xlu1 %1591 }
 0x5b7   : > { %v4853_v3 = vmax.f32 %v1592_v47, 0.0  ;;  %v1187_v47 = vsel %vm1185_vm7, %v1186_v15, %v1184_v21 }
 0x5b9   : > { %3893 = vrsqrt.f32 %v4853_v3  ;;  %vm1636_vm10 = vcmp.eq.f32.partialorder %v4853_v3, inf  ;;  %v1639_v15 = vand.u32 2147483648, %v4853_v3  ;;  %vm1638_vm13 = vcmp.eq.f32.partialorder %v4853_v3, 0.0 }
 0x5ba   : > { %3895 = vrcp.f32 %v1213_v53  ;;  %v1589_v19 = vpop.xlane.xlu1 %1588  ;;  %v912_v53 = vpop.xlane.xlu0 %911 }
 0x5bb   : > { %v4875_v23 = vmax.f32 %v1589_v19, 0.0  ;;  %3897 = vrcp.f32 %v1214_v5  ;;  %v1209_v19 = vmul.f32 %v1187_v47, %v4899_v54 }
 0x5bd   : > { %3899 = vrsqrt.f32 %v4875_v23  ;;  %v1219_v52 = vmax.f32 %v1209_v19, 1e-08  ;;  %vm1629_vm15 = vcmp.eq.f32.partialorder %v4875_v23, inf  ;;  %vm1631_vm3 = vcmp.eq.f32.partialorder %v4875_v23, 0.0 }
 0x5be   : > { %3901 = vrsqrt.f32 %v4865_v57  ;;  %v1598_v58 = vpop.xlane.xlu1 %1597  ;;  %v915_v44 = vpop.xlane.xlu0 %914 }
 0x5bf   : > { %v4893_v35 = vmax.f32 %v1598_v58, 0.0 }
 0x5c1   : > { %3903 = vrsqrt.f32 %v4893_v35  ;;  %vm1650_vm6 = vcmp.eq.f32.partialorder %v4893_v35, inf }
 0x5c2   : > { %3905 = vrsqrt.f32 %v4883_v39  ;;  %v1595_v5 = vpop.xlane.xlu1 %1594 }
 0x5c3   : > { %v3894_v49 = vpop.eup %3893  ;;  %3907 = vrcp.f32 %v1215_v61  ;;  %v4905_v45 = vmax.f32 %v1595_v5, 0.0  ;;  %v1177_v61 = vsel %vm1176_vm8, %v4846_v28, %v1175_v4  ;;  %v1632_v5 = vand.u32 2147483648, %v4875_v23 }
 0x5c4   : > { %v3896_v16 = vpop.eup %3895  ;;  %v1635_v9 = vmul.f32 %v3894_v49, %v4853_v3  ;;  %vm1192_vm8 = vcmp.eq.f32.partialorder %v4883_v39, 0.0 }
 0x5c5   : > { %3909 = vrsqrt.f32 %v4905_v45  ;;  %v3898_v27 = vpop.eup %3897  ;;  %v4925_v47 = vmul.f32 %v3896_v16, %v912_v53  ;;  %v1180_v53 = vsel %vm1178_vm9, %v1179_v51, %v1177_v61  ;;  %vm1652_vm9 = vcmp.eq.f32.partialorder %v4893_v35, 0.0 }
 0x5c6   : > { %3911 = vrcp.f32 %v1217_v62  ;;  %v1604_v48 = vpop.xlane.xlu1 %1603  ;;  %v1637_v21 = vsel %vm1636_vm10, %v4853_v3, %v1635_v9  ;;  %v1234_v4 = vmul.f32 %v3898_v27, %v915_v44  ;;  %v4935_v9 = vld [vmem:[%s5709_s5 + $0x30] sm:$0xff]  ;;  %vm1643_vm10 = vcmp.eq.f32.partialorder %v4905_v45, inf }
 0x5c7   : > { %v3900_v58 = vpop.eup %3899  ;;  %v4922_v42 = vmax.f32 %v1604_v48, 0.0  ;;  %v1640_v49 = vsel %vm1638_vm13, %v1639_v15, %v1637_v21  ;;  %v4947_v21 = vsel %vm1242_vm12, 1e-08, %v1232_v30  ;;  %vm1243_vm5 = vcmp.eq.f32.partialorder %v4925_v47, 0.0 }
 0x5c8   : > { %v3902_v31 = vpop.eup %3901  ;;  %v1628_v62 = vmul.f32 %v3900_v58, %v4875_v23  ;;  %v1698_v44 = vmul.f32 %v1640_v49, %v4837_v32  ;;  %vm1244_vm7 = vcmp.eq.f32.partialorder %v1234_v4, 0.0 }
 0x5c9   : > { %3913 = vrsqrt.f32 %v4922_v42  ;;  %v1196_v27 = vmul.f32 %v3902_v31, %v4865_v57  ;;  %vm1664_vm12 = vcmp.eq.f32.partialorder %v4922_v42, inf }
 0x5ca   : > { %v1630_v3 = vsel %vm1629_vm15, %v4875_v23, %v1628_v62  ;;  %v1601_v16 = vpop.xlane.xlu1 %1600  ;;  %3915 = vrcp.f32 %v1216_v14  ;;  %v1208_v23 = vmul.f32 %v1180_v53, %v4935_v9  ;;  %v918_v62 = vpop.xlane.xlu0 %917  ;;  %v1653_v53 = vand.u32 2147483648, %v4893_v35 }
 0x5cb   : > { %v3904_v19 = vpop.eup %3903  ;;  %v4944_v48 = vmax.f32 %v1601_v16, 0.0  ;;  %v1633_v58 = vsel %vm1631_vm3, %v1632_v5, %v1630_v3  ;;  %v1198_v5 = vsel %vm1197_vm11, %v4865_v57, %v1196_v27  ;;  %v1708_v16 = vmax.f32 %v1698_v44, 1e-08 }
 0x5cc   : > { %v3906_v28 = vpop.eup %3905  ;;  %v1649_v51 = vmul.f32 %v3904_v19, %v4893_v35  ;;  %v1697_v61 = vmul.f32 %v1633_v58, %v4829_v41  ;;  %v1646_v19 = vand.u32 2147483648, %v4905_v45  ;;  %vm1645_vm11 = vcmp.eq.f32.partialorder %v4905_v45, 0.0 }
 0x5cd   : > { %v3908_v15 = vpop.eup %3907  ;;  %3917 = vrsqrt.f32 %v4944_v48  ;;  %v1189_v41 = vmul.f32 %v3906_v28, %v4883_v39  ;;  %v1218_v28 = vmax.f32 %v1208_v23, 1e-08  ;;  %vm1666_vm15 = vcmp.eq.f32.partialorder %v4922_v42, 0.0 }
 0x5ce   : > { %3919 = vrcp.f32 %v1219_v52  ;;  %v1610_v30 = vpop.xlane.xlu1 %1609  ;;  %v1707_v14 = vmax.f32 %v1697_v61, 1e-08  ;;  %v1651_v31 = vsel %vm1650_vm6, %v4893_v35, %v1649_v51  ;;  %v1235_v27 = vmul.f32 %v3908_v15, %v918_v62  ;;  %v4980_v35 = vld [vmem:[%s5709_s5 + $0x48] sm:$0xff] }
 0x5cf   : > { %v3910_v32 = vpop.eup %3909  ;;  %v4962_v49 = vmax.f32 %v1610_v30, 0.0  ;;  %v1654_v58 = vsel %vm1652_vm9, %v1653_v53, %v1651_v31  ;;  %v1191_v44 = vsel %vm1190_vm1, %v4883_v39, %v1189_v41  ;;  %v1201_v15 = vsel %vm1199_vm2, %v1200_v34, %v1198_v5 }
 0x5d0   : > { %v4965_v3 = vpop.eup %3911  ;;  %v1642_v52 = vmul.f32 %v3910_v32, %v4905_v45  ;;  %3921 = vrcp.f32 %v1707_v14  ;;  %v1700_v32 = vmul.f32 %v1654_v58, %v4859_v22  ;;  %v4994_v41 = vsel %vm1243_vm5, 1e-08, %v4925_v47  ;;  %v5008_v47 = vld [vmem:[%s5709_s5 + $0x40] sm:$0xff] }
 0x5d1   : > { %3923 = vrsqrt.f32 %v4962_v49  ;;  %v4997_v62 = vsel %vm1244_vm7, 1e-08, %v1234_v4  ;;  %v5002_v34 = vmul.f32 %v1201_v15, %v4980_v35  ;;  %vm1245_vm13 = vcmp.eq.f32.partialorder %v1235_v27, 0.0 }
 0x5d2   : > { %v1607_v51 = vpop.xlane.xlu1 %1606  ;;  %v1644_v61 = vsel %vm1643_vm10, %v4905_v45, %v1642_v52  ;;  %3925 = vrcp.f32 %v1708_v16  ;;  %v1194_v4 = vsel %vm1192_vm8, %v1193_v17, %v1191_v44  ;;  %v1667_v16 = vand.u32 2147483648, %v4922_v42 }
 0x5d3   : > { %v3914_v30 = vpop.eup %3913  ;;  %v4986_v23 = vmax.f32 %v1607_v51, 0.0  ;;  %v1647_v14 = vsel %vm1645_vm11, %v1646_v19, %v1644_v61  ;;  %vm1657_vm1 = vcmp.eq.f32.partialorder %v4944_v48, inf  ;;  %v1660_v51 = vand.u32 2147483648, %v4944_v48 }
 0x5d4   : > { %v1663_v45 = vmul.f32 %v3914_v30, %v4922_v42  ;;  %v1699_v31 = vmul.f32 %v1647_v14, %v4842_v20  ;;  %v3916_v57 = vpop.eup %3915  ;;  %v5024_v61 = vsel %vm1245_vm13, 1e-08, %v1235_v27  ;;  %v921_v30 = vpop.xlane.xlu0 %920  ;;  %v1210_v44 = vmul.f32 %v1194_v4, %v5008_v47 }
 0x5d5   : > { %3927 = vrsqrt.f32 %v4986_v23  ;;  %vm1659_vm2 = vcmp.eq.f32.partialorder %v4944_v48, 0.0  ;;  %vm1678_vm5 = vcmp.eq.f32.partialorder %v4962_v49, inf  ;;  %vm1680_vm6 = vcmp.eq.f32.partialorder %v4962_v49, 0.0 }
 0x5d6   : > { %3929 = vrcp.f32 %v1218_v28  ;;  %v1616_v20 = vpop.xlane.xlu1 %1615  ;;  %v1709_v5 = vmax.f32 %v1699_v31, 1e-08  ;;  %v1665_v22 = vsel %vm1664_vm12, %v4922_v42, %v1663_v45  ;;  %v1710_v28 = vmax.f32 %v1700_v32, 1e-08 }
 0x5d7   : > { %v3918_v53 = vpop.eup %3917  ;;  %v5014_v52 = vmax.f32 %v1616_v20, 0.0  ;;  %v1668_v39 = vsel %vm1666_vm15, %v1667_v16, %v1665_v22  ;;  %v1221_v42 = vmax.f32 %v5002_v34, 1e-08  ;;  %v1220_v4 = vmax.f32 %v1210_v44, 1e-08 }
 0x5d8   : > { %v5017_v19 = vpop.eup %3919  ;;  %v1656_v58 = vmul.f32 %v3918_v53, %v4944_v48  ;;  %3931 = vrcp.f32 %v1709_v5  ;;  %v1702_v22 = vmul.f32 %v1668_v39, %v4873_v60  ;;  %v5036_v53 = vmul.f32 %v3916_v57, %v921_v30  ;;  %v924_v39 = vpop.xlane.xlu0 %923 }
 0x5d9   : > { %3933 = vrsqrt.f32 %v5014_v52  ;;  %v1681_v60 = vand.u32 2147483648, %v4962_v49  ;;  %vm1671_vm7 = vcmp.eq.f32.partialorder %v4986_v23, inf  ;;  %vm1673_vm10 = vcmp.eq.f32.partialorder %v4986_v23, 0.0 }
 0x5da   : > { %v3922_v17 = vpop.eup %3921  ;;  %v1613_v15 = vpop.xlane.xlu1 %1612  ;;  %v1658_v14 = vsel %vm1657_vm1, %v4944_v48, %v1656_v58  ;;  %3935 = vrcp.f32 %v1710_v28  ;;  %v1712_v44 = vmax.f32 %v1702_v22, 1e-08  ;;  %vm1246_vm11 = vcmp.eq.f32.partialorder %v5036_v53, 0.0 }
 0x5db   : > { %v3924_v45 = vpop.eup %3923  ;;  %v5030_v31 = vmax.f32 %v1613_v15, 0.0  ;;  %v1727_v32 = vmul.f32 %v3922_v17, %v4844_v26  ;;  %v1661_v20 = vsel %vm1659_vm2, %v1660_v51, %v1658_v14  ;;  %v1674_v15 = vand.u32 2147483648, %v4986_v23 }
 0x5dc   : > { %v1677_v5 = vmul.f32 %v3924_v45, %v4962_v49  ;;  %v1701_v27 = vmul.f32 %v1661_v20, %v4890_v0  ;;  %v3926_v48 = vpop.eup %3925  ;;  %vm1692_vm15 = vcmp.eq.f32.partialorder %v5014_v52, inf  ;;  %vm1694_vm1 = vcmp.eq.f32.partialorder %v5014_v52, 0.0 }
 0x5dd   : > { %3937 = vrsqrt.f32 %v5030_v31  ;;  %vm1737_vm3 = vcmp.eq.f32.partialorder %v1727_v32, 0.0  ;;  %vm1685_vm2 = vcmp.eq.f32.partialorder %v5030_v31, inf }
 0x5de   : > { %v1407_v16 = vpop.xlane.xlu1 %1406  ;;  %v1747_v58 = vsel %vm1737_vm3, 1e-08, %v1727_v32  ;;  %v1711_v26 = vmax.f32 %v1701_v27, 1e-08  ;;  %v1679_v51 = vsel %vm1678_vm5, %v4962_v49, %v1677_v5 }
 0x5df   : > { %v3928_v17 = vpop.eup %3927  ;;  %v1728_v28 = vmul.f32 %v3926_v48, %v1407_v16  ;;  %v1757_v0 = vsub.f32 %v1747_v58, %v4947_v21  ;;  %v1682_v14 = vsel %vm1680_vm6, %v1681_v60, %v1679_v51  ;;  %v927_v51 = vpop.xlane.xlu0 %926  ;;  %vm1687_vm6 = vcmp.eq.f32.partialorder %v5030_v31, 0.0 }
 0x5e0   : > { %v5044_v57 = vpop.eup %3929  ;;  %v1670_v30 = vmul.f32 %v3928_v17, %v4986_v23  ;;  %3939 = vrcp.f32 %v1711_v26  ;;  %v1704_v26 = vmul.f32 %v1682_v14, %v4899_v54  ;;  %v1695_v54 = vand.u32 2147483648, %v5014_v52 }
 0x5e1   : > { %vm1738_vm8 = vcmp.eq.f32.partialorder %v1728_v28, 0.0  ;;  %vm1767_vm9 = vcmp.eq.f32.partialorder %v1757_v0, 0.0  ;;  %3941 = vrcp.f32 %v1712_v44  ;;  %v1688_v14 = vand.u32 2147483648, %v5030_v31 }
 0x5e2   : > { %v3932_v45 = vpop.eup %3931  ;;  %v1748_v21 = vsel %vm1738_vm8, 1e-08, %v1728_v28  ;;  %v1410_v32 = vpop.xlane.xlu1 %1409  ;;  %v1777_v20 = vsel %vm1767_vm9, 1e-08, %v1757_v0  ;;  %v1672_v49 = vsel %vm1671_vm7, %v4986_v23, %v1670_v30  ;;  %3943 = vrcp.f32 %v1220_v4 }
 0x5e3   : > { %v3934_v5 = vpop.eup %3933  ;;  %v1758_v27 = vsub.f32 %v1748_v21, %v4994_v41  ;;  %v1729_v22 = vmul.f32 %v3932_v45, %v1410_v32  ;;  %1789 = vperm.xlu0 %3768, %v1777_v20   ;;  %v1675_v48 = vsel %vm1673_vm10, %v1674_v15, %v1672_v49  ;;  %v1714_v44 = vmax.f32 %v1704_v26, 1e-08 }
 0x5e4   : > { %v1691_v16 = vmul.f32 %v3934_v5, %v5014_v52  ;;  %v1703_v58 = vmul.f32 %v1675_v48, %v4935_v9  ;;  %v3936_v23 = vpop.eup %3935  ;;  %v930_v48 = vpop.xlane.xlu0 %929  ;;  %v1256_v26 = vsel %vm1246_vm11, 1e-08, %v5036_v53 }
 0x5e5   : > { %vm1739_vm12 = vcmp.eq.f32.partialorder %v1729_v22, 0.0  ;;  %vm1768_vm13 = vcmp.eq.f32.partialorder %v1758_v27, 0.0 }
 0x5e6   : > { %v1749_v17 = vsel %vm1739_vm12, 1e-08, %v1729_v22  ;;  %v1413_v28 = vpop.xlane.xlu1 %1412  ;;  %v1778_v41 = vsel %vm1768_vm13, 1e-08, %v1758_v27  ;;  %v1713_v0 = vmax.f32 %v1703_v58, 1e-08  ;;  %v1693_v60 = vsel %vm1692_vm15, %v5014_v52, %v1691_v16 }
 0x5e7   : > { %v3938_v30 = vpop.eup %3937  ;;  %v1730_v15 = vmul.f32 %v3936_v23, %v1413_v28  ;;  %1794 = vperm.xlu1 %3769, %v1778_v41   ;;  %v1759_v9 = vsub.f32 %v1749_v17, %v4997_v62  ;;  %v1696_v45 = vsel %vm1694_vm1, %v1695_v54, %v1693_v60  ;;  %v1237_v52 = vmul.f32 %v4965_v3, %v924_v39 }
 0x5e8   : > { %v1684_v4 = vmul.f32 %v3938_v30, %v5030_v31  ;;  %3945 = vrcp.f32 %v1713_v0  ;;  %v1706_v58 = vmul.f32 %v1696_v45, %v4980_v35  ;;  %v1238_v35 = vmul.f32 %v5044_v57, %v927_v51  ;;  %v933_v0 = vpop.xlane.xlu0 %932 }
 0x5e9   : > { %vm1740_vm3 = vcmp.eq.f32.partialorder %v1730_v15, 0.0  ;;  %vm1769_vm5 = vcmp.eq.f32.partialorder %v1759_v9, 0.0  ;;  %3947 = vrcp.f32 %v1714_v44  ;;  %vm1247_vm9 = vcmp.eq.f32.partialorder %v1237_v52, 0.0 }
 0x5ea   : > { %v3940_v21 = vpop.eup %3939  ;;  %v1750_v32 = vsel %vm1740_vm3, 1e-08, %v1730_v15  ;;  %v1416_v20 = vpop.xlane.xlu1 %1415  ;;  %v1779_v49 = vsel %vm1769_vm5, 1e-08, %v1759_v9  ;;  %v1686_v62 = vsel %vm1685_vm2, %v5030_v31, %v1684_v4  ;;  %3949 = vrcp.f32 %v1221_v42 }
 0x5eb   : > { %v1760_v5 = vsub.f32 %v1750_v32, %v5024_v61  ;;  %v1731_v27 = vmul.f32 %v3940_v21, %v1416_v20  ;;  %1799 = vperm.xlu0 %3768, %v1779_v49   ;;  %v1689_v22 = vsel %vm1687_vm6, %v1688_v14, %v1686_v62  ;;  %v3942_v31 = vpop.eup %3941  ;;  %v1716_v41 = vmax.f32 %v1706_v58, 1e-08 }
 0x5ec   : > { %v1705_v16 = vmul.f32 %v1689_v22, %v5008_v47  ;;  %v3944_v17 = vpop.eup %3943  ;;  %v1257_v53 = vsel %vm1247_vm9, 1e-08, %v1237_v52  ;;  %v1239_v54 = vmul.f32 %v5017_v19, %v930_v48  ;;  %vm1248_vm12 = vcmp.eq.f32.partialorder %v1238_v35, 0.0  ;;  %v936_v32 = vpop.xlane.xlu0 %935 }
 0x5ed   : > { %vm1741_vm7 = vcmp.eq.f32.partialorder %v1731_v27, 0.0  ;;  %vm1770_vm8 = vcmp.eq.f32.partialorder %v1760_v5, 0.0  ;;  %v1240_v57 = vmul.f32 %v3944_v17, %v933_v0  ;;  %v1258_v14 = vsel %vm1248_vm12, 1e-08, %v1238_v35 }
 0x5ee   : > { %v1751_v23 = vsel %vm1741_vm7, 1e-08, %v1731_v27  ;;  %v1419_v3 = vpop.xlane.xlu1 %1418  ;;  %v1780_v39 = vsel %vm1770_vm8, 1e-08, %v1760_v5  ;;  %v1715_v61 = vmax.f32 %v1705_v16, 1e-08 }
 0x5ef   : > { %v1761_v28 = vsub.f32 %v1751_v23, %v1256_v26  ;;  %v1732_v47 = vmul.f32 %v3942_v31, %v1419_v3  ;;  %1804 = vperm.xlu1 %3769, %v1780_v39   ;;  %vm1249_vm1 = vcmp.eq.f32.partialorder %v1239_v54, 0.0  ;;  %vm1250_vm3 = vcmp.eq.f32.partialorder %v1240_v57, 0.0 }
 0x5f0   : > { %3951 = vrcp.f32 %v1715_v61  ;;  %v1259_v62 = vsel %vm1249_vm1, 1e-08, %v1239_v54  ;;  %v1260_v26 = vsel %vm1250_vm3, 1e-08, %v1240_v57 }
 0x5f1   : > { %vm1742_vm10 = vcmp.eq.f32.partialorder %v1732_v47, 0.0  ;;  %vm1771_vm11 = vcmp.eq.f32.partialorder %v1761_v28, 0.0  ;;  %3953 = vrcp.f32 %v1716_v41 }
 0x5f2   : > { %v1752_v60 = vsel %vm1742_vm10, 1e-08, %v1732_v47  ;;  %v1422_v30 = vpop.xlane.xlu1 %1421  ;;  %v1781_v15 = vsel %vm1771_vm11, 1e-08, %v1761_v28  ;;  %v3946_v9 = vpop.eup %3945 }
 0x5f3   : > { %v1762_v4 = vsub.f32 %v1752_v60, %v1257_v53  ;;  %1809 = vperm.xlu1 %3769, %v1781_v15   ;;  %v1733_v34 = vmul.f32 %v3946_v9, %v1422_v30  ;;  %v3948_v42 = vpop.eup %3947  ;;  %v2571_v53 = vpop.xlane.xlu0 %2570 }
 0x5f4   : > { %v3950_v49 = vpop.eup %3949 }
 0x5f5   : > { %vm1772_vm13 = vcmp.eq.f32.partialorder %v1762_v4, 0.0  ;;  %vm1743_vm15 = vcmp.eq.f32.partialorder %v1733_v34, 0.0  ;;  %v1241_v27 = vmul.f32 %v3950_v49, %v936_v32 }
 0x5f6   : > { %v1425_v51 = vpop.xlane.xlu1 %1424  ;;  %v1782_v44 = vsel %vm1772_vm13, 1e-08, %v1762_v4  ;;  %v1753_v45 = vsel %vm1743_vm15, 1e-08, %v1733_v34 }
 0x5f7   : > { %v1734_v21 = vmul.f32 %v3948_v42, %v1425_v51  ;;  %1814 = vperm.xlu0 %3768, %v1782_v44   ;;  %v1763_v20 = vsub.f32 %v1753_v45, %v1258_v14  ;;  %vm1251_vm8 = vcmp.eq.f32.partialorder %v1241_v27, 0.0 }
 0x5f8   : > { %v1261_v17 = vsel %vm1251_vm8, 1e-08, %v1241_v27 }
 0x5f9   : > { %vm1744_vm2 = vcmp.eq.f32.partialorder %v1734_v21, 0.0  ;;  %vm1773_vm5 = vcmp.eq.f32.partialorder %v1763_v20, 0.0 }
 0x5fa   : > { %v3952_v19 = vpop.eup %3951  ;;  %v1754_v52 = vsel %vm1744_vm2, 1e-08, %v1734_v21  ;;  %v1428_v5 = vpop.xlane.xlu1 %1427  ;;  %v1783_v16 = vsel %vm1773_vm5, 1e-08, %v1763_v20 }
 0x5fb   : > { %v1764_v22 = vsub.f32 %v1754_v52, %v1259_v62  ;;  %v1735_v48 = vmul.f32 %v3952_v19, %v1428_v5  ;;  %1819 = vperm.xlu1 %3769, %v1783_v16   ;;  %v3954_v58 = vpop.eup %3953 }
 0x5fd   : > { %vm1745_vm6 = vcmp.eq.f32.partialorder %v1735_v48, 0.0  ;;  %vm1774_vm7 = vcmp.eq.f32.partialorder %v1764_v22, 0.0 }
 0x5fe   : > { %v1755_v31 = vsel %vm1745_vm6, 1e-08, %v1735_v48  ;;  %v1431_v23 = vpop.xlane.xlu1 %1430  ;;  %v1784_v3 = vsel %vm1774_vm7, 1e-08, %v1764_v22 }
 0x5ff   : > { %v1765_v39 = vsub.f32 %v1755_v31, %v1260_v26  ;;  %v1736_v61 = vmul.f32 %v3954_v58, %v1431_v23  ;;  %1824 = vperm.xlu0 %3768, %v1784_v3   ;;  %v4117_v23 = vmov 0.0|0.0   ;;  %v442_v3 = vld [vmem:[%s5708_s4 + $0x18] sm:$0xff] }
 0x600   : > { %3703 = vmatprep.subr.bf16.mxu0 %v4117_v23  ;;  %3715 = vmatprep.subr.bf16.mxu1 %v4117_v23 }
 0x601   : > { %vm1746_vm9 = vcmp.eq.f32.partialorder %v1736_v61, 0.0  ;;  %vm1775_vm10 = vcmp.eq.f32.partialorder %v1765_v39, 0.0 }
 0x602   : > { %v1756_v28 = vsel %vm1746_vm9, 1e-08, %v1736_v61  ;;  %v1785_v47 = vsel %vm1775_vm10, 1e-08, %v1765_v39  ;;  %v2568_v0 = vpop.xlane.xlu1 %2567  ;;  %v5721_v61 = vmov 0.0  }
 0x603   : > { %v1766_v35 = vsub.f32 %v1756_v28, %v1261_v17  ;;  %1829 = vperm.xlu1 %3769, %v1785_v47   ;;  %3955 = vrcp.f32 %v2568_v0  ;;  %v5164_v17 = vld [vmem:[%s5708_s4 + $0x20] sm:$0xff] }
 0x604   : > { %3957 = vrcp.f32 %v2571_v53 }
 0x605   : > { %vm1776_vm11 = vcmp.eq.f32.partialorder %v1766_v35, 0.0 }
 0x606   : > { %v1786_v41 = vsel %vm1776_vm11, 1e-08, %v1766_v35 }
 0x607   : > { %1834 = vperm.xlu0 %3768, %v1786_v41  }
 0x662   : > { %v1790_v60 = vpop.permute.xlu0 %1789 }
 0x663   : > { %v5078_v30 = vmul.f32 %v1790_v60, %v4629_v43 }
 0x665   : > { %v1847_v15 = vsel %vm640_vm4, %v5078_v30, 0.0 }
 0x666   : > { %1848 = vadd.xlane.f32.xlu1 %v1847_v15  ;;  %v1795_v9 = vpop.permute.xlu1 %1794 }
 0x667   : > { %v5083_v54 = vmul.f32 %v1795_v9, %v4626_v40 }
 0x669   : > { %v1850_v4 = vsel %vm640_vm4, %v5083_v54, 0.0 }
 0x66a   : > { %v1800_v34 = vpop.permute.xlu0 %1799  ;;  %1851 = vadd.xlane.f32.xlu0 %v1850_v4 }
 0x66b   : > { %v5088_v42 = vmul.f32 %v1800_v34, %v4636_v56 }
 0x66d   : > { %v1853_v43 = vsel %vm640_vm4, %v5088_v42, 0.0 }
 0x66e   : > { %1854 = vadd.xlane.f32.xlu0 %v1853_v43  ;;  %v1805_v57 = vpop.permute.xlu1 %1804 }
 0x66f   : > { %v5093_v51 = vmul.f32 %v1805_v57, %v4642_v59 }
 0x671   : > { %v1856_v40 = vsel %vm640_vm4, %v5093_v51, 0.0 }
 0x672   : > { %1857 = vadd.xlane.f32.xlu1 %v1856_v40  ;;  %v1810_v44 = vpop.permute.xlu1 %1809 }
 0x673   : > { %v5098_v14 = vmul.f32 %v1810_v44, %v4647_v63  ;;  %v3956_v63 = vpop.eup %3955 }
 0x674   : > { %v2574_v52 = vmul.f32 %v3956_v63, %v4813_v55  ;;  %v3958_v5 = vpop.eup %3957 }
 0x675   : > { %v1859_v56 = vsel %vm640_vm4, %v5098_v14, 0.0 }
 0x676   : > { %v1815_v45 = vpop.permute.xlu0 %1814  ;;  %1860 = vadd.xlane.f32.xlu0 %v1859_v56  ;;  %v5124_v48 = vmul.f32 %v2574_v52, %v4381_v29 }
 0x677   : > { %v5103_v21 = vmul.f32 %v1815_v45, %v4652_v10 }
 0x679   : > { %v1862_v59 = vsel %vm640_vm4, %v5103_v21, 0.0 }
 0x67a   : > { %1863 = vadd.xlane.f32.xlu1 %v1862_v59  ;;  %v1820_v32 = vpop.permute.xlu1 %1819 }
 0x67b   : > { %v5108_v20 = vmul.f32 %v1820_v32, %v4657_v13 }
 0x67d   : > { %v1865_v19 = vsel %vm640_vm4, %v5108_v20, 0.0 }
 0x67e   : > { %v1825_v49 = vpop.permute.xlu0 %1824  ;;  %1866 = vadd.xlane.f32.xlu0 %v1865_v19 }
 0x67f   : > { %v5113_v62 = vmul.f32 %v1825_v49, %v4665_v37  ;;  %v2575_v37 = vmul.f32 %v3958_v5, %v4789_v2  ;;  %v440_v2 = vld [vmem:[%s5708_s4 + $0x8] sm:$0xff] }
 0x681   : > { %v1868_v10 = vsel %vm640_vm4, %v5113_v62, 0.0  ;;  %v5135_v26 = vmul.f32 %v2575_v37, %v4397_v6  ;;  %v441_v6 = vld [vmem:[%s5708_s4 + $0x10] sm:$0xff] }
 0x682   : > { %1869 = vadd.xlane.f32.xlu1 %v1868_v10  ;;  %v1830_v27 = vpop.permute.xlu1 %1829  ;;  %v5157_v39 = vpack.c.bf16 %v442_v3, %v441_v6 }
 0x683   : > { %v5119_v13 = vmul.f32 %v1830_v27, %v4662_v36  ;;  %v2578_v36 = vsel %vm2508_vm14, %v5124_v48, 0.0  ;;  %v2581_v29 = vsel %vm2508_vm14, %v5135_v26, 0.0 }
 0x685   : > { %v1871_v22 = vsel %vm640_vm4, %v5119_v13, 0.0 }
 0x686   : > { %v1835_v16 = vpop.permute.xlu0 %1834  ;;  %1872 = vadd.xlane.f32.xlu0 %v1871_v22 }
 0x687   : > { %v5128_v58 = vmul.f32 %v1835_v16, %v4672_v25  ;;  %v439_v25 = vld [vmem:[%s5708_s4] sm:$0xff] }
 0x688   : > { %v5145_v31 = vpack.c.bf16 %v440_v2, %v439_v25  ;;  %v445_v25 = vld [vmem:[%s5708_s4 + $0x30] sm:$0xff] }
 0x689   : > { %v1874_v55 = vsel %vm640_vm4, %v5128_v58, 0.0 }
 0x68a   : > { %1875 = vadd.xlane.f32.xlu1 %v1874_v55  ;;  %2579 = vadd.xlane.f32.xlu0 %v2578_v36 }
 0x68b   : > { %3705 = vmatpush3.bf16.msra.mxu0 %v5145_v31 }
 0x68c   : > { %3706 = vmatprep.subr.bf16.mxu0 %v4117_v23 }
 0x68e   : > { %2582 = vadd.xlane.f32.xlu1 %v2581_v29 }
 0x68f   : > { %3708 = vmatpush3.bf16.msra.mxu0 %v5157_v39 }
 0x690   : > { %3633 = vmatprep.subr.mxu0 %v5721_v61 }
 0x693   : > { %3634 = vmatpush3.msra.mxu0 %v5164_v17 }
 0x694   : > { %3709 = vmatprep.subr.bf16.mxu0 %v4117_v23 }
 0x6f3   : > { %v1849_v28 = vpop.xlane.xlu1 %1848 }
 0x6f4   : > { %3959 = vrcp.f32 %v1849_v28 }
 0x6f7   : > { %v1852_v47 = vpop.xlane.xlu0 %1851 }
 0x6f8   : > { %3961 = vrcp.f32 %v1852_v47  ;;  %v447_v47 = vld [vmem:[%s5708_s4 + $0x40] sm:$0xff] }
 0x6fb   : > { %v1855_v35 = vpop.xlane.xlu0 %1854 }
 0x6fc   : > { %3963 = vrcp.f32 %v1855_v35 }
 0x6fe   : > { %v3960_v41 = vpop.eup %3959 }
 0x6ff   : > { %v1858_v53 = vpop.xlane.xlu1 %1857  ;;  %v5169_v0 = vmul.f32 %v3960_v41, %v5078_v30 }
 0x700   : > { %3965 = vrcp.f32 %v1858_v53 }
 0x701   : > { %v1907_v60 = vsel %vm640_vm4, %v5169_v0, 0.0 }
 0x702   : > { %v3962_v15 = vpop.eup %3961  ;;  %1908 = vadd.xlane.f32.xlu0 %v1907_v60 }
 0x703   : > { %v1861_v9 = vpop.xlane.xlu0 %1860  ;;  %v5174_v4 = vmul.f32 %v3962_v15, %v5083_v54 }
 0x704   : > { %3967 = vrcp.f32 %v1861_v9  ;;  %v5255_v9 = vld [vmem:[%s5708_s4 + $0x48] sm:$0xff] }
 0x705   : > { %v1910_v34 = vsel %vm640_vm4, %v5174_v4, 0.0 }
 0x706   : > { %v3964_v43 = vpop.eup %3963  ;;  %1911 = vadd.xlane.f32.xlu1 %v1910_v34 }
 0x707   : > { %v1864_v57 = vpop.xlane.xlu1 %1863  ;;  %v5179_v30 = vmul.f32 %v3964_v43, %v5088_v42 }
 0x708   : > { %3969 = vrcp.f32 %v1864_v57  ;;  %v1898_v57 = vmul.f32 8.0, %v5174_v4 }
 0x709   : > { %v1913_v40 = vsel %vm640_vm4, %v5179_v30, 0.0 }
 0x70a   : > { %v3966_v44 = vpop.eup %3965  ;;  %1914 = vadd.xlane.f32.xlu0 %v1913_v40 }
 0x70b   : > { %v5184_v56 = vmul.f32 %v3966_v44, %v5093_v51  ;;  %v1867_v54 = vpop.xlane.xlu0 %1866 }
 0x70c   : > { %3971 = vrcp.f32 %v1867_v54 }
 0x70d   : > { %v1916_v45 = vsel %vm640_vm4, %v5184_v56, 0.0 }
 0x70e   : > { %v3968_v59 = vpop.eup %3967  ;;  %1917 = vadd.xlane.f32.xlu1 %v1916_v45 }
 0x70f   : > { %v1870_v32 = vpop.xlane.xlu1 %1869  ;;  %v5189_v42 = vmul.f32 %v3968_v59, %v5098_v14  ;;  %v1899_v59 = vmul.f32 8.0, %v5179_v30 }
 0x710   : > { %3973 = vrcp.f32 %v1870_v32 }
 0x711   : > { %v1919_v63 = vsel %vm640_vm4, %v5189_v42, 0.0 }
 0x712   : > { %v3970_v49 = vpop.eup %3969  ;;  %1920 = vadd.xlane.f32.xlu0 %v1919_v63 }
 0x713   : > { %v1873_v19 = vpop.xlane.xlu0 %1872  ;;  %v5194_v51 = vmul.f32 %v3970_v49, %v5103_v21 }
 0x714   : > { %3975 = vrcp.f32 %v1873_v19 }
 0x715   : > { %v1922_v10 = vsel %vm640_vm4, %v5194_v51, 0.0 }
 0x716   : > { %1923 = vadd.xlane.f32.xlu1 %v1922_v10  ;;  %v3972_v52 = vpop.eup %3971 }
 0x717   : > { %v2580_v5 = vpop.xlane.xlu0 %2579  ;;  %v1876_v27 = vpop.xlane.xlu1 %1875  ;;  %v5199_v14 = vmul.f32 %v3972_v52, %v5108_v20  ;;  %v444_v20 = vld [vmem:[%s5708_s4 + $0x28] sm:$0xff]  ;;  %v1900_v52 = vmul.f32 8.0, %v5184_v56 }
 0x718   : > { %3977 = vrcp.f32 %v2580_v5  ;;  %v5219_v6 = vpack.c.bf16 %v445_v25, %v444_v20 }
 0x719   : > { %3979 = vrcp.f32 %v1876_v27  ;;  %v1925_v37 = vsel %vm640_vm4, %v5199_v14, 0.0 }
 0x71a   : > { %v3974_v22 = vpop.eup %3973  ;;  %1926 = vadd.xlane.f32.xlu0 %v1925_v37 }
 0x71b   : > { %v2583_v21 = vpop.xlane.xlu1 %2582  ;;  %v5204_v16 = vmul.f32 %v3974_v22, %v5113_v62 }
 0x71c   : > { %3981 = vrcp.f32 %v2583_v21  ;;  %v1901_v21 = vmul.f32 8.0, %v5189_v42 }
 0x71d   : > { %v1928_v55 = vsel %vm640_vm4, %v5204_v16, 0.0 }
 0x71e   : > { %v3976_v36 = vpop.eup %3975  ;;  %1929 = vadd.xlane.f32.xlu1 %v1928_v55 }
 0x71f   : > { %v5209_v29 = vmul.f32 %v3976_v36, %v5119_v13  ;;  %v446_v13 = vld [vmem:[%s5708_s4 + $0x38] sm:$0xff] }
 0x720   : > { %v5240_v60 = vpack.c.bf16 %v447_v47, %v446_v13 }
 0x721   : > { %v1931_v62 = vsel %vm640_vm4, %v5209_v29, 0.0 }
 0x722   : > { %v3978_v2 = vpop.eup %3977  ;;  %1932 = vadd.xlane.f32.xlu0 %v1931_v62  ;;  %v1902_v62 = vmul.f32 8.0, %v5194_v51 }
 0x723   : > { %v3980_v3 = vpop.eup %3979  ;;  %v5222_v28 = vmul.f32 %v3978_v2, %v5124_v48 }
 0x724   : > { %v5231_v35 = vmul.f32 %v3980_v3, %v5128_v58 }
 0x725   : > { %3636 = vmatmul.mubr.msk.f32.vlgmr.msra.gmra.mrb[20].mxu0 %vm2508_vm14, %v5222_v28  ;;  %v2780_v41 = vsel %vm2508_vm14, %v5222_v28, 0.0 }
 0x726   : > { %v3982_v53 = vpop.eup %3981  ;;  %3711 = vmatpush3.bf16.msra.mxu0 %v5219_v6  ;;  %2781 = vadd.xlane.f32.xlu0 %v2780_v41  ;;  %v1934_v48 = vsel %vm640_vm4, %v5231_v35, 0.0 }
 0x727   : > { %v5243_v15 = vmul.f32 %v3982_v53, %v5135_v26  ;;  %1935 = vadd.xlane.f32.xlu1 %v1934_v48  ;;  %3712 = vmatprep.subr.bf16.mxu0 %v4117_v23  ;;  %v1897_v26 = vmul.f32 8.0, %v5169_v0  ;;  %v1903_v53 = vmul.f32 8.0, %v5199_v14 }
 0x728   : > { %3648 = vmatprep.mubr.msk.f32.mxu0 %vm4114_vm0, %v5721_v61 }
 0x729   : > { %v2783_v58 = vsel %vm2508_vm14, %v5243_v15, 0.0 }
 0x72a   : > { %3714 = vmatpush3.bf16.msra.mxu0 %v5240_v60 }
 0x72b   : > { %2784 = vadd.xlane.f32.xlu1 %v2783_v58  ;;  %3646 = vmatprep.subr.mxu0 %v5721_v61 }
 0x72e   : > { %3647 = vmatpush3.msra.mxu0 %v5255_v9 }
 0x72f   : > { %3649 = vmatmul.mubr.msk.f32.vlgmr.msra.gmra.mrb[22].mxu0 %vm2508_vm14, %v5243_v15  ;;  %3721 = vmatprep.subr.bf16.mxu0 %v4117_v23 }
 0x730   : > { %3723 = vmatpush3.bf16.msra.mxu0 %v5219_v6  ;;  %3674 = vmatprep.mubr.msk.f32.mxu0 %vm4114_vm0, %v5721_v61 }
 0x731   : > { %3724 = vmatprep.subr.bf16.mxu0 %v4117_v23 }
 0x734   : > { %3726 = vmatpush3.bf16.msra.mxu0 %v5240_v60 }
 0x735   : > { %3672 = vmatprep.subr.mxu0 %v5721_v61 }
 0x738   : > { %3673 = vmatpush3.msra.mxu0 %v5255_v9 }
 0x739   : > { %3733 = vmatprep.subr.bf16.mxu0 %v4117_v23 }
 0x78f   : > { %v1909_v34 = vpop.xlane.xlu0 %1908 }
 0x790   : > { %v1937_v43 = vsub.f32 %v1897_v26, %v1909_v34 }
 0x792   : > { %vm1947_vm12 = vcmp.gt.f32.partialorder %v1937_v43, 0.0 }
 0x793   : > { %v1957_v40 = vsel %vm1947_vm12, 1.0, %v5721_v61  ;;  %v1912_v44 = vpop.xlane.xlu1 %1911 }
 0x794   : > { %v5273_v54 = vmul.f32 %v1957_v40, %v5169_v0  ;;  %v1938_v45 = vsub.f32 %v1898_v57, %v1912_v44 }
 0x796   : > { %vm1948_vm13 = vcmp.gt.f32.partialorder %v1938_v45, 0.0  ;;  %v1977_v32 = vsel %vm640_vm4, %v5273_v54, 0.0 }
 0x797   : > { %v1958_v63 = vsel %vm1948_vm13, 1.0, %v5721_v61  ;;  %v1915_v49 = vpop.xlane.xlu0 %1914  ;;  %1978 = vadd.xlane.f32.xlu0 %v1977_v32 }
 0x798   : > { %v5280_v19 = vmul.f32 %v1958_v63, %v5174_v4  ;;  %v1939_v10 = vsub.f32 %v1899_v59, %v1915_v49 }
 0x79a   : > { %vm1949_vm15 = vcmp.gt.f32.partialorder %v1939_v10, 0.0  ;;  %v1980_v0 = vsel %vm640_vm4, %v5280_v19, 0.0  ;;  %v2778_v10 = vmul.f32 36.0, %v5222_v28 }
 0x79b   : > { %v1959_v5 = vsel %vm1949_vm15, 1.0, %v5721_v61  ;;  %1981 = vadd.xlane.f32.xlu1 %v1980_v0  ;;  %v1918_v27 = vpop.xlane.xlu1 %1917 }
 0x79c   : > { %v5287_v22 = vmul.f32 %v1959_v5, %v5179_v30  ;;  %v1940_v37 = vsub.f32 %v1900_v52, %v1918_v27  ;;  %v1906_v5 = vmul.f32 8.0, %v5231_v35 }
 0x79e   : > { %vm1950_vm1 = vcmp.gt.f32.partialorder %v1940_v37, 0.0  ;;  %v1983_v4 = vsel %vm640_vm4, %v5287_v22, 0.0 }
 0x79f   : > { %v1960_v55 = vsel %vm1950_vm1, 1.0, %v5721_v61  ;;  %v1921_v36 = vpop.xlane.xlu0 %1920  ;;  %1984 = vadd.xlane.f32.xlu0 %v1983_v4 }
 0x7a0   : > { %v5294_v20 = vmul.f32 %v1960_v55, %v5184_v56  ;;  %v1941_v25 = vsub.f32 %v1901_v21, %v1921_v36  ;;  %v2779_v36 = vmul.f32 36.0, %v5243_v15 }
 0x7a2   : > { %vm1951_vm2 = vcmp.gt.f32.partialorder %v1941_v25, 0.0  ;;  %v1986_v30 = vsel %vm640_vm4, %v5294_v20, 0.0 }
 0x7a3   : > { %v1961_v2 = vsel %vm1951_vm2, 1.0, %v5721_v61  ;;  %1987 = vadd.xlane.f32.xlu1 %v1986_v30  ;;  %v1924_v3 = vpop.xlane.xlu1 %1923 }
 0x7a4   : > { %v5301_v13 = vmul.f32 %v1961_v2, %v5189_v42  ;;  %v1942_v47 = vsub.f32 %v1902_v62, %v1924_v3  ;;  %v1904_v42 = vmul.f32 8.0, %v5204_v16 }
 0x7a6   : > { %vm1952_vm3 = vcmp.gt.f32.partialorder %v1942_v47, 0.0  ;;  %v1989_v56 = vsel %vm640_vm4, %v5301_v13, 0.0 }
 0x7a7   : > { %v1962_v41 = vsel %vm1952_vm3, 1.0, %v5721_v61  ;;  %1990 = vadd.xlane.f32.xlu0 %v1989_v56  ;;  %v1927_v58 = vpop.xlane.xlu0 %1926 }
 0x7a8   : > { %v5308_v48 = vmul.f32 %v1962_v41, %v5194_v51  ;;  %v1943_v26 = vsub.f32 %v1903_v53, %v1927_v58  ;;  %v1905_v51 = vmul.f32 8.0, %v5209_v29 }
 0x7aa   : > { %v1992_v34 = vsel %vm640_vm4, %v5308_v48, 0.0  ;;  %vm1953_vm5 = vcmp.gt.f32.partialorder %v1943_v26, 0.0 }
 0x7ab   : > { %1993 = vadd.xlane.f32.xlu1 %v1992_v34  ;;  %v1930_v43 = vpop.xlane.xlu1 %1929  ;;  %v1963_v57 = vsel %vm1953_vm5, 1.0, %v5721_v61 }
 0x7ac   : > { %v1944_v40 = vsub.f32 %v1904_v42, %v1930_v43  ;;  %v5315_v44 = vmul.f32 %v1963_v57, %v5199_v14 }
 0x7ae   : > { %vm1954_vm6 = vcmp.gt.f32.partialorder %v1944_v40, 0.0  ;;  %v1995_v32 = vsel %vm640_vm4, %v5315_v44, 0.0 }
 0x7af   : > { %v1964_v45 = vsel %vm1954_vm6, 1.0, %v5721_v61  ;;  %v1933_v59 = vpop.xlane.xlu0 %1932  ;;  %1996 = vadd.xlane.f32.xlu0 %v1995_v32 }
 0x7b0   : > { %v5322_v63 = vmul.f32 %v1964_v45, %v5204_v16  ;;  %v1945_v49 = vsub.f32 %v1905_v51, %v1933_v59 }
 0x7b2   : > { %vm1955_vm7 = vcmp.gt.f32.partialorder %v1945_v49, 0.0  ;;  %v1998_v14 = vsel %vm640_vm4, %v5322_v63, 0.0 }
 0x7b3   : > { %v1965_v0 = vsel %vm1955_vm7, 1.0, %v5721_v61  ;;  %v2782_v52 = vpop.xlane.xlu0 %2781  ;;  %1999 = vadd.xlane.f32.xlu1 %v1998_v14 }
 0x7b4   : > { %v5330_v27 = vmul.f32 %v1965_v0, %v5209_v29  ;;  %v2786_v37 = vsub.f32 %v2778_v10, %v2782_v52  ;;  %v1936_v16 = vpop.xlane.xlu1 %1935 }
 0x7b5   : > { %v1946_v21 = vsub.f32 %v1906_v5, %v1936_v16 }
 0x7b6   : > { %vm2788_vm8 = vcmp.gt.f32.partialorder %v2786_v37, 0.0  ;;  %v2001_v4 = vsel %vm640_vm4, %v5330_v27, 0.0 }
 0x7b7   : > { %v2790_v55 = vsel %vm2788_vm8, 1.0, %v5721_v61  ;;  %vm1956_vm9 = vcmp.gt.f32.partialorder %v1946_v21, 0.0  ;;  %2002 = vadd.xlane.f32.xlu0 %v2001_v4 }
 0x7b8   : > { %v5337_v25 = vmul.f32 %v2790_v55, %v5222_v28  ;;  %v1966_v30 = vsel %vm1956_vm9, 1.0, %v5721_v61  ;;  %v2785_v29 = vpop.xlane.xlu1 %2784 }
 0x7b9   : > { %v5341_v62 = vmul.f32 %v1966_v30, %v5231_v35  ;;  %v2787_v2 = vsub.f32 %v2779_v36, %v2785_v29 }
 0x7ba   : > { %v2794_v3 = vsel %vm2508_vm14, %v5337_v25, 0.0 }
 0x7bb   : > { %vm2789_vm10 = vcmp.gt.f32.partialorder %v2787_v2, 0.0  ;;  %2795 = vadd.xlane.f32.xlu0 %v2794_v3  ;;  %v2004_v47 = vsel %vm640_vm4, %v5341_v62, 0.0 }
 0x7bc   : > { %v2791_v56 = vsel %vm2789_vm10, 1.0, %v5721_v61  ;;  %2005 = vadd.xlane.f32.xlu1 %v2004_v47 }
 0x7bd   : > { %v5349_v41 = vmul.f32 %v2791_v56, %v5243_v15 }
 0x7bf   : > { %v2797_v53 = vsel %vm2508_vm14, %v5349_v41, 0.0 }
 0x7c0   : > { %2798 = vadd.xlane.f32.xlu1 %v2797_v53 }
 0x7f8   : > { %v2665_v35 = vpop.f32.mrb[20].mxu0 }
 0x7f9   : > { %v2742_v58 = vmul.f32 %v2665_v35, %v5222_v28  ;;  %v3637_v26 = vpop.f32.mrb[21].mxu0 }
 0x7fb   : > { %v2744_v34 = vsel %vm2508_vm14, %v2742_v58, 0.0 }
 0x7fc   : > { %2745 = vadd.xlane.f32.xlu0 %v2744_v34 }
 0x802   : > { %v2738_v42 = vpop.f32.mrb[22].mxu0 }
 0x803   : > { %v2743_v43 = vmul.f32 %v2738_v42, %v5243_v15  ;;  %v3650_v57 = vpop.f32.mrb[23].mxu0 }
 0x805   : > { %v2747_v40 = vsel %vm2508_vm14, %v2743_v43, 0.0 }
 0x806   : > { %2748 = vadd.xlane.f32.xlu1 %v2747_v40 }
 0x824   : > { %v1979_v51 = vpop.xlane.xlu0 %1978 }
 0x825   : > { %3983 = vrcp.f32 %v1979_v51 }
 0x828   : > { %v1982_v45 = vpop.xlane.xlu1 %1981 }
 0x829   : > { %3985 = vrcp.f32 %v1982_v45 }
 0x82c   : > { %v1985_v59 = vpop.xlane.xlu0 %1984 }
 0x82d   : > { %3987 = vrcp.f32 %v1985_v59 }
 0x82f   : > { %v3984_v32 = vpop.eup %3983 }
 0x830   : > { %v1988_v49 = vpop.xlane.xlu1 %1987  ;;  %v5358_v10 = vmul.f32 %v3984_v32, %v5273_v54 }
 0x831   : > { %3989 = vrcp.f32 %v1988_v49  ;;  %v2588_v49 = vmul.f32 %v5222_v28, %v4676_v12 }
 0x832   : > { %3610 = vmatprep.mubr.msk.f32.mxu1 %vm640_vm4, %v5358_v10 }
 0x833   : > { %v3986_v14 = vpop.eup %3985 }
 0x834   : > { %v5363_v0 = vmul.f32 %v3986_v14, %v5280_v19  ;;  %v1991_v52 = vpop.xlane.xlu0 %1990  ;;  %v5722_v14 = vld [vmem:[#allocation3_spill] sm:$0xff] }
 0x835   : > { %3991 = vrcp.f32 %v1991_v52  ;;  %v2589_v52 = vmul.f32 %v5243_v15, %v5722_v14 }
 0x836   : > { %3611 = vmatmul.mubr.msk.f32.vlgmr.msra.gmra.mrb[20].mxu1 %vm640_vm4, %v5363_v0 }
 0x837   : > { %v3988_v5 = vpop.eup %3987  ;;  %3717 = vmatpush3.bf16.msra.mxu1 %v5145_v31 }
 0x838   : > { %v1994_v37 = vpop.xlane.xlu1 %1993  ;;  %v5369_v54 = vmul.f32 %v3988_v5, %v5287_v22  ;;  %3718 = vmatprep.subr.bf16.mxu1 %v4117_v23  ;;  %v2590_v5 = vsel %vm2508_vm14, %v2588_v49, 0.0 }
 0x839   : > { %3993 = vrcp.f32 %v1994_v37  ;;  %v2593_v37 = vsel %vm2508_vm14, %v2589_v52, 0.0 }
 0x83a   : > { %3613 = vmatprep.mubr.msk.f32.mxu1 %vm640_vm4, %v5369_v54 }
 0x83b   : > { %v3990_v19 = vpop.eup %3989  ;;  %3720 = vmatpush3.bf16.msra.mxu1 %v5157_v39 }
 0x83c   : > { %v5376_v16 = vmul.f32 %v3990_v19, %v5294_v20  ;;  %3659 = vmatprep.subr.mxu1 %v5721_v61  ;;  %v1997_v21 = vpop.xlane.xlu0 %1996 }
 0x83d   : > { %3995 = vrcp.f32 %v1997_v21 }
 0x83e   : > { %3614 = vmatmul.mubr.msk.f32.gmra.mrb[22].mxu1 %vm640_vm4, %v5376_v16 }
 0x83f   : > { %v3992_v22 = vpop.eup %3991  ;;  %3660 = vmatpush3.msra.mxu1 %v5164_v17 }
 0x840   : > { %v2000_v4 = vpop.xlane.xlu1 %1999  ;;  %v5383_v55 = vmul.f32 %v3992_v22, %v5301_v13  ;;  %3727 = vmatprep.subr.bf16.mxu1 %v4117_v23 }
 0x841   : > { %3997 = vrcp.f32 %v2000_v4 }
 0x842   : > { %3616 = vmatprep.mubr.msk.f32.mxu1 %vm640_vm4, %v5383_v55 }
 0x843   : > { %v3994_v20 = vpop.eup %3993 }
 0x844   : > { %v2003_v36 = vpop.xlane.xlu0 %2002  ;;  %v5389_v30 = vmul.f32 %v3994_v20, %v5308_v48 }
 0x845   : > { %3999 = vrcp.f32 %v2003_v36 }
 0x846   : > { %3617 = vmatmul.mubr.msk.f32.gmra.mrb[24].mxu1 %vm640_vm4, %v5389_v30 }
 0x847   : > { %v3996_v29 = vpop.eup %3995 }
 0x848   : > { %v2796_v2 = vpop.xlane.xlu0 %2795  ;;  %v5394_v13 = vmul.f32 %v3996_v29, %v5315_v44 }
 0x849   : > { %v2006_v3 = vpop.xlane.xlu1 %2005 }
 0x84a   : > { %4001 = vrcp.f32 %v2006_v3  ;;  %3619 = vmatprep.mubr.msk.f32.mxu1 %vm640_vm4, %v5394_v13 }
 0x84b   : > { %v3998_v47 = vpop.eup %3997  ;;  %4003 = vrcp.f32 %v2796_v2 }
 0x84c   : > { %v5399_v56 = vmul.f32 %v3998_v47, %v5322_v63 }
 0x84d   : > { %v2799_v48 = vpop.xlane.xlu1 %2798 }
 0x84e   : > { %4005 = vrcp.f32 %v2799_v48  ;;  %3620 = vmatmul.mubr.msk.f32.gmra.mrb[26].mxu1 %vm640_vm4, %v5399_v56 }
 0x84f   : > { %v4000_v53 = vpop.eup %3999 }
 0x850   : > { %v5404_v35 = vmul.f32 %v4000_v53, %v5330_v27 }
 0x852   : > { %3622 = vmatprep.mubr.msk.f32.mxu1 %vm640_vm4, %v5404_v35 }
 0x854   : > { %v4002_v44 = vpop.eup %4001 }
 0x855   : > { %v5409_v58 = vmul.f32 %v4002_v44, %v5341_v62  ;;  %v4004_v26 = vpop.eup %4003 }
 0x856   : > { %v5416_v34 = vmul.f32 %v4004_v26, %v5337_v25 }
 0x857   : > { %3623 = vmatmul.mubr.msk.f32.gmra.mrb[28].mxu1 %vm640_vm4, %v5409_v58 }
 0x858   : > { %v4006_v63 = vpop.eup %4005  ;;  %3661 = vmatprep.mubr.msk.f32.mxu1 %vm4114_vm0, %v5721_v61  ;;  %v2804_v19 = vmul.f32 %v5416_v34, %v4676_v12 }
 0x859   : > { %v5419_v27 = vmul.f32 %v4006_v63, %v5349_v41 }
 0x85a   : > { %v2806_v22 = vsel %vm2508_vm14, %v2804_v19, 0.0 }
 0x85b   : > { %3662 = vmatmul.mubr.msk.f32.vlgmr.msra.gmra.mrb[30].mxu1 %vm2508_vm14, %v5416_v34  ;;  %3675 = vmatmul.mubr.msk.f32.vlgmr.msra.gmra.mrb[24].mxu0 %vm2508_vm14, %v5419_v27  ;;  %v2805_v21 = vmul.f32 %v5419_v27, %v5722_v14 }
 0x85c   : > { %3729 = vmatpush3.bf16.msra.mxu1 %v5145_v31  ;;  %3735 = vmatpush3.bf16.msra.mxu0 %v5219_v6 }
 0x85d   : > { %3730 = vmatprep.subr.bf16.mxu1 %v4117_v23  ;;  %3736 = vmatprep.subr.bf16.mxu0 %v4117_v23  ;;  %v2809_v28 = vsel %vm2508_vm14, %v2805_v21, 0.0 }
 0x85e   : > { %3687 = vmatprep.mubr.msk.f32.mxu1 %vm4114_vm0, %v5721_v61  ;;  %3700 = vmatprep.mubr.msk.f32.mxu0 %vm4114_vm0, %v5721_v61 }
 0x860   : > { %3732 = vmatpush3.bf16.msra.mxu1 %v5157_v39  ;;  %3738 = vmatpush3.bf16.msra.mxu0 %v5240_v60 }
 0x861   : > { %3685 = vmatprep.subr.mxu1 %v5721_v61  ;;  %3698 = vmatprep.subr.mxu0 %v5721_v61 }
 0x864   : > { %3686 = vmatpush3.msra.mxu1 %v5164_v17  ;;  %3699 = vmatpush3.msra.mxu0 %v5255_v9 }
 0x889   : > { %v2746_v15 = vpop.xlane.xlu0 %2745 }
 0x88a   : > { %v2750_v20 = vmax.f32 %v2746_v15, 0.0 }
 0x88c   : > { %4007 = vrsqrt.f32 %v2750_v20  ;;  %vm2754_vm0 = vcmp.eq.f32.partialorder %v2750_v20, inf  ;;  %vm2756_vm12 = vcmp.eq.f32.partialorder %v2750_v20, 0.0 }
 0x893   : > { %v2749_v4 = vpop.xlane.xlu1 %2748 }
 0x894   : > { %v2751_v36 = vmax.f32 %v2749_v4, 0.0 }
 0x896   : > { %4009 = vrsqrt.f32 %v2751_v36  ;;  %v4008_v29 = vpop.eup %4007  ;;  %vm2761_vm11 = vcmp.eq.f32.partialorder %v2751_v36, inf  ;;  %vm2763_vm13 = vcmp.eq.f32.partialorder %v2751_v36, 0.0 }
 0x897   : > { %v2753_v3 = vmul.f32 %v4008_v29, %v2750_v20 }
 0x899   : > { %v2755_v63 = vsel %vm2754_vm0, %v2750_v20, %v2753_v3 }
 0x8a0   : > { %v4010_v2 = vpop.eup %4009 }
 0x8a1   : > { %v2760_v53 = vmul.f32 %v4010_v2, %v2751_v36 }
 0x909   : > { %v5439_v31 = vpop.f32.mrb[20].mxu1 }
 0x90a   : > { %v5441_v23 = vpop.f32.mrb[21].mxu1 }
 0x911   : > { %v5443_v6 = vpop.f32.mrb[22].mxu1 }
 0x912   : > { %v5445_v25 = vpop.f32.mrb[23].mxu1 }
 0x919   : > { %v5447_v62 = vpop.f32.mrb[24].mxu1 }
 0x91a   : > { %v5449_v39 = vpop.f32.mrb[25].mxu1 }
 0x921   : > { %v5451_v60 = vpop.f32.mrb[26].mxu1 }
 0x922   : > { %v5453_v41 = vpop.f32.mrb[27].mxu1 }
 0x92a   : > { %v5455_v42 = vpop.f32.mrb[28].mxu1 }
 0x92b   : > { %v5457_v17 = vpop.f32.mrb[29].mxu1 }
 0x92e   : > { %v2881_v9 = vpop.f32.mrb[30].mxu1  ;;  %v2954_v43 = vpop.f32.mrb[24].mxu0 }
 0x92f   : > { %v2958_v57 = vmul.f32 %v2881_v9, %v5416_v34  ;;  %v2959_v40 = vmul.f32 %v2954_v43, %v5419_v27  ;;  %v3663_v51 = vpop.f32.mrb[31].mxu1  ;;  %v3676_v45 = vpop.f32.mrb[25].mxu0  ;;  %v2757_v9 = vand.u32 2147483648, %v2750_v20  ;;  %v2762_v43 = vsel %vm2761_vm11, %v2751_v36, %v2760_v53 }
 0x931   : > { %v2960_v59 = vsel %vm2508_vm14, %v2958_v57, 0.0  ;;  %v2963_v32 = vsel %vm2508_vm14, %v2959_v40, 0.0  ;;  %v2764_v57 = vand.u32 2147483648, %v2751_v36  ;;  %v5480_v40 = vld [vmem:[%s391_s16] sm:$0xff]  ;;  %v2758_v51 = vsel %vm2756_vm12, %v2757_v9, %v2755_v63 }
 0x932   : > { %2961 = vadd.xlane.f32.xlu0 %v2960_v59  ;;  %2964 = vadd.xlane.f32.xlu1 %v2963_v32  ;;  %v2766_v59 = vmul.f32 %v2758_v51, %v5480_v40 }
 0x933   : > { %v2765_v45 = vsel %vm2763_vm13, %v2764_v57, %v2762_v43 }
 0x934   : > { %v2767_v32 = vmul.f32 %v2765_v45, %v5480_v40 }
 0x936   : > { %2591 = vadd.xlane.f32.xlu0 %v2590_v5  ;;  %2594 = vadd.xlane.f32.xlu1 %v2593_v37  ;;  %v2768_v37 = vmax.f32 %v2766_v59, 1e-08  ;;  %v2769_v21 = vmax.f32 %v2767_v32, 1e-08 }
 0x93a   : > { %2807 = vadd.xlane.f32.xlu0 %v2806_v22  ;;  %2810 = vadd.xlane.f32.xlu1 %v2809_v28 }
 0x9bf   : > { %v2962_v47 = vpop.xlane.xlu0 %2961  ;;  %v2965_v48 = vpop.xlane.xlu1 %2964 }
 0x9c0   : > { %v2966_v44 = vmax.f32 %v2962_v47, 0.0  ;;  %v2967_v26 = vmax.f32 %v2965_v48, 0.0 }
 0x9c2   : > { %4011 = vrsqrt.f32 %v2966_v44  ;;  %vm2970_vm15 = vcmp.eq.f32.partialorder %v2966_v44, inf  ;;  %v2973_v22 = vand.u32 2147483648, %v2966_v44  ;;  %vm2972_vm1 = vcmp.eq.f32.partialorder %v2966_v44, 0.0 }
 0x9c3   : > { %4013 = vrsqrt.f32 %v2967_v26  ;;  %vm2977_vm2 = vcmp.eq.f32.partialorder %v2967_v26, inf  ;;  %v2980_v15 = vand.u32 2147483648, %v2967_v26  ;;  %vm2979_vm3 = vcmp.eq.f32.partialorder %v2967_v26, 0.0  ;;  %v2592_v48 = vpop.xlane.xlu0 %2591  ;;  %v2595_v53 = vpop.xlane.xlu1 %2594 }
 0x9c4   : > { %4015 = vrcp.f32 %v2768_v37 }
 0x9c5   : > { %4017 = vrcp.f32 %v2769_v21 }
 0x9c7   : > { %v2808_v51 = vpop.xlane.xlu0 %2807  ;;  %v2811_v59 = vpop.xlane.xlu1 %2810 }
 0x9cc   : > { %v4012_v49 = vpop.eup %4011 }
 0x9cd   : > { %v4014_v52 = vpop.eup %4013  ;;  %v2969_v5 = vmul.f32 %v4012_v49, %v2966_v44 }
 0x9ce   : > { %v2976_v19 = vmul.f32 %v4014_v52, %v2967_v26  ;;  %v4016_v63 = vpop.eup %4015 }
 0x9cf   : > { %v2971_v28 = vsel %vm2970_vm15, %v2966_v44, %v2969_v5  ;;  %v4018_v44 = vpop.eup %4017  ;;  %v2772_v9 = vmul.f32 %v4016_v63, %v2592_v48 }
 0x9d0   : > { %v2974_v4 = vsel %vm2972_vm1, %v2973_v22, %v2971_v28  ;;  %v2978_v20 = vsel %vm2977_vm2, %v2967_v26, %v2976_v19  ;;  %v2773_v43 = vmul.f32 %v4018_v44, %v2595_v53 }
 0x9d1   : > { %v2982_v36 = vmul.f32 %v2974_v4, %v5480_v40  ;;  %v2981_v29 = vsel %vm2979_vm3, %v2980_v15, %v2978_v20  ;;  %vm2774_vm5 = vcmp.eq.f32.partialorder %v2772_v9, 0.0 }
 0x9d2   : > { %v2983_v2 = vmul.f32 %v2981_v29, %v5480_v40  ;;  %vm2775_vm6 = vcmp.eq.f32.partialorder %v2773_v43, 0.0  ;;  %v2776_v49 = vsel %vm2774_vm5, 1e-08, %v2772_v9 }
 0x9d3   : > { %v2984_v3 = vmax.f32 %v2982_v36, 1e-08  ;;  %v2777_v5 = vsel %vm2775_vm6, 1e-08, %v2773_v43 }
 0x9d4   : > { %v2985_v47 = vmax.f32 %v2983_v2, 1e-08 }
 0x9d5   : > { %4019 = vrcp.f32 %v2984_v3 }
 0x9d6   : > { %4021 = vrcp.f32 %v2985_v47 }
 0x9df   : > { %v4020_v57 = vpop.eup %4019 }
 0x9e0   : > { %v4022_v26 = vpop.eup %4021  ;;  %v2988_v45 = vmul.f32 %v4020_v57, %v2808_v51 }
 0x9e1   : > { %v2989_v32 = vmul.f32 %v4022_v26, %v2811_v59 }
 0x9e2   : > { %vm2990_vm7 = vcmp.eq.f32.partialorder %v2988_v45, 0.0 }
 0x9e3   : > { %v2992_v52 = vsel %vm2990_vm7, 1e-08, %v2988_v45  ;;  %vm2991_vm8 = vcmp.eq.f32.partialorder %v2989_v32, 0.0 }
 0x9e4   : > { %v2994_v37 = vsub.f32 %v2992_v52, %v2776_v49  ;;  %v2993_v19 = vsel %vm2991_vm8, 1e-08, %v2989_v32 }
 0x9e5   : > { %v2995_v21 = vsub.f32 %v2993_v19, %v2777_v5  ;;  %v2212_v5 = vmul.f32 %v5441_v23, %v5358_v10  ;;  %v2213_v19 = vmul.f32 %v5439_v31, %v5363_v0 }
 0x9e6   : > { %vm2996_vm9 = vcmp.eq.f32.partialorder %v2994_v37, 0.0 }
 0x9e7   : > { %v2998_v22 = vsel %vm2996_vm9, 1e-08, %v2994_v37  ;;  %vm2997_vm10 = vcmp.eq.f32.partialorder %v2995_v21, 0.0  ;;  %v2225_v23 = vsel %vm640_vm4, %v2213_v19, 0.0 }
 0x9e8   : > { %3002 = vperm.xlu0 %3768, %v2998_v22   ;;  %v2999_v28 = vsel %vm2997_vm10, 1e-08, %v2995_v21  ;;  %v2217_v22 = vmul.f32 %v5447_v62, %v5389_v30 }
 0x9e9   : > { %3007 = vperm.xlu1 %3769, %v2999_v28   ;;  %v2222_v28 = vsel %vm640_vm4, %v2212_v5, 0.0  ;;  %v2033_v5 = vmul.f32 %v5394_v13, %v4273_v46 }
 0x9ea   : > { %v2237_v31 = vsel %vm640_vm4, %v2217_v22, 0.0 }
 0xa67   : > { %v3003_v15 = vpop.permute.xlu0 %3002 }
 0xa68   : > { %v3010_v4 = vmul.f32 %v3003_v15, %v5416_v34  ;;  %v3008_v20 = vpop.permute.xlu1 %3007  ;;  %v2214_v15 = vmul.f32 %v5445_v25, %v5369_v54 }
 0xa69   : > { %v3011_v36 = vmul.f32 %v3008_v20, %v5419_v27  ;;  %v2215_v20 = vmul.f32 %v5443_v6, %v5376_v16 }
 0xa6a   : > { %v3012_v29 = vsel %vm2508_vm14, %v3010_v4, 0.0 }
 0xa6b   : > { %3013 = vadd.xlane.f32.xlu1 %v3012_v29  ;;  %v3015_v2 = vsel %vm2508_vm14, %v3011_v36, 0.0  ;;  %v2216_v29 = vmul.f32 %v5449_v39, %v5383_v55 }
 0xa6c   : > { %3016 = vadd.xlane.f32.xlu0 %v3015_v2  ;;  %v2221_v2 = vmul.f32 %v5455_v42, %v5409_v58 }
 0xaf8   : > { %v3014_v3 = vpop.xlane.xlu1 %3013 }
 0xaf9   : > { %v3017_v47 = vpop.xlane.xlu0 %3016  ;;  %4023 = vrcp.f32 %v3014_v3  ;;  %v2234_v3 = vsel %vm640_vm4, %v2216_v29, 0.0 }
 0xafa   : > { %4025 = vrcp.f32 %v3017_v47 }
 0xb03   : > { %v4024_v48 = vpop.eup %4023 }
 0xb04   : > { %v4026_v53 = vpop.eup %4025  ;;  %v3020_v63 = vmul.f32 %v4024_v48, %v3010_v4  ;;  %v2219_v4 = vmul.f32 %v5451_v60, %v5399_v56  ;;  %v2231_v60 = vsel %vm640_vm4, %v2215_v20, 0.0 }
 0xb05   : > { %v3021_v44 = vmul.f32 %v4026_v53, %v3011_v36  ;;  %v2220_v36 = vmul.f32 %v5457_v17, %v5404_v35  ;;  %v2249_v17 = vsel %vm640_vm4, %v2221_v2, 0.0 }
 0xb06   : > { %v3024_v9 = vsel %vm2508_vm14, %v3020_v63, 0.0  ;;  %v3022_v27 = vmul.f32 36.0, %v3020_v63  ;;  %v2243_v25 = vsel %vm640_vm4, %v2219_v4, 0.0 }
 0xb07   : > { %v3027_v34 = vsel %vm2508_vm14, %v3021_v44, 0.0  ;;  %3025 = vadd.xlane.f32.xlu0 %v3024_v9  ;;  %v3023_v57 = vmul.f32 36.0, %v3021_v44  ;;  %v2246_v6 = vsel %vm640_vm4, %v2220_v36, 0.0 }
 0xb08   : > { %3028 = vadd.xlane.f32.xlu1 %v3027_v34 }
 0xb94   : > { %v3026_v43 = vpop.xlane.xlu0 %3025 }
 0xb95   : > { %v3030_v51 = vsub.f32 %v3022_v27, %v3026_v43  ;;  %v3029_v26 = vpop.xlane.xlu1 %3028 }
 0xb96   : > { %v3031_v45 = vsub.f32 %v3023_v57, %v3029_v26  ;;  %v2027_v26 = vmul.f32 %v5358_v10, %v4216_v8  ;;  %v2029_v10 = vmul.f32 %v5369_v54, %v4234_v18  ;;  %v2031_v54 = vmul.f32 %v5383_v55, %v4255_v33 }
 0xb97   : > { %vm3032_vm0 = vcmp.gt.f32.partialorder %v3030_v51, 0.0 }
 0xb98   : > { %v3034_v59 = vsel %vm3032_vm0, 1.0, %v5721_v61  ;;  %vm3033_vm11 = vcmp.gt.f32.partialorder %v3031_v45, 0.0 }
 0xb99   : > { %v3036_v32 = vmul.f32 %v3034_v59, %v3020_v63  ;;  %v3035_v49 = vsel %vm3033_vm11, 1.0, %v5721_v61  ;;  %v2218_v61 = vmul.f32 %v5453_v41, %v5394_v13  ;;  %v2228_v41 = vsel %vm640_vm4, %v2214_v15, 0.0 }
 0xb9a   : > { %v3037_v52 = vmul.f32 %v3035_v49, %v3021_v44  ;;  %v2028_v59 = vmul.f32 %v5363_v0, %v4220_v11  ;;  %v2032_v49 = vmul.f32 %v5389_v30, %v4260_v38  ;;  %v2055_v11 = vsel %vm640_vm4, %v2033_v5, 0.0 }
 0xb9b   : > { %v3038_v37 = vsel %vm2508_vm14, %v3036_v32, 0.0  ;;  %v2240_v62 = vsel %vm640_vm4, %v2218_v61, 0.0  ;;  %v2034_v0 = vmul.f32 %v5399_v56, %v4277_v50  ;;  %v2043_v38 = vsel %vm640_vm4, %v2029_v10, 0.0 }
 0xb9c   : > { %3039 = vadd.xlane.f32.xlu0 %v3038_v37  ;;  %v3041_v21 = vsel %vm2508_vm14, %v3037_v52, 0.0  ;;  %v2052_v8 = vsel %vm640_vm4, %v2032_v49, 0.0  ;;  %v2030_v30 = vmul.f32 %v5376_v16, %v4240_v24  ;;  %v2035_v13 = vmul.f32 %v5404_v35, %v4295_v1 }
 0xb9d   : > { %3042 = vadd.xlane.f32.xlu1 %v3041_v21  ;;  %v2058_v46 = vsel %vm640_vm4, %v2034_v0, 0.0  ;;  %v2036_v56 = vmul.f32 %v5409_v58, %v4300_v7  ;;  %v2049_v24 = vsel %vm640_vm4, %v2031_v54, 0.0 }
 0xb9e   : > { %v2046_v18 = vsel %vm640_vm4, %v2030_v30, 0.0  ;;  %v2061_v50 = vsel %vm640_vm4, %v2035_v13, 0.0 }
 0xb9f   : > { %v2064_v1 = vsel %vm640_vm4, %v2036_v56, 0.0  ;;  %v4080_v56 = vld [vmem:[%s5709_s5 + $0x8] sm:$0xff] }
 0xba0   : > { %2223 = vadd.xlane.f32.xlu0 %v2222_v28 }
 0xba1   : > { %2226 = vadd.xlane.f32.xlu1 %v2225_v23 }
 0xba4   : > { %2238 = vadd.xlane.f32.xlu0 %v2237_v31 }
 0xba5   : > { %2241 = vadd.xlane.f32.xlu1 %v2240_v62 }
 0xba8   : > { %2229 = vadd.xlane.f32.xlu0 %v2228_v41 }
 0xba9   : > { %2244 = vadd.xlane.f32.xlu1 %v2243_v25 }
 0xbac   : > { %2232 = vadd.xlane.f32.xlu0 %v2231_v60 }
 0xbad   : > { %2247 = vadd.xlane.f32.xlu1 %v2246_v6 }
 0xbb0   : > { %2235 = vadd.xlane.f32.xlu0 %v2234_v3 }
 0xbb1   : > { %2250 = vadd.xlane.f32.xlu1 %v2249_v17 }
 0xc29   : > { %v3040_v47 = vpop.xlane.xlu0 %3039 }
 0xc2a   : > { %4027 = vrcp.f32 %v3040_v47  ;;  %v3043_v48 = vpop.xlane.xlu1 %3042 }
 0xc2b   : > { %4029 = vrcp.f32 %v3043_v48 }
 0xc2d   : > { %v2224_v55 = vpop.xlane.xlu0 %2223 }
 0xc2e   : > { %v2227_v19 = vpop.xlane.xlu1 %2226  ;;  %v2252_v28 = vmax.f32 %v2224_v55, 0.0 }
 0xc30   : > { %4031 = vrsqrt.f32 %v2252_v28 }
 0xc31   : > { %v2239_v7 = vpop.xlane.xlu0 %2238 }
 0xc32   : > { %v2242_v58 = vpop.xlane.xlu1 %2241  ;;  %v2257_v61 = vmax.f32 %v2239_v7, 0.0 }
 0xc33   : > { %v5564_v23 = vmax.f32 %v2242_v58, 0.0 }
 0xc34   : > { %v4028_v39 = vpop.eup %4027  ;;  %vm2299_vm15 = vcmp.eq.f32.partialorder %v2257_v61, inf  ;;  %vm2301_vm1 = vcmp.eq.f32.partialorder %v2257_v61, 0.0 }
 0xc35   : > { %v4030_v53 = vpop.eup %4029  ;;  %v3046_v63 = vmul.f32 %v4028_v39, %v3036_v32  ;;  %v2037_v32 = vsel %vm640_vm4, %v2027_v26, 0.0  ;;  %v2230_v21 = vpop.xlane.xlu0 %2229  ;;  %v2302_v26 = vand.u32 2147483648, %v2257_v61  ;;  %vm2306_vm2 = vcmp.eq.f32.partialorder %v5564_v23, inf }
 0xc36   : > { %v3047_v44 = vmul.f32 %v4030_v53, %v3037_v52  ;;  %v2040_v52 = vsel %vm640_vm4, %v2028_v59, 0.0  ;;  %v2245_v22 = vpop.xlane.xlu1 %2244  ;;  %vm2264_vm4 = vcmp.eq.f32.partialorder %v2252_v28, inf  ;;  %vm2308_vm3 = vcmp.eq.f32.partialorder %v5564_v23, 0.0 }
 0xc37   : > { %3688 = vmatmul.mubr.msk.f32.vlgmr.msra.gmra.mrb[32].mxu1 %vm2508_vm14, %v3046_v63  ;;  %v3048_v16 = vmul.f32 %v3046_v63, %v4676_v12  ;;  %v2253_v12 = vmax.f32 %v2227_v19, 0.0  ;;  %v5568_v31 = vmax.f32 %v2245_v22, 0.0  ;;  %v2309_v49 = vand.u32 2147483648, %v5564_v23  ;;  %v4082_v19 = vld [vmem:[%s5709_s5 + $0x30] sm:$0xff] }
 0xc38   : > { %3701 = vmatmul.mubr.msk.f32.vlgmr.msra.gmra.mrb[26].mxu0 %vm2508_vm14, %v3047_v44  ;;  %v3049_v35 = vmul.f32 %v3047_v44, %v5722_v14  ;;  %v5566_v14 = vmax.f32 %v2230_v21, 0.0 }
 0xc39   : > { %v3050_v37 = vsel %vm2508_vm14, %v3048_v16, 0.0  ;;  %v2233_v15 = vpop.xlane.xlu0 %2232  ;;  %4033 = vrsqrt.f32 %v2253_v12  ;;  %vm2271_vm12 = vcmp.eq.f32.partialorder %v2253_v12, inf  ;;  %vm2273_vm13 = vcmp.eq.f32.partialorder %v2253_v12, 0.0 }
 0xc3a   : > { %v3053_v33 = vsel %vm2508_vm14, %v3049_v35, 0.0  ;;  %v2248_v4 = vpop.xlane.xlu1 %2247  ;;  %4035 = vrsqrt.f32 %v2257_v61  ;;  %v5573_v62 = vmax.f32 %v2233_v15, 0.0  ;;  %v4032_v29 = vpop.eup %4031  ;;  %vm2278_vm5 = vcmp.eq.f32.partialorder %v5566_v14, inf }
 0xc3b   : > { %4037 = vrsqrt.f32 %v5564_v23  ;;  %v5575_v20 = vmax.f32 %v2248_v4, 0.0  ;;  %v2263_v17 = vmul.f32 %v4032_v29, %v2252_v28  ;;  %vm2280_vm6 = vcmp.eq.f32.partialorder %v5566_v14, 0.0 }
 0xc3c   : > { %4039 = vrsqrt.f32 %v5566_v14  ;;  %vm2313_vm7 = vcmp.eq.f32.partialorder %v5568_v31, inf  ;;  %v2316_v54 = vand.u32 2147483648, %v5568_v31  ;;  %vm2315_vm8 = vcmp.eq.f32.partialorder %v5568_v31, 0.0 }
 0xc3d   : > { %4041 = vrsqrt.f32 %v5568_v31  ;;  %v2236_v41 = vpop.xlane.xlu0 %2235  ;;  %vm2285_vm9 = vcmp.eq.f32.partialorder %v5573_v62, inf  ;;  %vm2287_vm10 = vcmp.eq.f32.partialorder %v5573_v62, 0.0  ;;  %vm2320_vm0 = vcmp.eq.f32.partialorder %v5575_v20, inf }
 0xc3e   : > { %v2251_v36 = vpop.xlane.xlu1 %2250  ;;  %4043 = vrsqrt.f32 %v5573_v62  ;;  %v5578_v25 = vmax.f32 %v2236_v41, 0.0  ;;  %vm2322_vm11 = vcmp.eq.f32.partialorder %v5575_v20, 0.0 }
 0xc3f   : > { %4045 = vrsqrt.f32 %v5575_v20  ;;  %v5581_v60 = vmax.f32 %v2251_v36, 0.0 }
 0xc40   : > { %4047 = vrsqrt.f32 %v5578_v25 }
 0xc41   : > { %4049 = vrsqrt.f32 %v5581_v60 }
 0xc43   : > { %v4034_v2 = vpop.eup %4033 }
 0xc44   : > { %v4036_v6 = vpop.eup %4035  ;;  %v2270_v48 = vmul.f32 %v4034_v2, %v2253_v12 }
 0xc45   : > { %v4038_v3 = vpop.eup %4037  ;;  %v2298_v53 = vmul.f32 %v4036_v6, %v2257_v61 }
 0xc46   : > { %v4040_v47 = vpop.eup %4039 }
 0xc47   : > { %v4042_v39 = vpop.eup %4041 }
 0xd0a   : > { %v3125_v42 = vpop.f32.mrb[32].mxu1 }
 0xd0b   : > { %v3202_v9 = vmul.f32 %v3125_v42, %v3046_v63  ;;  %v3198_v34 = vpop.f32.mrb[26].mxu0  ;;  %v3689_v27 = vpop.f32.mrb[33].mxu1  ;;  %v2305_v63 = vmul.f32 %v4038_v3, %v5564_v23  ;;  %v2277_v42 = vmul.f32 %v4040_v47, %v5566_v14  ;;  %v2295_v3 = vand.u32 2147483648, %v5578_v25 }
 0xd0c   : > { %v3203_v43 = vmul.f32 %v3198_v34, %v3047_v44  ;;  %v3702_v57 = vpop.f32.mrb[27].mxu0  ;;  %v2267_v44 = vand.u32 2147483648, %v2252_v28  ;;  %v2274_v34 = vand.u32 2147483648, %v2253_v12  ;;  %v2312_v27 = vmul.f32 %v4042_v39, %v5568_v31  ;;  %v4086_v39 = vld [vmem:[%s5709_s5 + $0x40] sm:$0xff] }
 0xd0d   : > { %v3204_v51 = vsel %vm2508_vm14, %v3202_v9, 0.0  ;;  %v2265_v9 = vsel %vm2264_vm4, %v2252_v28, %v2263_v17  ;;  %v4044_v57 = vpop.eup %4043  ;;  %v2279_v5 = vsel %vm2278_vm5, %v5566_v14, %v2277_v42  ;;  %vm2292_vm4 = vcmp.eq.f32.partialorder %v5578_v25, inf }
 0xd0e   : > { %3205 = vadd.xlane.f32.xlu0 %v3204_v51  ;;  %v3207_v45 = vsel %vm2508_vm14, %v3203_v43, 0.0  ;;  %vm2266_vm14 = vcmp.eq.f32.partialorder %v2252_v28, 0.0  ;;  %v2272_v43 = vsel %vm2271_vm12, %v2253_v12, %v2270_v48  ;;  %v2300_v51 = vsel %vm2299_vm15, %v2257_v61, %v2298_v53  ;;  %v4083_v28 = vld [vmem:[%s5709_s5 + $0x10] sm:$0xff] }
 0xd0f   : > { %3208 = vadd.xlane.f32.xlu1 %v3207_v45  ;;  %v4046_v45 = vpop.eup %4045  ;;  %v2268_v59 = vsel %vm2266_vm14, %v2267_v44, %v2265_v9  ;;  %v2303_v10 = vsel %vm2301_vm1, %v2302_v26, %v2300_v51  ;;  %v2314_v0 = vsel %vm2313_vm7, %v5568_v31, %v2312_v27  ;;  %v2323_v31 = vand.u32 2147483648, %v5575_v20 }
 0xd10   : > { %v2319_v30 = vmul.f32 %v4046_v45, %v5575_v20  ;;  %vm2294_vm14 = vcmp.eq.f32.partialorder %v5578_v25, 0.0  ;;  %vm2327_vm12 = vcmp.eq.f32.partialorder %v5581_v60, inf  ;;  %v2330_v48 = vand.u32 2147483648, %v5581_v60 }
 0xd11   : > { %vm2403_vm15 = vcmask 7168   ;;  %vm3254_vm7 = vcmask 1041409  }
 0xd12   : > { %2038 = vadd.xlane.f32.xlu0 %v2037_v32  ;;  %v2307_v32 = vsel %vm2306_vm2, %v5564_v23, %v2305_v63  ;;  %v2321_v61 = vsel %vm2320_vm0, %v5575_v20, %v2319_v30 }
 0xd13   : > { %2041 = vadd.xlane.f32.xlu1 %v2040_v52  ;;  %v2275_v52 = vsel %vm2273_vm13, %v2274_v34, %v2272_v43  ;;  %v2324_v29 = vsel %vm2322_vm11, %v2323_v31, %v2321_v61  ;;  %vm2329_vm13 = vcmp.eq.f32.partialorder %v5581_v60, 0.0 }
 0xd14   : > { %v2340_v53 = vmul.f32 %v4086_v39, %v2324_v29 }
 0xd16   : > { %2053 = vadd.xlane.f32.xlu0 %v2052_v8  ;;  %v2284_v8 = vmul.f32 %v4044_v57, %v5573_v62  ;;  %v4087_v57 = vld [vmem:[%s5709_s5 + $0x20] sm:$0xff] }
 0xd17   : > { %2056 = vadd.xlane.f32.xlu1 %v2055_v11  ;;  %v2281_v11 = vand.u32 2147483648, %v5566_v14  ;;  %v4084_v14 = vld [vmem:[%s5709_s5 + $0x38] sm:$0xff] }
 0xd18   : > { %v2286_v58 = vsel %vm2285_vm9, %v5573_v62, %v2284_v8 }
 0xd19   : > { %v2282_v16 = vsel %vm2280_vm6, %v2281_v11, %v2279_v5 }
 0xd1a   : > { %2044 = vadd.xlane.f32.xlu0 %v2043_v38  ;;  %v4048_v38 = vpop.eup %4047  ;;  %v2334_v12 = vmul.f32 %v4083_v28, %v2282_v16  ;;  %v5723_v16 = vld [vmem:[#allocation2_spill] sm:$0xff] }
 0xd1b   : > { %2059 = vadd.xlane.f32.xlu1 %v2058_v46  ;;  %v4079_v46 = vld [vmem:[%s5709_s5] sm:$0xff]  ;;  %v2291_v55 = vmul.f32 %v4048_v38, %v5578_v25 }
 0xd1c   : > { %v2332_v13 = vmul.f32 %v4079_v46, %v2268_v59  ;;  %v2344_v6 = vmax.f32 %v2334_v12, 1e-08 }
 0xd1d   : > { %v2293_v2 = vsel %vm2292_vm4, %v5578_v25, %v2291_v55  ;;  %v2350_v25 = vmax.f32 %v2340_v53, 1e-08 }
 0xd1e   : > { %2047 = vadd.xlane.f32.xlu0 %v2046_v18  ;;  %v2310_v18 = vsel %vm2308_vm3, %v2309_v49, %v2307_v32  ;;  %v2342_v22 = vmax.f32 %v2332_v13, 1e-08  ;;  %v2296_v63 = vsel %vm2294_vm14, %v2295_v3, %v2293_v2 }
 0xd1f   : > { %2062 = vadd.xlane.f32.xlu1 %v2061_v50  ;;  %v4050_v50 = vpop.eup %4049  ;;  %v2338_v7 = vmul.f32 %v4082_v19, %v2310_v18  ;;  %v2336_v51 = vmul.f32 %v4087_v57, %v2296_v63 }
 0xd20   : > { %v2326_v21 = vmul.f32 %v4050_v50, %v5581_v60  ;;  %4051 = vrcp.f32 %v2342_v22 }
 0xd21   : > { %v2348_v36 = vmax.f32 %v2338_v7, 1e-08  ;;  %v2346_v32 = vmax.f32 %v2336_v51, 1e-08 }
 0xd22   : > { %2050 = vadd.xlane.f32.xlu0 %v2049_v24  ;;  %v2333_v24 = vmul.f32 %v4080_v56, %v2275_v52  ;;  %v2328_v20 = vsel %vm2327_vm12, %v5581_v60, %v2326_v21  ;;  %v4088_v60 = vld [vmem:[%s5709_s5 + $0x48] sm:$0xff] }
 0xd23   : > { %2065 = vadd.xlane.f32.xlu1 %v2064_v1  ;;  %v4081_v1 = vld [vmem:[%s5709_s5 + $0x28] sm:$0xff]  ;;  %v2331_v42 = vsel %vm2329_vm13, %v2330_v48, %v2328_v20 }
 0xd24   : > { %v2337_v35 = vmul.f32 %v4081_v1, %v2303_v10  ;;  %v2343_v23 = vmax.f32 %v2333_v24, 1e-08  ;;  %v2341_v26 = vmul.f32 %v4088_v60, %v2331_v42  ;;  %v2377_v1 = vadd.s32 32, %v5723_v16 }
 0xd26   : > { %3051 = vadd.xlane.f32.xlu0 %v3050_v37  ;;  %v2317_v37 = vsel %vm2315_vm8, %v2316_v54, %v2314_v0  ;;  %v2347_v4 = vmax.f32 %v2337_v35, 1e-08  ;;  %4053 = vrcp.f32 %v2343_v23  ;;  %v2351_v52 = vmax.f32 %v2341_v26, 1e-08 }
 0xd27   : > { %3054 = vadd.xlane.f32.xlu1 %v3053_v33  ;;  %v2288_v33 = vand.u32 2147483648, %v5573_v62  ;;  %v2339_v15 = vmul.f32 %v4084_v14, %v2317_v37  ;;  %v4085_v62 = vld [vmem:[%s5709_s5 + $0x18] sm:$0xff]  ;;  %vm2382_vm6 = vcmp.lt.s32.totalorder %v2377_v1, 36  ;;  %vm3257_vm8 = vcmask 1024  }
 0xd28   : > { %4055 = vrcp.f32 %v2347_v4 }
 0xd29   : > { %v2289_v41 = vsel %vm2287_vm10, %v2288_v33, %v2286_v58  ;;  %v2349_v17 = vmax.f32 %v2339_v15, 1e-08  ;;  %4057 = vrcp.f32 %v2348_v36 }
 0xd2a   : > { %v2335_v47 = vmul.f32 %v4085_v62, %v2289_v41  ;;  %4059 = vrcp.f32 %v2344_v6  ;;  %v4052_v49 = vpop.eup %4051 }
 0xd2b   : > { %4061 = vrcp.f32 %v2349_v17 }
 0xd2c   : > { %v2345_v43 = vmax.f32 %v2335_v47, 1e-08 }
 0xd30   : > { %v4054_v5 = vpop.eup %4053 }
 0xd32   : > { %v4056_v10 = vpop.eup %4055 }
 0xd33   : > { %v4058_v0 = vpop.eup %4057 }
 0xd34   : > { %v4060_v38 = vpop.eup %4059 }
 0xd35   : > { %v4062_v30 = vpop.eup %4061 }
 0xd9b   : > { %v3206_v44 = vpop.xlane.xlu0 %3205 }
 0xd9c   : > { %v3210_v9 = vmax.f32 %v3206_v44, 0.0  ;;  %v3209_v34 = vpop.xlane.xlu1 %3208 }
 0xd9d   : > { %v5653_v27 = vmax.f32 %v3209_v34, 0.0 }
 0xd9e   : > { %4063 = vrsqrt.f32 %v3210_v9  ;;  %vm3214_vm1 = vcmp.eq.f32.partialorder %v3210_v9, inf  ;;  %vm3216_vm2 = vcmp.eq.f32.partialorder %v3210_v9, 0.0  ;;  %v3217_v55 = vand.u32 2147483648, %v3210_v9 }
 0xd9f   : > { %4065 = vrsqrt.f32 %v5653_v27  ;;  %v2039_v45 = vpop.xlane.xlu0 %2038  ;;  %vm3221_vm3 = vcmp.eq.f32.partialorder %v5653_v27, inf  ;;  %vm3223_vm5 = vcmp.eq.f32.partialorder %v5653_v27, 0.0  ;;  %v3224_v58 = vand.u32 2147483648, %v5653_v27 }
 0xda0   : > { %v2042_v59 = vpop.xlane.xlu1 %2041  ;;  %4067 = vrcp.f32 %v2345_v43  ;;  %v2362_v46 = vmul.f32 %v4052_v49, %v2039_v45 }
 0xda1   : > { %4069 = vrcp.f32 %v2350_v25  ;;  %v2363_v13 = vmul.f32 %v4054_v5, %v2042_v59 }
 0xda2   : > { %4071 = vrcp.f32 %v2346_v32  ;;  %v2404_v22 = vsel %vm2403_vm15, %v2362_v46, 0.0 }
 0xda3   : > { %v2054_v8 = vpop.xlane.xlu0 %2053  ;;  %4073 = vrcp.f32 %v2351_v52  ;;  %v2405_v28 = vsel %vm2403_vm15, %v2363_v13, 0.0 }
 0xda4   : > { %v2057_v11 = vpop.xlane.xlu1 %2056  ;;  %v2367_v18 = vmul.f32 %v4056_v10, %v2054_v8  ;;  %v2406_v20 = vadd.f32 %v2405_v28, %v2404_v22 }
 0xda5   : > { %v2368_v56 = vmul.f32 %v4058_v0, %v2057_v11 }
 0xda6   : > { %v2419_v12 = vsel %vm2403_vm15, %v2367_v18, 0.0 }
 0xda7   : > { %v2045_v54 = vpop.xlane.xlu0 %2044  ;;  %v2420_v15 = vsel %vm2403_vm15, %v2368_v56, 0.0 }
 0xda8   : > { %v4064_v50 = vpop.eup %4063  ;;  %v2060_v24 = vpop.xlane.xlu1 %2059  ;;  %v2364_v33 = vmul.f32 %v4060_v38, %v2045_v54  ;;  %v2421_v48 = vadd.f32 %v2420_v15, %v2419_v12 }
 0xda9   : > { %v4066_v35 = vpop.eup %4065  ;;  %v3213_v37 = vmul.f32 %v4064_v50, %v3210_v9  ;;  %v2369_v7 = vmul.f32 %v4062_v30, %v2060_v24 }
 0xdaa   : > { %v3220_v19 = vmul.f32 %v4066_v35, %v5653_v27  ;;  %v4068_v21 = vpop.eup %4067  ;;  %v2407_v29 = vsel %vm2403_vm15, %v2364_v33, 0.0 }
 0xdab   : > { %v2048_v61 = vpop.xlane.xlu0 %2047  ;;  %v3215_v23 = vsel %vm3214_vm1, %v3210_v9, %v3213_v37  ;;  %v4070_v14 = vpop.eup %4069  ;;  %v2422_v17 = vsel %vm2403_vm15, %v2369_v7, 0.0  ;;  %v2408_v42 = vadd.f32 %v2407_v29, %v2406_v20 }
 0xdac   : > { %v2365_v31 = vmul.f32 %v4068_v21, %v2048_v61  ;;  %v2063_v4 = vpop.xlane.xlu1 %2062  ;;  %v3218_v41 = vsel %vm3216_vm2, %v3217_v55, %v3215_v23  ;;  %v3222_v36 = vsel %vm3221_vm3, %v5653_v27, %v3220_v19  ;;  %v4072_v47 = vpop.eup %4071  ;;  %v2423_v57 = vadd.f32 %v2422_v17, %v2421_v48 }
 0xdad   : > { %v2370_v2 = vmul.f32 %v4070_v14, %v2063_v4  ;;  %v3226_v6 = vmul.f32 %v3218_v41, %v5480_v40  ;;  %v3225_v3 = vsel %vm3223_vm5, %v3224_v58, %v3222_v36  ;;  %v4074_v44 = vpop.eup %4073 }
 0xdae   : > { %v3227_v62 = vmul.f32 %v3225_v3, %v5480_v40  ;;  %v2409_v39 = vsel %vm2403_vm15, %v2365_v31, 0.0 }
 0xdaf   : > { %v2051_v53 = vpop.xlane.xlu0 %2050  ;;  %v3228_v63 = vmax.f32 %v3226_v6, 1e-08  ;;  %v2424_v9 = vsel %vm2403_vm15, %v2370_v2, 0.0  ;;  %v2410_v25 = vadd.f32 %v2409_v39, %v2408_v42 }
 0xdb0   : > { %v2366_v34 = vmul.f32 %v4072_v47, %v2051_v53  ;;  %v2066_v43 = vpop.xlane.xlu1 %2065  ;;  %v3229_v27 = vmax.f32 %v3227_v62, 1e-08  ;;  %v2425_v60 = vadd.f32 %v2424_v9, %v2423_v57 }
 0xdb1   : > { %v2371_v51 = vmul.f32 %v4074_v44, %v2066_v43  ;;  %4075 = vrcp.f32 %v3228_v63 }
 0xdb2   : > { %v2397_v40 = vsel %vm2382_vm6, %v2366_v34, 0.0  ;;  %4077 = vrcp.f32 %v3229_v27 }
 0xdb3   : > { %v2411_v26 = vsel %vm2403_vm15, %v2397_v40, 0.0  ;;  %v2402_v45 = vsel %vm2382_vm6, %v2371_v51, 0.0  ;;  %v3052_v38 = vpop.xlane.xlu0 %3051 }
 0xdb4   : > { %v2412_v59 = vadd.f32 %v2411_v26, %v2410_v25  ;;  %v2426_v32 = vsel %vm2403_vm15, %v2402_v45, 0.0  ;;  %v3055_v18 = vpop.xlane.xlu1 %3054 }
 0xdb5   : > { %v2427_v49 = vadd.f32 %v2426_v32, %v2425_v60 }
 0xdb6   : > { %v2413_v52 = vrot.slane %v2412_v59, 4 }
 0xdb7   : > { %v2428_v5 = vrot.slane %v2427_v49, 4 }
 0xdb8   : > { %v2414_v8 = vadd.f32 %v2413_v52, %v2412_v59 }
 0xdb9   : > { %v2429_v10 = vadd.f32 %v2428_v5, %v2427_v49 }
 0xdba   : > { %v2415_v0 = vrot.slane %v2414_v8, 2 }
 0xdbb   : > { %v4076_v11 = vpop.eup %4075  ;;  %v2430_v46 = vrot.slane %v2429_v10, 2 }
 0xdbc   : > { %v4078_v30 = vpop.eup %4077  ;;  %v3232_v13 = vmul.f32 %v4076_v11, %v3052_v38  ;;  %v2416_v56 = vadd.f32 %v2415_v0, %v2414_v8 }
 0xdbd   : > { %v3233_v54 = vmul.f32 %v4078_v30, %v3055_v18  ;;  %v2431_v1 = vadd.f32 %v2430_v46, %v2429_v10 }
 0xdbe   : > { %v3234_v50 = vsel %vm2403_vm15, %v3232_v13, 0.0  ;;  %v2417_v55 = vrot.slane %v2416_v56, 1 }
 0xdbf   : > { %v3235_v24 = vrot.slane %v3234_v50, 4  ;;  %v3241_v16 = vsel %vm2403_vm15, %v3233_v54, 0.0  ;;  %v2432_v7 = vrot.slane %v2431_v1, 1 }
 0xdc0   : > { %v3242_v35 = vrot.slane %v3241_v16, 4  ;;  %v2418_v28 = vadd.f32 %v2417_v55, %v2416_v56 }
 0xdc1   : > { %v3236_v37 = vadd.f32 %v3235_v24, %v3234_v50  ;;  %v2433_v61 = vadd.f32 %v2432_v7, %v2431_v1 }
 0xdc2   : > { %v3243_v33 = vadd.f32 %v3242_v35, %v3241_v16  ;;  %v2434_v31 = vmul.f32 0.027777778, %v2418_v28 }
 0xdc3   : > { %v3237_v19 = vrot.slane %v3236_v37, 2  ;;  %v2435_v41 = vmul.f32 0.027777778, %v2433_v61 }
 0xdc4   : > { %v3244_v58 = vrot.slane %v3243_v33, 2 }
 0xdc5   : > { %v3238_v21 = vadd.f32 %v3237_v19, %v3236_v37 }
 0xdc6   : > { %v3245_v22 = vadd.f32 %v3244_v58, %v3243_v33 }
 0xdc7   : > { %v3239_v12 = vrot.slane %v3238_v21, 1 }
 0xdc8   : > { %v3246_v23 = vrot.slane %v3245_v22, 1 }
 0xdc9   : > { %v3240_v14 = vadd.f32 %v3239_v12, %v3238_v21 }
 0xdca   : > { %v3247_v15 = vadd.f32 %v3246_v23, %v3245_v22 }
 0xdcb   : > { %v3248_v4 = vmul.f32 0.125, %v3240_v14 }
 0xdcc   : > { %v3249_v36 = vmul.f32 0.125, %v3247_v15 }
 0xdcd   : > { %v3250_v29 = vadd.f32 %v3248_v4, %v2434_v31 }
 0xdce   : > { %v3251_v2 = vadd.f32 %v3249_v36, %v2435_v41 }
 0xdd0   : > { %v3255_v6 = vsel %vm3254_vm7, %v3251_v2, %v3250_v29 }
 0xdd1   : > { %3258 = vst.msk [vmem:[%s424_s21] sm:$0x3] %vm3257_vm8, %v3255_v6 }
 0xdd2 PF: > { %s17_s26 = sadd.s32 1, %s4111_s26   ;;  %s5724_s24 = smov %s4107_s25 }
 0xdd3   : > { %p14_p5 = scmp.ge.s32.totalorder %s17_s26, 4   ;;  %s5725_s25 = smov %s5727_s27 }
 0xdd5   :  { %16 = sbr.rel (!%p14_p5) target bundleno = 2 (0x2), region = 96 }

</bundles_post_ra>
